<compile_context>
chip_gen: v7x
topology: tpu7x:2x2x1
jax: 0.10.0
libtpu: 0.0.40
codegen_flags: <defaults>
</compile_context>

<pallas_src>
import jax
import jax.numpy as jnp
from jax.experimental import pallas as pl
from jax.experimental.pallas import tpu as pltpu

# ---- static model dims (classifier input = 12*12*32, per the module) ----
KH = KW = 12
STRIDE = 4
PAD = 4
C_OUT = 32
H_IN = W_IN = 48          # (48 + 2*4 - 12)/4 + 1 = 12
OH = OW = 12
NPOS = OH * OW            # 144 output positions per sample
PATCH = KH * KW           # 144 patch features
PACK = 4                  # patch rows packed per matmul row (lane-dense output)
FEAT = C_OUT * NPOS       # 4608
HID = 512
NCLS = 10


# ---------------------------- Pallas kernels ----------------------------

def conv_bn_relu_kernel(p_ref, w_ref, shift_ref, o_ref):
    # Conv2d as a packed im2col matmul (bf16 in / f32 acc).  BN scale is folded
    # into w_ref at prep time, so only the shift + ReLU remain.  Output minor
    # dim is 128 -> full-lane unmasked stores.
    y = jnp.dot(p_ref[...], w_ref[...], preferred_element_type=jnp.float32)
    o_ref[...] = jnp.maximum(y + shift_ref[...], 0.0).astype(o_ref.dtype)


def classifier_kernel(feat_ref, w1_ref, b1_ref, w2_ref, b2_ref, out_ref):
    # Linear(4608->512) with w1 fully VMEM-resident (single K=4608 contraction),
    # ReLU -> (eval Dropout = identity) -> Linear(512->10) -> log_softmax.
    h = jnp.dot(feat_ref[...], w1_ref[...], preferred_element_type=jnp.float32)
    h = jnp.maximum(h + b1_ref[...], 0.0)
    logits = jnp.dot(h.astype(jnp.bfloat16), w2_ref[...],
                     preferred_element_type=jnp.float32) + b2_ref[...]
    m = jnp.max(logits, axis=-1, keepdims=True)
    s = logits - m
    out_ref[...] = s - jnp.log(jnp.sum(jnp.exp(s), axis=-1, keepdims=True))


# ---------------------------- wrappers / glue ----------------------------

def im2col_bf16(x):
    """x: (N, 1, 48, 48) f32 NCHW -> (N*144, 144) bf16 patch rows (stride 4, pad 4).

    Slice-based (space-to-depth + 9 contiguous slices), all in bf16: no gather,
    no f32 expanded patch matrix.
    """
    n = x.shape[0]
    xb = x[:, 0].astype(jnp.bfloat16)
    xp = jnp.pad(xb, ((0, 0), (PAD, PAD), (PAD, PAD)))             # (N, 56, 56)
    # space-to-depth: s2d[n, HB, WB, r, c] = xp[n, 4*HB + r, 4*WB + c]
    s2d = xp.reshape(n, 14, STRIDE, 14, STRIDE).transpose(0, 1, 3, 2, 4)
    # kernel offset (kh, kw) = (4*bi + r, 4*bj + c); patch pixel lives at block
    # (oh + bi, ow + bj), sub-position (r, c)  ->  9 contiguous slices.
    blks = jnp.stack(
        [s2d[:, bi:bi + OH, bj:bj + OW] for bi in range(3) for bj in range(3)],
        axis=3)                                                    # (N,12,12,9,4,4)
    blks = blks.reshape(n, OH, OW, 3, 3, STRIDE, STRIDE)           # (bi, bj, r, c)
    blks = blks.transpose(0, 1, 2, 3, 5, 4, 6)                     # (bi, r, bj, c)
    return blks.reshape(n * NPOS, PATCH)                           # feature = kh*12+kw


def conv_bn_relu(packed, w_blk, shift, *, rows_per_tile=2304):
    """packed: (N*36, 576) bf16 -> (N*36, 128) bf16.  Row-tiled, pipelined.

    2304 packed rows == 9216 patch rows == 64 samples per tile (~7 MB
    double-buffered VMEM), amortizing the ~0.35 us per-grid-step overhead.
    """
    rows = packed.shape[0]
    tm = rows if rows <= rows_per_tile else rows_per_tile   # rows is a multiple of 36
    grid = (pl.cdiv(rows, tm),)
    return pl.pallas_call(
        conv_bn_relu_kernel,
        out_shape=jax.ShapeDtypeStruct((rows, PACK * C_OUT), jnp.bfloat16),
        grid=grid,
        in_specs=[
            pl.BlockSpec((tm, PACK * PATCH), lambda i: (i, 0)),
            pl.BlockSpec((PACK * PATCH, PACK * C_OUT), lambda i: (0, 0)),
            pl.BlockSpec((1, PACK * C_OUT), lambda i: (0, 0)),
        ],
        out_specs=pl.BlockSpec((tm, PACK * C_OUT), lambda i: (i, 0)),
        compiler_params=pltpu.CompilerParams(
            dimension_semantics=("parallel",),   # both TCs on v7x when grid >= 2
            vmem_limit_bytes=32 << 20),          # explicit: v5e default is 16 MiB
    )(packed, w_blk, shift)


def classifier(feat, w1, b1, w2, b2, *, batch_tile=512):
    """feat: (N, 4608) bf16 -> log-probs (N, 10) f32.  w1 resident in VMEM."""
    n = feat.shape[0]
    tm = n if n <= batch_tile else batch_tile
    grid = (pl.cdiv(n, tm),)
    flops = 2 * n * FEAT * HID + 2 * n * HID * NCLS
    bytes_accessed = (n * FEAT * 2 + FEAT * HID * 2 + HID * NCLS * 2
                      + n * NCLS * 4 + (HID + NCLS) * 4)
    return pl.pallas_call(
        classifier_kernel,
        out_shape=jax.ShapeDtypeStruct((n, NCLS), jnp.float32),
        grid=grid,
        in_specs=[
            pl.BlockSpec((tm, FEAT), lambda i: (i, 0)),
            pl.BlockSpec((FEAT, HID), lambda i: (0, 0)),   # w1 stays resident
            pl.BlockSpec((1, HID), lambda i: (0, 0)),
            pl.BlockSpec((HID, NCLS), lambda i: (0, 0)),
            pl.BlockSpec((1, NCLS), lambda i: (0, 0)),
        ],
        out_specs=pl.BlockSpec((tm, NCLS), lambda i: (i, 0)),
        compiler_params=pltpu.CompilerParams(
            dimension_semantics=("parallel",),
            vmem_limit_bytes=48 << 20),          # ~14 MB actual @ tm=512; <= v7x 64 MiB
        cost_estimate=pl.CostEstimate(
            flops=flops, transcendentals=n * (NCLS + 1),
            bytes_accessed=bytes_accessed),
    )(feat, w1, b1, w2, b2)


def four_layer_sg_forward(x, kparams):
    n = x.shape[0]
    patches = im2col_bf16(x)                                    # (N*144, 144) bf16
    # Pack 4 patch rows per matmul row (free row-major reshape) -> lane-dense
    # (N*36, 576) x (576, 128) matmul with a 128-wide output.
    packed = patches.reshape(n * NPOS // PACK, PACK * PATCH)
    conv_out = conv_bn_relu(packed, kparams["conv_w_blk"], kparams["bn_shift"])
    # (N*36, 128) row-major == (N*144, 32) row-major == NHWC-collapsed features.
    # The NHWC->NCHW permutation is folded into w1's rows (prepare_kernel_params),
    # so no activation transpose is needed here.
    feat = conv_out.reshape(n, FEAT)
    return classifier(feat, kparams["w1"], kparams["b1"],
                      kparams["w2"], kparams["b2"])


# ---------------------------- params ----------------------------

def init_params(key):
    """Canonical (torch-layout, f32) parameters."""
    ks = jax.random.split(key, 10)
    return dict(
        conv_w=jax.random.normal(ks[0], (C_OUT, 1, KH, KW), jnp.float32) * 0.05,
        conv_b=jax.random.normal(ks[1], (C_OUT,), jnp.float32) * 0.05,
        gamma=1.0 + 0.1 * jax.random.normal(ks[2], (C_OUT,), jnp.float32),
        beta=0.1 * jax.random.normal(ks[3], (C_OUT,), jnp.float32),
        run_mean=0.1 * jax.random.normal(ks[4], (C_OUT,), jnp.float32),
        run_var=jnp.abs(1.0 + 0.1 * jax.random.normal(ks[5], (C_OUT,), jnp.float32)),
        eps=1e-5,
        # w1 rows in torch/NCHW flatten order (c*144 + oh*12 + ow):
        w1=(jax.random.normal(ks[6], (HID, FEAT), jnp.float32) * 0.02).T,  # (FEAT, HID)
        b1=jax.random.normal(ks[7], (HID,), jnp.float32) * 0.02,
        w2=(jax.random.normal(ks[8], (NCLS, HID), jnp.float32) * 0.02).T,  # (HID, NCLS)
        b2=jax.random.normal(ks[9], (NCLS,), jnp.float32) * 0.02,
    )


def prepare_kernel_params(p):
    """One-time prep: fold BN scale into conv weights, build the block-diagonal
    (576, 128) packed conv matrix, fold the NHWC->NCHW permutation into w1,
    cast matmul operands to bf16."""
    scale = p["gamma"] / jnp.sqrt(p["run_var"] + p["eps"])            # (32,)
    shift = scale * (p["conv_b"] - p["run_mean"]) + p["beta"]         # (32,)
    w_scaled = p["conv_w"].reshape(C_OUT, PATCH).T * scale[None, :]   # (144, 32) f32
    # Block-diagonal packing: packed row holds 4 consecutive patch rows, so the
    # weight is 4 copies of w_scaled on the diagonal -> (576, 128).
    w_blk = jnp.zeros((PACK * PATCH, PACK * C_OUT), jnp.float32)
    for i in range(PACK):
        w_blk = w_blk.at[i * PATCH:(i + 1) * PATCH,
                         i * C_OUT:(i + 1) * C_OUT].set(w_scaled)
    shift_blk = jnp.tile(shift.reshape(1, C_OUT), (1, PACK))          # (1, 128)
    # w1_kernel[pos*32 + c, :] = w1_nchw[c*144 + pos, :]
    idx = jnp.arange(FEAT)
    pos, c = idx // C_OUT, idx % C_OUT
    w1_nhwc = p["w1"][c * NPOS + pos, :]
    return dict(
        conv_w_blk=w_blk.astype(jnp.bfloat16),           # (576, 128) bf16
        bn_shift=shift_blk.astype(jnp.float32),          # (1, 128) f32
        w1=w1_nhwc.astype(jnp.bfloat16),                 # (4608, 512) bf16, permuted rows
        b1=p["b1"].reshape(1, HID).astype(jnp.float32),
        w2=p["w2"].astype(jnp.bfloat16),                 # (512, 10) bf16
        b2=p["b2"].reshape(1, NCLS).astype(jnp.float32),
    )


def reference_forward(x, p):
    """Pure-JAX reference of the same eval forward (bf16 matmul inputs, f32 accum,
    BN scale folded into the bf16 conv weights like the kernel), but using the
    ORIGINAL NCHW feature ordering and unpermuted w1 — this validates both the
    w1 row-permutation fold and the block-diagonal lane-dense packing."""
    n = x.shape[0]
    scale = p["gamma"] / jnp.sqrt(p["run_var"] + p["eps"])
    shift = (scale * (p["conv_b"] - p["run_mean"]) + p["beta"]).reshape(1, C_OUT)
    wc = (p["conv_w"].reshape(C_OUT, PATCH).T * scale[None, :]).astype(jnp.bfloat16)
    patches = im2col_bf16(x)                                           # (N*144, 144) bf16
    conv = jnp.maximum(
        jnp.dot(patches, wc, preferred_element_type=jnp.float32) + shift, 0.0)
    feat = (conv.reshape(n, OH, OW, C_OUT).transpose(0, 3, 1, 2)
                .reshape(n, FEAT).astype(jnp.bfloat16))                # torch x.view(N,-1) order
    h = jnp.maximum(
        jnp.dot(feat, p["w1"].astype(jnp.bfloat16),
                preferred_element_type=jnp.float32) + p["b1"], 0.0)
    logits = jnp.dot(h.astype(jnp.bfloat16), p["w2"].astype(jnp.bfloat16),
                     preferred_element_type=jnp.float32) + p["b2"]
    return jax.nn.log_softmax(logits, axis=-1)


if __name__ == "__main__":
    key = jax.random.PRNGKey(0)
    k_x, k_p = jax.random.split(key)
    x = jax.random.normal(k_x, (2, 1, H_IN, W_IN), jnp.float32)   # NCHW, batch=2
    params = init_params(k_p)
    kparams = prepare_kernel_params(params)

    fwd = jax.jit(four_layer_sg_forward)
    out = jax.block_until_ready(fwd(x, kparams))
    ref = jax.block_until_ready(reference_forward(x, params))

    assert out.shape == (2, NCLS)
    assert bool(jnp.all(jnp.isfinite(out)))
    assert bool(jnp.allclose(out, ref, atol=2e-3, rtol=2e-3))
    print("KERNEL_OK")
</pallas_src>

<mosaic_0001>
module attributes {stable_mosaic.version = 11 : i64} {
  func.func @conv_bn_relu_kernel(%arg0: i32, %arg1: memref<72x576xbf16, #tpu.memory_space<vmem>>, %arg2: memref<576x128xbf16, #tpu.memory_space<vmem>>, %arg3: memref<1x128xf32, #tpu.memory_space<vmem>>, %arg4: memref<72x128xbf16, #tpu.memory_space<vmem>>) attributes {dimension_semantics = [#tpu.dimension_semantics<parallel>], iteration_bounds = array<i64: 1>, scalar_prefetch = 0 : i64, scratch_operands = 0 : i64, tpu.core_type = #tpu.core_type<tc>, window_params = [{transform_indices = @transform_0, window_bounds = array<i64: 72, 576>}, {pipeline_mode = #tpu.pipeline_mode<synchronous>, transform_indices = @transform_1, window_bounds = array<i64: 576, 128>}, {pipeline_mode = #tpu.pipeline_mode<synchronous>, transform_indices = @transform_2, window_bounds = array<i64: 1, 128>}, {transform_indices = @transform_3, window_bounds = array<i64: 72, 128>}]} {
    %c0 = arith.constant 0 : index
    %c0_0 = arith.constant 0 : index
    %0 = vector.load %arg1[%c0, %c0_0] : memref<72x576xbf16, #tpu.memory_space<vmem>>, vector<72x576xbf16>
    %c0_1 = arith.constant 0 : index
    %c0_2 = arith.constant 0 : index
    %1 = vector.load %arg2[%c0_1, %c0_2] : memref<576x128xbf16, #tpu.memory_space<vmem>>, vector<576x128xbf16>
    %cst = arith.constant dense<0.000000e+00> : vector<72x128xf32>
    %2 = tpu.matmul %0, %1, %cst {dimension_numbers = #tpu.dot_dimension_numbers<[1], [0], [0], [1], [0, 0, 1, 1], [], []>} : vector<72x576xbf16>, vector<576x128xbf16>, vector<72x128xf32> -> vector<72x128xf32>
    %c0_3 = arith.constant 0 : index
    %c0_4 = arith.constant 0 : index
    %3 = vector.load %arg3[%c0_3, %c0_4] : memref<1x128xf32, #tpu.memory_space<vmem>>, vector<1x128xf32>
    %4 = vector.broadcast %3 : vector<1x128xf32> to vector<72x128xf32>
    %5 = arith.addf %2, %4 : vector<72x128xf32>
    %cst_5 = arith.constant 0.000000e+00 : f32
    %6 = vector.broadcast %cst_5 : f32 to vector<72x128xf32>
    %7 = arith.maximumf %5, %6 : vector<72x128xf32>
    %8 = arith.truncf %7 : vector<72x128xf32> to vector<72x128xbf16>
    %c0_6 = arith.constant 0 : index
    %c0_7 = arith.constant 0 : index
    %9 = vector.load %arg4[%c0_6, %c0_7] : memref<72x128xbf16, #tpu.memory_space<vmem>>, vector<72x128xbf16>
    tpu.vector_store %arg4[%c0_6, %c0_7], %8 {strides = array<i32>} : memref<72x128xbf16, #tpu.memory_space<vmem>>, vector<72x128xbf16>,
    return
  }
  func.func @transform_0(%arg0: i32) -> (i32, i32) {
    %c0_i32 = arith.constant 0 : i32
    %c0_i32_0 = arith.constant 0 : i32
    return %arg0, %c0_i32 : i32, i32
  }
  func.func @transform_1(%arg0: i32) -> (i32, i32) {
    %c0_i32 = arith.constant 0 : i32
    %c0_i32_0 = arith.constant 0 : i32
    %c0_i32_1 = arith.constant 0 : i32
    return %c0_i32, %c0_i32_0 : i32, i32
  }
  func.func @transform_2(%arg0: i32) -> (i32, i32) {
    %c0_i32 = arith.constant 0 : i32
    %c0_i32_0 = arith.constant 0 : i32
    %c0_i32_1 = arith.constant 0 : i32
    return %c0_i32, %c0_i32_0 : i32, i32
  }
  func.func @transform_3(%arg0: i32) -> (i32, i32) {
    %c0_i32 = arith.constant 0 : i32
    %c0_i32_0 = arith.constant 0 : i32
    return %arg0, %c0_i32 : i32, i32
  }
}

module attributes {stable_mosaic.version = 11 : i64} {
  func.func @classifier_kernel(%arg0: i32, %arg1: memref<2x4608xbf16, #tpu.memory_space<vmem>>, %arg2: memref<4608x512xbf16, #tpu.memory_space<vmem>>, %arg3: memref<1x512xf32, #tpu.memory_space<vmem>>, %arg4: memref<512x10xbf16, #tpu.memory_space<vmem>>, %arg5: memref<1x10xf32, #tpu.memory_space<vmem>>, %arg6: memref<2x10xf32, #tpu.memory_space<vmem>>) attributes {dimension_semantics = [#tpu.dimension_semantics<parallel>], iteration_bounds = array<i64: 1>, scalar_prefetch = 0 : i64, scratch_operands = 0 : i64, tpu.core_type = #tpu.core_type<tc>, window_params = [{transform_indices = @transform_0, window_bounds = array<i64: 2, 4608>}, {pipeline_mode = #tpu.pipeline_mode<synchronous>, transform_indices = @transform_1, window_bounds = array<i64: 4608, 512>}, {pipeline_mode = #tpu.pipeline_mode<synchronous>, transform_indices = @transform_2, window_bounds = array<i64: 1, 512>}, {pipeline_mode = #tpu.pipeline_mode<synchronous>, transform_indices = @transform_3, window_bounds = array<i64: 512, 10>}, {pipeline_mode = #tpu.pipeline_mode<synchronous>, transform_indices = @transform_4, window_bounds = array<i64: 1, 10>}, {transform_indices = @transform_5, window_bounds = array<i64: 2, 10>}]} {
    %c0 = arith.constant 0 : index
    %c0_0 = arith.constant 0 : index
    %0 = vector.load %arg1[%c0, %c0_0] : memref<2x4608xbf16, #tpu.memory_space<vmem>>, vector<2x4608xbf16>
    %c0_1 = arith.constant 0 : index
    %c0_2 = arith.constant 0 : index
    %1 = vector.load %arg2[%c0_1, %c0_2] : memref<4608x512xbf16, #tpu.memory_space<vmem>>, vector<4608x512xbf16>
    %cst = arith.constant dense<0.000000e+00> : vector<2x512xf32>
    %2 = tpu.matmul %0, %1, %cst {dimension_numbers = #tpu.dot_dimension_numbers<[1], [0], [0], [1], [0, 0, 1, 1], [], []>} : vector<2x4608xbf16>, vector<4608x512xbf16>, vector<2x512xf32> -> vector<2x512xf32>
    %c0_3 = arith.constant 0 : index
    %c0_4 = arith.constant 0 : index
    %3 = vector.load %arg3[%c0_3, %c0_4] : memref<1x512xf32, #tpu.memory_space<vmem>>, vector<1x512xf32>
    %4 = vector.broadcast %3 : vector<1x512xf32> to vector<2x512xf32>
    %5 = arith.addf %2, %4 : vector<2x512xf32>
    %cst_5 = arith.constant 0.000000e+00 : f32
    %6 = vector.broadcast %cst_5 : f32 to vector<2x512xf32>
    %7 = arith.maximumf %5, %6 : vector<2x512xf32>
    %8 = arith.truncf %7 : vector<2x512xf32> to vector<2x512xbf16>
    %c0_6 = arith.constant 0 : index
    %c0_7 = arith.constant 0 : index
    %9 = vector.load %arg4[%c0_6, %c0_7] : memref<512x10xbf16, #tpu.memory_space<vmem>>, vector<512x10xbf16>
    %cst_8 = arith.constant dense<0.000000e+00> : vector<2x10xf32>
    %10 = tpu.matmul %8, %9, %cst_8 {dimension_numbers = #tpu.dot_dimension_numbers<[1], [0], [0], [1], [0, 0, 1, 1], [], []>} : vector<2x512xbf16>, vector<512x10xbf16>, vector<2x10xf32> -> vector<2x10xf32>
    %c0_9 = arith.constant 0 : index
    %c0_10 = arith.constant 0 : index
    %11 = vector.load %arg5[%c0_9, %c0_10] : memref<1x10xf32, #tpu.memory_space<vmem>>, vector<1x10xf32>
    %12 = vector.broadcast %11 : vector<1x10xf32> to vector<2x10xf32>
    %13 = arith.addf %10, %12 : vector<2x10xf32>
    %cst_11 = arith.constant dense<0xFF800000> : vector<2xf32>
    %14 = vector.multi_reduction <maximumf>, %13, %cst_11 [1] : vector<2x10xf32> to vector<2xf32>
    %15 = vector.shape_cast %14 : vector<2xf32> to vector<2x1xf32>
    %16 = vector.broadcast %15 : vector<2x1xf32> to vector<2x10xf32>
    %17 = arith.subf %13, %16 : vector<2x10xf32>
    %18 = math.exp %17 : vector<2x10xf32>
    %cst_12 = arith.constant dense<0.000000e+00> : vector<2xf32>
    %19 = vector.multi_reduction <add>, %18, %cst_12 [1] : vector<2x10xf32> to vector<2xf32>
    %20 = vector.shape_cast %19 : vector<2xf32> to vector<2x1xf32>
    %21 = math.log %20 : vector<2x1xf32>
    %22 = vector.broadcast %21 : vector<2x1xf32> to vector<2x10xf32>
    %23 = arith.subf %17, %22 : vector<2x10xf32>
    %c0_13 = arith.constant 0 : index
    %c0_14 = arith.constant 0 : index
    %24 = vector.load %arg6[%c0_13, %c0_14] : memref<2x10xf32, #tpu.memory_space<vmem>>, vector<2x10xf32>
    tpu.vector_store %arg6[%c0_13, %c0_14], %23 {strides = array<i32>} : memref<2x10xf32, #tpu.memory_space<vmem>>, vector<2x10xf32>,
    return
  }
  func.func @transform_0(%arg0: i32) -> (i32, i32) {
    %c0_i32 = arith.constant 0 : i32
    %c0_i32_0 = arith.constant 0 : i32
    return %arg0, %c0_i32 : i32, i32
  }
  func.func @transform_1(%arg0: i32) -> (i32, i32) {
    %c0_i32 = arith.constant 0 : i32
    %c0_i32_0 = arith.constant 0 : i32
    %c0_i32_1 = arith.constant 0 : i32
    return %c0_i32, %c0_i32_0 : i32, i32
  }
  func.func @transform_2(%arg0: i32) -> (i32, i32) {
    %c0_i32 = arith.constant 0 : i32
    %c0_i32_0 = arith.constant 0 : i32
    %c0_i32_1 = arith.constant 0 : i32
    return %c0_i32, %c0_i32_0 : i32, i32
  }
  func.func @transform_3(%arg0: i32) -> (i32, i32) {
    %c0_i32 = arith.constant 0 : i32
    %c0_i32_0 = arith.constant 0 : i32
    %c0_i32_1 = arith.constant 0 : i32
    return %c0_i32, %c0_i32_0 : i32, i32
  }
  func.func @transform_4(%arg0: i32) -> (i32, i32) {
    %c0_i32 = arith.constant 0 : i32
    %c0_i32_0 = arith.constant 0 : i32
    %c0_i32_1 = arith.constant 0 : i32
    return %c0_i32, %c0_i32_0 : i32, i32
  }
  func.func @transform_5(%arg0: i32) -> (i32, i32) {
    %c0_i32 = arith.constant 0 : i32
    %c0_i32_0 = arith.constant 0 : i32
    return %arg0, %c0_i32 : i32, i32
  }
}

</mosaic_0001>

<bundles_post_ra>
// kernel: four_layer_sg_forward.2
= control target key start
LH: loop header
LB: loop body
LE: loop exit
PB: predicated region body
PF: predicated region fallthrough
CT: control target
= control target key end

     0   :  { %v1061_v34 = vmov 0.0   ;;  %vm1062_vm0 = vmmov 0   ;;  %vm454_vm1 = vcmask 523264   ;;  %s1320_s1 = inlined_call_operand.vmem [shape: bf16[576,128], index: 1, kind: input, shape index: {}]   ;;  %s1321_s0 = inlined_call_operand.vmem [shape: bf16[72,576], index: 0, kind: input, shape index: {}]   ;;  %s1322_s2 = inlined_call_operand.vmem [shape: f32[1,128], index: 2, kind: input, shape index: {}]   ;;  %s1323_s3 = inlined_call_operand.vmem [shape: bf16[72,128], index: 3, kind: output, shape index: {}]  }
   0x1   :  { %v992_v0 = vld [vmem:[%s1320_s1 + $0x40] sm:$0xff]   ;;  %v996_v4 = vld [vmem:[%s1320_s1 + $0x48] sm:$0xff]   ;;  %v1000_v8 = vld [vmem:[%s1320_s1 + $0x50] sm:$0xff]  }
   0x2   :  { %v993_v1 = vld [vmem:[%s1320_s1 + $0xc0] sm:$0xff]   ;;  %853 = vmatprep.subr.bf16.mxu0 %v992_v0  ;;  %v997_v5 = vld [vmem:[%s1320_s1 + $0xc8] sm:$0xff]   ;;  %v1001_v9 = vld [vmem:[%s1320_s1 + $0xd0] sm:$0xff]  }
   0x3   :  { %v994_v2 = vld [vmem:[%s1320_s1] sm:$0xff]   ;;  %899 = vmatprep.subr.bf16.mxu1 %v993_v1  ;;  %v998_v6 = vld [vmem:[%s1320_s1 + $0x8] sm:$0xff]   ;;  %v1002_v10 = vld [vmem:[%s1320_s1 + $0x10] sm:$0xff]  }
   0x4   :  { %v995_v3 = vld [vmem:[%s1320_s1 + $0x80] sm:$0xff]   ;;  %854 = vmatpush3.bf16.msra.mxu0 %v994_v2  ;;  %v999_v7 = vld [vmem:[%s1320_s1 + $0x88] sm:$0xff]   ;;  %v1003_v11 = vld [vmem:[%s1320_s1 + $0x90] sm:$0xff]  }
   0x5   :  { %900 = vmatpush3.bf16.msra.mxu1 %v995_v3  ;;  %855 = vmatprep.subr.bf16.mxu0 %v996_v4  ;;  %v1004_v12 = vld [vmem:[%s1320_s1 + $0x58] sm:$0xff]   ;;  %v1008_v16 = vld [vmem:[%s1320_s1 + $0x60] sm:$0xff]   ;;  %v1012_v20 = vld [vmem:[%s1320_s1 + $0x68] sm:$0xff]  }
   0x6   :  { %901 = vmatprep.subr.bf16.mxu1 %v997_v5  ;;  %v1005_v13 = vld [vmem:[%s1320_s1 + $0xd8] sm:$0xff]   ;;  %v1009_v17 = vld [vmem:[%s1320_s1 + $0xe0] sm:$0xff]   ;;  %v1013_v21 = vld [vmem:[%s1320_s1 + $0xe8] sm:$0xff]  }
   0x7   :  { %v1006_v14 = vld [vmem:[%s1320_s1 + $0x18] sm:$0xff]   ;;  %v1010_v18 = vld [vmem:[%s1320_s1 + $0x20] sm:$0xff]   ;;  %v1014_v22 = vld [vmem:[%s1320_s1 + $0x28] sm:$0xff]  }
   0x8   :  { %856 = vmatpush3.bf16.msra.mxu0 %v998_v6  ;;  %v1007_v15 = vld [vmem:[%s1320_s1 + $0x98] sm:$0xff]   ;;  %v1011_v19 = vld [vmem:[%s1320_s1 + $0xa0] sm:$0xff]   ;;  %v1015_v23 = vld [vmem:[%s1320_s1 + $0xa8] sm:$0xff]  }
   0x9   :  { %902 = vmatpush3.bf16.msra.mxu1 %v999_v7  ;;  %857 = vmatprep.subr.bf16.mxu0 %v1000_v8  ;;  %v1016_v24 = vld [vmem:[%s1320_s1 + $0x70] sm:$0xff]   ;;  %v1020_v28 = vld [vmem:[%s1320_s1 + $0x78] sm:$0xff]   ;;  %v1029_v36 = vld [vmem:[%s1321_s0 + $0xc] ss:$20 sps:$4 sm:$0xff]  }
   0xa   :  { %903 = vmatprep.subr.bf16.mxu1 %v1001_v9  ;;  %v1017_v25 = vld [vmem:[%s1320_s1 + $0xf0] sm:$0xff]   ;;  %v1021_v29 = vld [vmem:[%s1320_s1 + $0xf8] sm:$0xff]   ;;  %v1030_v37 = vld [vmem:[%s1320_s1 + $0x100] sm:$0xff]   ;;  %574 = vmatprep.mubr.bf16.mxu1 %v1029_v36 }
   0xb   :  { %v1018_v26 = vld [vmem:[%s1320_s1 + $0x30] sm:$0xff]   ;;  %v1022_v30 = vld [vmem:[%s1320_s1 + $0x38] sm:$0xff]   ;;  %v1031_v38 = vld [vmem:[%s1321_s0 + $0x2c] ss:$20 sps:$4 sm:$0xff]  }
   0xc   :  { %858 = vmatpush3.bf16.msra.mxu0 %v1002_v10  ;;  %v1019_v27 = vld [vmem:[%s1320_s1 + $0xb0] sm:$0xff]   ;;  %v1023_v31 = vld [vmem:[%s1320_s1 + $0xb8] sm:$0xff]   ;;  %v1037_v40 = vld [vmem:[%s1320_s1 + $0x108] sm:$0xff]  }
   0xd   :  { %904 = vmatpush3.bf16.msra.mxu1 %v1003_v11  ;;  %859 = vmatprep.subr.bf16.mxu0 %v1004_v12  ;;  %v1024_v32 = vld [vmem:[%s1321_s0] ss:$20 sps:$4 sm:$0xff]   ;;  %v1026_v33 = vld [vmem:[%s1321_s0 + $0x4] ss:$20 sps:$4 sm:$0xff]   ;;  %v1027_v35 = vld [vmem:[%s1321_s0 + $0x8] ss:$20 sps:$4 sm:$0xff]  }
   0xe   :  { %905 = vmatprep.subr.bf16.mxu1 %v1005_v13  ;;  %502 = vmatprep.mubr.bf16.mxu0 %v1026_v33  ;;  %v1033_v39 = vld [vmem:[%s1321_s0 + $0x34] ss:$20 sps:$4 sm:$0xff]   ;;  %v1036_v42 = vld [vmem:[%s1321_s0 + $0x30] ss:$20 sps:$4 sm:$0xff]   ;;  %v1053_v47 = vld [vmem:[%s1320_s1 + $0x118] sm:$0xff]  }
   0xf   :  { %v1035_v41 = vld [vmem:[%s1321_s0 + $0x28] ss:$20 sps:$4 sm:$0xff]   ;;  %v1044_v45 = vld [vmem:[%s1320_s1 + $0x110] sm:$0xff]   ;;  %v1043_v48 = vld [vmem:[%s1321_s0 + $0x58] ss:$20 sps:$4 sm:$0xff]  }
  0x10   :  { %860 = vmatpush3.bf16.msra.mxu0 %v1006_v14  ;;  %v1038_v43 = vld [vmem:[%s1321_s0 + $0x54] ss:$20 sps:$4 sm:$0xff]   ;;  %v1040_v44 = vld [vmem:[%s1321_s0 + $0x5c] ss:$20 sps:$4 sm:$0xff]   ;;  %v1047_v50 = vld [vmem:[%s1321_s0 + $0x84] ss:$20 sps:$4 sm:$0xff]  }
  0x11   :  { %906 = vmatpush3.bf16.msra.mxu1 %v1007_v15  ;;  %861 = vmatprep.subr.bf16.mxu0 %v1008_v16  ;;  %v1042_v46 = vld [vmem:[%s1321_s0 + $0x50] ss:$20 sps:$4 sm:$0xff]   ;;  %v40_v52 = vld [vmem:[%s1321_s0 + $0xa8] sm:$0xff]  ;;  %v1050_v54 = vld [vmem:[%s1321_s0 + $0x80] ss:$20 sps:$4 sm:$0xff]  }
  0x12   :  { %907 = vmatprep.subr.bf16.mxu1 %v1009_v17  ;;  %v1045_v49 = vld [vmem:[%s1321_s0 + $0x7c] ss:$20 sps:$4 sm:$0xff]   ;;  %v39_v51 = vld [vmem:[%s1321_s0 + $0xa0] sm:$0xff]  ;;  %v1049_v53 = vld [vmem:[%s1321_s0 + $0x78] ss:$20 sps:$4 sm:$0xff]   ;;  %v769_v56 = vcombine.high %v40_v52, %v40_v52  ;;  %v768_v58 = vcombine.low %v40_v52, %v40_v52 }
  0x13   :  { %v767_v55 = vcombine.high %v39_v51, %v39_v51  ;;  %v766_v57 = vcombine.low %v39_v51, %v39_v51  ;;  %v1056_v59 = vld [vmem:[%s1321_s0 + $0x10] ss:$20 sps:$4 sm:$0xff]   ;;  %v1057_v60 = vld [vmem:[%s1321_s0 + $0x88] ss:$20 sps:$4 sm:$0xff]   ;;  %v1058_v61 = vld [vmem:[%s1321_s0 + $0x38] ss:$20 sps:$4 sm:$0xff]  }
  0x14   :  { %862 = vmatpush3.bf16.msra.mxu0 %v1010_v18  ;;  %v1059_v62 = vld [vmem:[%s1321_s0 + $0xb0] ss:$0 sps:$4 sm:$0xff]   ;;  %v1060_v63 = vld [vmem:[%s1321_s0 + $0x60] ss:$20 sps:$4 sm:$0xff]  }
  0x15   :  { %908 = vmatpush3.bf16.msra.mxu1 %v1011_v19  ;;  %863 = vmatprep.subr.bf16.mxu0 %v1012_v20  ;;  %v1276_v1 = vld [vmem:[%s1322_s2] ss:$0 sm:$0xff] }
  0x16   :  { %909 = vmatprep.subr.bf16.mxu1 %v1013_v21 }
  0x18   :  { %864 = vmatpush3.bf16.msra.mxu0 %v1014_v22 }
  0x19   :  { %910 = vmatpush3.bf16.msra.mxu1 %v1015_v23  ;;  %865 = vmatprep.subr.bf16.mxu0 %v1016_v24 }
  0x1a   :  { %911 = vmatprep.subr.bf16.mxu1 %v1017_v25 }
  0x1c   :  { %866 = vmatpush3.bf16.msra.mxu0 %v1018_v26 }
  0x1d   :  { %912 = vmatpush3.bf16.msra.mxu1 %v1019_v27  ;;  %867 = vmatprep.subr.bf16.mxu0 %v1020_v28 }
  0x1e   :  { %913 = vmatprep.subr.bf16.mxu1 %v1021_v29 }
  0x20   :  { %868 = vmatpush3.bf16.msra.mxu0 %v1022_v30 }
  0x21   :  { %914 = vmatpush3.bf16.msra.mxu1 %v1023_v31  ;;  %954 = vmatprep.subr.bf16.mxu0 %v1061_v34 }
  0x22   :  { %982 = vmatprep.subr.bf16.mxu1 %v1061_v34 }
  0x23   :  { %503 = vmatmul.mubr.bf16.vlgmr.msra.gmra.mrb[0].mxu0 %v1024_v32 }
  0x24   :  { %575 = vmatmul.mubr.bf16.vlgmr.msra.gmra.mrb[0].mxu1 %v1027_v35  ;;  %955 = vmatpush3.bf16.msra.mxu0 %v1030_v37 }
  0x25   :  { %510 = vmatprep.mubr.bf16.mxu0 %v1031_v38  ;;  %956 = vmatprep.subr.bf16.mxu0 %v1061_v34 }
  0x26   :  { %582 = vmatprep.mubr.bf16.mxu1 %v1033_v39  ;;  %986 = vmatpush3.bf16.msra.mxu1 %v1030_v37 }
  0x27   :  { %983 = vmatprep.subr.bf16.mxu1 %v1061_v34 }
  0x28   :  { %957 = vmatpush3.bf16.msra.mxu0 %v1037_v40 }
  0x29   :  { %958 = vmatprep.subr.bf16.mxu0 %v1061_v34 }
  0x2a   :  { %987 = vmatpush3.bf16.msra.mxu1 %v1037_v40 }
  0x2b   :  { %511 = vmatmul.mubr.bf16.gmra.mrb[4].mxu0 %v1035_v41  ;;  %984 = vmatprep.subr.bf16.mxu1 %v1061_v34 }
  0x2c   :  { %583 = vmatmul.mubr.bf16.gmra.mrb[4].mxu1 %v1036_v42  ;;  %518 = vmatprep.mubr.bf16.mxu0 %v1038_v43 }
  0x2d   :  { %590 = vmatprep.mubr.bf16.mxu1 %v1040_v44  ;;  %959 = vmatpush3.bf16.msra.mxu0 %v1044_v45 }
  0x2e   :  { %960 = vmatprep.subr.bf16.mxu0 %v1061_v34  ;;  %988 = vmatpush3.bf16.msra.mxu1 %v1044_v45 }
  0x2f   :  { %985 = vmatprep.subr.bf16.mxu1 %v1061_v34 }
  0x31   :  { %961 = vmatpush3.bf16.msra.mxu0 %v1053_v47 }
  0x32   :  { %989 = vmatpush3.bf16.msra.mxu1 %v1053_v47 }
  0x33   :  { %519 = vmatmul.mubr.bf16.gmra.mrb[8].mxu0 %v1042_v46 }
  0x34   :  { %591 = vmatmul.mubr.bf16.gmra.mrb[8].mxu1 %v1043_v48  ;;  %526 = vmatprep.mubr.bf16.mxu0 %v1045_v49 }
  0x35   :  { %598 = vmatprep.mubr.bf16.mxu1 %v1047_v50 }
  0x3b   :  { %527 = vmatmul.mubr.bf16.gmra.mrb[12].mxu0 %v1049_v53 }
  0x3c   :  { %599 = vmatmul.mubr.bf16.gmra.mrb[12].mxu1 %v1050_v54  ;;  %534 = vmatprep.mubr.bf16.mxu0 %v767_v55 }
  0x3d   :  { %606 = vmatprep.mubr.bf16.mxu1 %v769_v56 }
  0x43   :  { %535 = vmatmul.mubr.bf16.gmra.mrb[16].mxu0 %v766_v57 }
  0x44   :  { %607 = vmatmul.mubr.bf16.gmra.mrb[16].mxu1 %v768_v58  ;;  %962 = vmatprep.mubr.msk.bf16.mxu0 %vm1062_vm0, %v1061_v34 }
  0x45   :  { %974 = vmatprep.mubr.msk.bf16.mxu1 %vm1062_vm0, %v1061_v34 }
  0x4b   :  { %963 = vmatmul.mubr.msk.bf16.vlgmr.msra.gmra.mrb[20].mxu0 %vm454_vm1, %v1056_v59 }
  0x4c   :  { %975 = vmatmul.mubr.msk.bf16.vlgmr.msra.gmra.mrb[20].mxu1 %vm454_vm1, %v1057_v60  ;;  %966 = vmatprep.mubr.msk.bf16.mxu0 %vm1062_vm0, %v1061_v34 }
  0x4d   :  { %978 = vmatprep.mubr.msk.bf16.mxu1 %vm1062_vm0, %v1061_v34 }
  0x53   :  { %967 = vmatmul.mubr.msk.bf16.gmra.mrb[24].mxu0 %vm454_vm1, %v1058_v61 }
  0x54   :  { %979 = vmatmul.mubr.msk.bf16.gmra.mrb[24].mxu1 %vm454_vm1, %v1059_v62  ;;  %970 = vmatprep.mubr.msk.bf16.mxu0 %vm1062_vm0, %v1061_v34 }
  0x5b   :  { %971 = vmatmul.mubr.msk.bf16.gmra.mrb[28].mxu0 %vm454_vm1, %v1060_v63 }
  0xf6   :  { %v869_v0 = vpop.f32.mrb[0].mxu0 }
  0xf7   :  { %v870_v2 = vpop.f32.mrb[1].mxu0  ;;  %v915_v3 = vpop.f32.mrb[0].mxu1 }
  0xf8   :  { %v871_v4 = vadd.f32 %v870_v2, %v869_v0  ;;  %v872_v5 = vpop.f32.mrb[2].mxu0  ;;  %v916_v6 = vpop.f32.mrb[1].mxu1 }
  0xf9   :  { %v873_v7 = vpop.f32.mrb[3].mxu0  ;;  %v917_v8 = vadd.f32 %v916_v6, %v915_v3  ;;  %v918_v9 = vpop.f32.mrb[2].mxu1 }
  0xfa   :  { %v505_v10 = vadd.f32 %v871_v4, %v1276_v1  ;;  %v874_v11 = vadd.f32 %v873_v7, %v872_v5  ;;  %v919_v12 = vpop.f32.mrb[3].mxu1 }
  0xfb   :  { %v920_v13 = vadd.f32 %v919_v12, %v918_v9 }
  0xfc   :  { %v508_v14 = vadd.f32 %v874_v11, %v1276_v1  ;;  %v1280_v15 = vadd.f32 %v917_v8, %v505_v10 }
  0xfe   :  { %v875_v16 = vpop.f32.mrb[4].mxu0  ;;  %v1282_v17 = vadd.f32 %v920_v13, %v508_v14 }
  0xff   :  { %v876_v18 = vpop.f32.mrb[5].mxu0  ;;  %v921_v19 = vpop.f32.mrb[4].mxu1 }
 0x100   :  { %v877_v20 = vadd.f32 %v876_v18, %v875_v16  ;;  %v878_v21 = vpop.f32.mrb[6].mxu0  ;;  %v922_v22 = vpop.f32.mrb[5].mxu1 }
 0x101   :  { %v879_v23 = vpop.f32.mrb[7].mxu0  ;;  %v923_v24 = vadd.f32 %v922_v22, %v921_v19  ;;  %v924_v25 = vpop.f32.mrb[6].mxu1 }
 0x102   :  { %v513_v26 = vadd.f32 %v877_v20, %v1276_v1  ;;  %v880_v27 = vadd.f32 %v879_v23, %v878_v21  ;;  %v925_v28 = vpop.f32.mrb[7].mxu1 }
 0x103   :  { %v926_v29 = vadd.f32 %v925_v28, %v924_v25 }
 0x104   :  { %v516_v30 = vadd.f32 %v880_v27, %v1276_v1  ;;  %v1286_v31 = vadd.f32 %v923_v24, %v513_v26 }
 0x106   :  { %v881_v32 = vpop.f32.mrb[8].mxu0  ;;  %v1288_v33 = vadd.f32 %v926_v29, %v516_v30 }
 0x107   :  { %v882_v34 = vpop.f32.mrb[9].mxu0  ;;  %v927_v35 = vpop.f32.mrb[8].mxu1 }
 0x108   :  { %v883_v36 = vadd.f32 %v882_v34, %v881_v32  ;;  %v884_v37 = vpop.f32.mrb[10].mxu0  ;;  %v928_v38 = vpop.f32.mrb[9].mxu1 }
 0x109   :  { %v885_v39 = vpop.f32.mrb[11].mxu0  ;;  %v929_v40 = vadd.f32 %v928_v38, %v927_v35  ;;  %v930_v41 = vpop.f32.mrb[10].mxu1 }
 0x10a   :  { %v521_v42 = vadd.f32 %v883_v36, %v1276_v1  ;;  %v886_v43 = vadd.f32 %v885_v39, %v884_v37  ;;  %v931_v44 = vpop.f32.mrb[11].mxu1 }
 0x10b   :  { %v932_v45 = vadd.f32 %v931_v44, %v930_v41 }
 0x10c   :  { %v524_v46 = vadd.f32 %v886_v43, %v1276_v1  ;;  %v1292_v47 = vadd.f32 %v929_v40, %v521_v42 }
 0x10e   :  { %v887_v48 = vpop.f32.mrb[12].mxu0  ;;  %v1294_v49 = vadd.f32 %v932_v45, %v524_v46 }
 0x10f   :  { %v888_v50 = vpop.f32.mrb[13].mxu0  ;;  %v933_v51 = vpop.f32.mrb[12].mxu1 }
 0x110   :  { %v889_v52 = vadd.f32 %v888_v50, %v887_v48  ;;  %v890_v53 = vpop.f32.mrb[14].mxu0  ;;  %v934_v54 = vpop.f32.mrb[13].mxu1 }
 0x111   :  { %v891_v55 = vpop.f32.mrb[15].mxu0  ;;  %v935_v56 = vadd.f32 %v934_v54, %v933_v51  ;;  %v936_v57 = vpop.f32.mrb[14].mxu1 }
 0x112   :  { %v529_v58 = vadd.f32 %v889_v52, %v1276_v1  ;;  %v892_v59 = vadd.f32 %v891_v55, %v890_v53  ;;  %v937_v60 = vpop.f32.mrb[15].mxu1 }
 0x113   :  { %v938_v61 = vadd.f32 %v937_v60, %v936_v57 }
 0x114   :  { %v532_v62 = vadd.f32 %v892_v59, %v1276_v1  ;;  %v601_v63 = vadd.f32 %v935_v56, %v529_v58 }
 0x116   :  { %v893_v0 = vpop.f32.mrb[16].mxu0  ;;  %v604_v2 = vadd.f32 %v938_v61, %v532_v62 }
 0x117   :  { %v894_v3 = vpop.f32.mrb[17].mxu0  ;;  %v939_v4 = vpop.f32.mrb[16].mxu1 }
 0x118   :  { %v895_v5 = vadd.f32 %v894_v3, %v893_v0  ;;  %v896_v6 = vpop.f32.mrb[18].mxu0  ;;  %v940_v7 = vpop.f32.mrb[17].mxu1 }
 0x119   :  { %v897_v8 = vpop.f32.mrb[19].mxu0  ;;  %v941_v9 = vadd.f32 %v940_v7, %v939_v4  ;;  %v942_v10 = vpop.f32.mrb[18].mxu1 }
 0x11a   :  { %v537_v11 = vadd.f32 %v895_v5, %v1276_v1  ;;  %v943_v12 = vpop.f32.mrb[19].mxu1 }
 0x11c   :  { %v609_v13 = vadd.f32 %v941_v9, %v537_v11 }
 0x11e   :  { %v648_v14 = vpop.f32.mrb[20].mxu0 }
 0x11f   :  { %v649_v16 = vadd.f32 %v648_v14, %v1280_v15  ;;  %v672_v18 = vpop.f32.mrb[20].mxu1  ;;  %v964_v19 = vpop.f32.mrb[21].mxu0 }
 0x120   :  { %v673_v20 = vadd.f32 %v672_v18, %v601_v63  ;;  %v976_v21 = vpop.f32.mrb[21].mxu1  ;;  %v651_v22 = vpop.f32.mrb[22].mxu0 }
 0x121   :  { %v652_v23 = vadd.f32 %v651_v22, %v1282_v17  ;;  %v675_v24 = vpop.f32.mrb[22].mxu1  ;;  %v965_v25 = vpop.f32.mrb[23].mxu0  ;;  %v686_v28 = vmax.f32 %v649_v16, 0.0 }
 0x122   :  { %v676_v26 = vadd.f32 %v675_v24, %v604_v2  ;;  %v977_v27 = vpop.f32.mrb[23].mxu1  ;;  %v692_v30 = vmax.f32 %v673_v20, 0.0 }
 0x123   :  { %v687_v29 = vmax.f32 %v652_v23, 0.0 }
 0x124   :  { %v693_v1 = vmax.f32 %v676_v26, 0.0 }
 0x125   :  { %v833_v32 = vpack.c.bf16 %v687_v29, %v686_v28 }
 0x126   :  { %v848_v34 = vpack.c.bf16 %v693_v1, %v692_v30  ;;  %v656_v35 = vpop.f32.mrb[24].mxu0 }
 0x127   :  { %834 = vst [vmem:[%s1323_s3] sm:$0xff] %v833_v32   ;;  %v657_v15 = vadd.f32 %v656_v35, %v1286_v31  ;;  %v680_v36 = vpop.f32.mrb[24].mxu1  ;;  %v968_v37 = vpop.f32.mrb[25].mxu0 }
 0x128   :  { %852 = vst [vmem:[%s1323_s3 + $0x18] sm:$0xff] %v848_v34   ;;  %v681_v17 = vadd.f32 %v680_v36, %v609_v13  ;;  %v659_v38 = vpop.f32.mrb[26].mxu0  ;;  %v980_v39 = vpop.f32.mrb[25].mxu1 }
 0x129   :  { %v660_v40 = vadd.f32 %v659_v38, %v1288_v33  ;;  %v969_v41 = vpop.f32.mrb[27].mxu0  ;;  %v683_v42 = vpop.f32.mrb[26].mxu1  ;;  %v688_v45 = vmax.f32 %v657_v15, 0.0 }
 0x12a   :  { %v694_v43 = vmax.f32 %v681_v17, 0.0  ;;  %v981_v44 = vpop.f32.mrb[27].mxu1 }
 0x12b   :  { %v689_v46 = vmax.f32 %v660_v40, 0.0 }
 0x12c   :  { %v829_v48 = vpack.c.bf16 %v694_v43, %v694_v43 }
 0x12d   :  { %v838_v50 = vpack.c.bf16 %v689_v46, %v688_v45 }
 0x12e   :  { %740 = vst [vmem:[%s1323_s3 + $0x20] sm:$0xf] %v829_v48  ;;  %v664_v31 = vpop.f32.mrb[28].mxu0 }
 0x12f   :  { %850 = vst [vmem:[%s1323_s3 + $0x8] sm:$0xff] %v838_v50   ;;  %v665_v51 = vadd.f32 %v664_v31, %v1292_v47  ;;  %v972_v33 = vpop.f32.mrb[29].mxu0 }
 0x130   :  { %v667_v52 = vpop.f32.mrb[30].mxu0 }
 0x131   :  { %v668_v53 = vadd.f32 %v667_v52, %v1294_v49  ;;  %v973_v54 = vpop.f32.mrb[31].mxu0  ;;  %v690_v55 = vmax.f32 %v665_v51, 0.0 }
 0x133   :  { %v691_v56 = vmax.f32 %v668_v53, 0.0 }
 0x135   :  { %v843_v57 = vpack.c.bf16 %v691_v56, %v690_v55 }
 0x137   :  { %851 = vst [vmem:[%s1323_s3 + $0x10] sm:$0xff] %v843_v57  }

// kernel: four_layer_sg_forward.3
= control target key start
LH: loop header
LB: loop body
LE: loop exit
PB: predicated region body
PF: predicated region fallthrough
CT: control target
= control target key end

     0   :  { %v1181_v36 = vlaneseq  ;;  %v12245_v37 = vmov 1966171168   ;;  %s16056_s0 = inlined_call_operand.vmem [shape: bf16[2,4608], index: 0, kind: input, shape index: {}]   ;;  %s16057_s1 = inlined_call_operand.vmem [shape: bf16[4608,512], index: 1, kind: input, shape index: {}]   ;;  %s16058_s2 = inlined_call_operand.vmem [shape: f32[1,512], index: 2, kind: input, shape index: {}]   ;;  %s16059_s3 = inlined_call_operand.vmem [shape: bf16[512,10], index: 3, kind: input, shape index: {}]   ;;  %s16060_s4 = inlined_call_operand.vmem [shape: f32[1,10], index: 4, kind: input, shape index: {}]   ;;  %s16061_s5 = inlined_call_operand.hbm [shape: f32[2,10], index: 5, kind: output, shape index: {}]  }
   0x1   :  { %v10449_v0 = vld [vmem:[%s16057_s1 + $0x4] ss:$16 sps:$4 sm:$0xff]   ;;  %v10451_v1 = vld [vmem:[%s16057_s1 + $0xc] ss:$16 sps:$4 sm:$0xff]   ;;  %v10453_v2 = vld [vmem:[%s16057_s1] ss:$16 sps:$4 sm:$0xff]   ;;  %v1208_v38 = vunpack.c.l.s4 %v12245_v37 }
   0x2   :  { %7222 = vmatprep.subr.bf16.mxu0 %v10449_v0  ;;  %v10454_v3 = vld [vmem:[%s16057_s1 + $0x8] ss:$16 sps:$4 sm:$0xff]   ;;  %7960 = vmatprep.subr.bf16.mxu1 %v10451_v1  ;;  %v10455_v4 = vld [vmem:[%s16057_s1 + $0x24] ss:$16 sps:$4 sm:$0xff]   ;;  %v10457_v5 = vld [vmem:[%s16057_s1 + $0x2c] ss:$16 sps:$4 sm:$0xff]  }
   0x3   :  { %7223 = vmatpush1.bf16.msra.mxu0 %v10453_v2  ;;  %7961 = vmatpush1.bf16.msra.mxu1 %v10454_v3  ;;  %v10459_v6 = vld [vmem:[%s16057_s1 + $0x20] ss:$16 sps:$4 sm:$0xff]   ;;  %v10460_v7 = vld [vmem:[%s16057_s1 + $0x28] ss:$16 sps:$4 sm:$0xff]   ;;  %v10461_v8 = vld [vmem:[%s16057_s1 + $0x44] ss:$16 sps:$4 sm:$0xff]   ;;  %v1209_v43 = vunpack.c.0.s8 %v1208_v38 }
   0x4   :  { %7224 = vmatprep.subr.bf16.mxu0 %v10455_v4  ;;  %7962 = vmatprep.subr.bf16.mxu1 %v10457_v5  ;;  %v10463_v9 = vld [vmem:[%s16057_s1 + $0x4c] ss:$16 sps:$4 sm:$0xff]   ;;  %v10465_v10 = vld [vmem:[%s16057_s1 + $0x40] ss:$16 sps:$4 sm:$0xff]   ;;  %v10466_v11 = vld [vmem:[%s16057_s1 + $0x48] ss:$16 sps:$4 sm:$0xff]  }
   0x5   :  { %v10467_v12 = vld [vmem:[%s16057_s1 + $0x64] ss:$16 sps:$4 sm:$0xff]   ;;  %v10469_v13 = vld [vmem:[%s16057_s1 + $0x6c] ss:$16 sps:$4 sm:$0xff]   ;;  %v10471_v14 = vld [vmem:[%s16057_s1 + $0x60] ss:$16 sps:$4 sm:$0xff]  }
   0x6   :  { %v10472_v15 = vld [vmem:[%s16057_s1 + $0x68] ss:$16 sps:$4 sm:$0xff]   ;;  %v10473_v16 = vld [vmem:[%s16057_s1 + $0x84] ss:$16 sps:$4 sm:$0xff]   ;;  %v10475_v17 = vld [vmem:[%s16057_s1 + $0x8c] ss:$16 sps:$4 sm:$0xff]  }
   0x7   :  { %7225 = vmatpush1.bf16.msra.mxu0 %v10459_v6  ;;  %7963 = vmatpush1.bf16.msra.mxu1 %v10460_v7  ;;  %v10477_v18 = vld [vmem:[%s16057_s1 + $0x80] ss:$16 sps:$4 sm:$0xff]   ;;  %v10478_v19 = vld [vmem:[%s16057_s1 + $0x88] ss:$16 sps:$4 sm:$0xff]   ;;  %v10479_v20 = vld [vmem:[%s16057_s1 + $0xa4] ss:$16 sps:$4 sm:$0xff]  }
   0x8   :  { %7226 = vmatprep.subr.bf16.mxu0 %v10461_v8  ;;  %7964 = vmatprep.subr.bf16.mxu1 %v10463_v9  ;;  %v10481_v21 = vld [vmem:[%s16057_s1 + $0xac] ss:$16 sps:$4 sm:$0xff]   ;;  %v10483_v22 = vld [vmem:[%s16057_s1 + $0xa0] ss:$16 sps:$4 sm:$0xff]   ;;  %v10484_v23 = vld [vmem:[%s16057_s1 + $0xa8] ss:$16 sps:$4 sm:$0xff]  }
   0x9   :  { %v10485_v24 = vld [vmem:[%s16057_s1 + $0xc4] ss:$16 sps:$4 sm:$0xff]   ;;  %v10487_v25 = vld [vmem:[%s16057_s1 + $0xcc] ss:$16 sps:$4 sm:$0xff]   ;;  %v10489_v26 = vld [vmem:[%s16057_s1 + $0xc0] ss:$16 sps:$4 sm:$0xff]  }
   0xa   :  { %v10490_v27 = vld [vmem:[%s16057_s1 + $0xc8] ss:$16 sps:$4 sm:$0xff]   ;;  %v10491_v28 = vld [vmem:[%s16057_s1 + $0xe4] ss:$16 sps:$4 sm:$0xff]   ;;  %v10493_v29 = vld [vmem:[%s16057_s1 + $0xec] ss:$16 sps:$4 sm:$0xff]  }
   0xb   :  { %7227 = vmatpush1.bf16.msra.mxu0 %v10465_v10  ;;  %7965 = vmatpush1.bf16.msra.mxu1 %v10466_v11  ;;  %v10495_v30 = vld [vmem:[%s16057_s1 + $0xe0] ss:$16 sps:$4 sm:$0xff]   ;;  %v10496_v31 = vld [vmem:[%s16057_s1 + $0xe8] ss:$16 sps:$4 sm:$0xff]   ;;  %v10497_v32 = vld [vmem:[%s16057_s1 + $0x104] ss:$16 sps:$4 sm:$0xff]  }
   0xc   :  { %7228 = vmatprep.subr.bf16.mxu0 %v10467_v12  ;;  %7966 = vmatprep.subr.bf16.mxu1 %v10469_v13  ;;  %v10499_v33 = vld [vmem:[%s16057_s1 + $0x10c] ss:$16 sps:$4 sm:$0xff]   ;;  %v10501_v34 = vld [vmem:[%s16057_s1 + $0x100] ss:$16 sps:$4 sm:$0xff]   ;;  %v10502_v35 = vld [vmem:[%s16057_s1 + $0x108] ss:$16 sps:$4 sm:$0xff]  }
   0xd   :  { %v10503_v39 = vld [vmem:[%s16057_s1 + $0x124] ss:$16 sps:$4 sm:$0xff]   ;;  %v10505_v40 = vld [vmem:[%s16057_s1 + $0x12c] ss:$16 sps:$4 sm:$0xff]   ;;  %v10507_v41 = vld [vmem:[%s16057_s1 + $0x120] ss:$16 sps:$4 sm:$0xff]  }
   0xe   :  { %v12394_v42 = vshrl.u32 %v1181_v36, 7  ;;  %v10508_v44 = vld [vmem:[%s16057_s1 + $0x128] ss:$16 sps:$4 sm:$0xff]   ;;  %v10509_v45 = vld [vmem:[%s16057_s1 + $0x144] ss:$16 sps:$4 sm:$0xff]  }
   0xf   :  { %7229 = vmatpush1.bf16.msra.mxu0 %v10471_v14  ;;  %7967 = vmatpush1.bf16.msra.mxu1 %v10472_v15  ;;  %v10511_v46 = vld [vmem:[%s16057_s1 + $0x14c] ss:$16 sps:$4 sm:$0xff]   ;;  %v10513_v47 = vld [vmem:[%s16057_s1 + $0x140] ss:$16 sps:$4 sm:$0xff]   ;;  %v10514_v48 = vld [vmem:[%s16057_s1 + $0x148] ss:$16 sps:$4 sm:$0xff]  }
  0x10   :  { %7230 = vmatprep.subr.bf16.mxu0 %v10473_v16  ;;  %7968 = vmatprep.subr.bf16.mxu1 %v10475_v17  ;;  %v12412_v49 = vsub.s32 %v1209_v43, %v12394_v42  ;;  %v10515_v50 = vld [vmem:[%s16057_s1 + $0x164] ss:$16 sps:$4 sm:$0xff]   ;;  %v10517_v51 = vld [vmem:[%s16057_s1 + $0x16c] ss:$16 sps:$4 sm:$0xff]   ;;  %v10519_v53 = vld [vmem:[%s16057_s1 + $0x160] ss:$16 sps:$4 sm:$0xff]  }
  0x11   :  { %v12423_v52 = vld [vmem:[%s16056_s0] sm:$0xff]  ;;  %v10520_v55 = vld [vmem:[%s16057_s1 + $0x168] ss:$16 sps:$4 sm:$0xff]   ;;  %v10523_v57 = vld [vmem:[%s16057_s1 + $0x18c] ss:$16 sps:$4 sm:$0xff]  }
  0x12   :  { %v1213_v54 = vrot.slane %v12423_v52, %v12412_v49  ;;  %v10521_v56 = vld [vmem:[%s16057_s1 + $0x184] ss:$16 sps:$4 sm:$0xff]   ;;  %v10525_v59 = vld [vmem:[%s16057_s1 + $0x180] ss:$16 sps:$4 sm:$0xff]   ;;  %v10526_v61 = vld [vmem:[%s16057_s1 + $0x188] ss:$16 sps:$4 sm:$0xff]  }
  0x13   :  { %7231 = vmatpush1.bf16.msra.mxu0 %v10477_v18  ;;  %7969 = vmatpush1.bf16.msra.mxu1 %v10478_v19  ;;  %v10527_v62 = vld [vmem:[%s16057_s1 + $0x1a4] ss:$16 sps:$4 sm:$0xff]   ;;  %v10529_v63 = vld [vmem:[%s16057_s1 + $0x1ac] ss:$16 sps:$4 sm:$0xff]   ;;  %v10531_v0 = vld [vmem:[%s16057_s1 + $0x1a0] ss:$16 sps:$4 sm:$0xff]  }
  0x14   :  { %7232 = vmatprep.subr.bf16.mxu0 %v10479_v20  ;;  %7970 = vmatprep.subr.bf16.mxu1 %v10481_v21  ;;  %v1221_v58 = vcombine.high %v1213_v54, %v1213_v54  ;;  %v10532_v1 = vld [vmem:[%s16057_s1 + $0x1a8] ss:$16 sps:$4 sm:$0xff]   ;;  %v10533_v2 = vld [vmem:[%s16057_s1 + $0x1c4] ss:$16 sps:$4 sm:$0xff]   ;;  %v10535_v3 = vld [vmem:[%s16057_s1 + $0x1cc] ss:$16 sps:$4 sm:$0xff]   ;;  %v12492_v13 = vrot.slane %v1213_v54, %v12412_v49 }
  0x15   :  { %v10537_v4 = vld [vmem:[%s16057_s1 + $0x1c0] ss:$16 sps:$4 sm:$0xff]   ;;  %v10538_v5 = vld [vmem:[%s16057_s1 + $0x1c8] ss:$16 sps:$4 sm:$0xff]   ;;  %v10539_v6 = vld [vmem:[%s16057_s1 + $0x1e4] ss:$16 sps:$4 sm:$0xff]  }
  0x16   :  { %v1243_v60 = vrot.slane %v1221_v58, %v12412_v49  ;;  %v10541_v7 = vld [vmem:[%s16057_s1 + $0x1ec] ss:$16 sps:$4 sm:$0xff]   ;;  %v10543_v8 = vld [vmem:[%s16057_s1 + $0x1e0] ss:$16 sps:$4 sm:$0xff]   ;;  %v10544_v9 = vld [vmem:[%s16057_s1 + $0x1e8] ss:$16 sps:$4 sm:$0xff]  }
  0x17   :  { %7233 = vmatpush1.bf16.msra.mxu0 %v10483_v22  ;;  %7971 = vmatpush1.bf16.msra.mxu1 %v10484_v23  ;;  %v10547_v10 = vld [vmem:[%s16057_s1 + $0x204] ss:$16 sps:$4 sm:$0xff]   ;;  %v10550_v11 = vld [vmem:[%s16057_s1 + $0x20c] ss:$16 sps:$4 sm:$0xff]   ;;  %v10545_v12 = vld [vmem:[%s16057_s1 + $0x200] ss:$16 sps:$4 sm:$0xff]  }
  0x18   :  { %7234 = vmatprep.subr.bf16.mxu0 %v10485_v24  ;;  %7972 = vmatprep.subr.bf16.mxu1 %v10487_v25  ;;  %v10548_v14 = vld [vmem:[%s16057_s1 + $0x208] ss:$16 sps:$4 sm:$0xff]   ;;  %v10553_v15 = vld [vmem:[%s16057_s1 + $0x224] ss:$16 sps:$4 sm:$0xff]   ;;  %v10556_v16 = vld [vmem:[%s16057_s1 + $0x22c] ss:$16 sps:$4 sm:$0xff]   ;;  %v1253_v17 = vcombine.high %v1243_v60, %v1243_v60 }
  0x19   :  { %7254 = vmatprep.mubr.bf16.mxu0 %v1243_v60  ;;  %7992 = vmatprep.mubr.bf16.mxu1 %v1243_v60  ;;  %v10551_v18 = vld [vmem:[%s16057_s1 + $0x220] ss:$16 sps:$4 sm:$0xff]   ;;  %v10554_v19 = vld [vmem:[%s16057_s1 + $0x228] ss:$16 sps:$4 sm:$0xff]   ;;  %v10559_v20 = vld [vmem:[%s16057_s1 + $0x244] ss:$16 sps:$4 sm:$0xff]  }
  0x1a   :  { %v10562_v21 = vld [vmem:[%s16057_s1 + $0x24c] ss:$16 sps:$4 sm:$0xff]   ;;  %v10557_v22 = vld [vmem:[%s16057_s1 + $0x240] ss:$16 sps:$4 sm:$0xff]   ;;  %v10560_v23 = vld [vmem:[%s16057_s1 + $0x248] ss:$16 sps:$4 sm:$0xff]  }
  0x1b   :  { %7235 = vmatpush1.bf16.msra.mxu0 %v10489_v26  ;;  %7973 = vmatpush1.bf16.msra.mxu1 %v10490_v27  ;;  %v10565_v24 = vld [vmem:[%s16057_s1 + $0x264] ss:$16 sps:$4 sm:$0xff]   ;;  %v10568_v25 = vld [vmem:[%s16057_s1 + $0x26c] ss:$16 sps:$4 sm:$0xff]   ;;  %v10563_v26 = vld [vmem:[%s16057_s1 + $0x260] ss:$16 sps:$4 sm:$0xff]  }
  0x1c   :  { %7236 = vmatprep.subr.bf16.mxu0 %v10491_v28  ;;  %7974 = vmatprep.subr.bf16.mxu1 %v10493_v29  ;;  %v10566_v27 = vld [vmem:[%s16057_s1 + $0x268] ss:$16 sps:$4 sm:$0xff]   ;;  %v10571_v28 = vld [vmem:[%s16057_s1 + $0x284] ss:$16 sps:$4 sm:$0xff]   ;;  %v10574_v29 = vld [vmem:[%s16057_s1 + $0x28c] ss:$16 sps:$4 sm:$0xff]  }
  0x1d   :  { %v10583_v36 = vld [vmem:[%s16057_s1 + $0x2c4] ss:$16 sps:$4 sm:$0xff]   ;;  %v10586_v37 = vld [vmem:[%s16057_s1 + $0x2cc] ss:$16 sps:$4 sm:$0xff]   ;;  %v10581_v38 = vld [vmem:[%s16057_s1 + $0x2c0] ss:$16 sps:$4 sm:$0xff]  }
  0x1e   :  { %v10587_v43 = vld [vmem:[%s16057_s1 + $0x2e0] ss:$16 sps:$4 sm:$0xff]   ;;  %v10602_v54 = vld [vmem:[%s16057_s1 + $0x328] ss:$16 sps:$4 sm:$0xff]   ;;  %v10616_v60 = vld [vmem:[%s16057_s1 + $0x36c] ss:$16 sps:$4 sm:$0xff]  }
  0x1f   :  { %7237 = vmatpush1.bf16.msra.mxu0 %v10495_v30  ;;  %7975 = vmatpush1.bf16.msra.mxu1 %v10496_v31  ;;  %v10569_v30 = vld [vmem:[%s16057_s1 + $0x280] ss:$16 sps:$4 sm:$0xff]   ;;  %v10572_v31 = vld [vmem:[%s16057_s1 + $0x288] ss:$16 sps:$4 sm:$0xff]  }
  0x20   :  { %7238 = vmatprep.subr.bf16.mxu0 %v10497_v32  ;;  %7976 = vmatprep.subr.bf16.mxu1 %v10499_v33  ;;  %v10577_v32 = vld [vmem:[%s16057_s1 + $0x2a4] ss:$16 sps:$4 sm:$0xff]   ;;  %v10580_v33 = vld [vmem:[%s16057_s1 + $0x2ac] ss:$16 sps:$4 sm:$0xff]   ;;  %v10608_v58 = vld [vmem:[%s16057_s1 + $0x348] ss:$16 sps:$4 sm:$0xff]  }
  0x23   :  { %7239 = vmatpush1.bf16.msra.mxu0 %v10501_v34  ;;  %7977 = vmatpush1.bf16.msra.mxu1 %v10502_v35  ;;  %v10575_v34 = vld [vmem:[%s16057_s1 + $0x2a0] ss:$16 sps:$4 sm:$0xff]   ;;  %v10578_v35 = vld [vmem:[%s16057_s1 + $0x2a8] ss:$16 sps:$4 sm:$0xff]  }
  0x24   :  { %7240 = vmatprep.subr.bf16.mxu0 %v10503_v39  ;;  %7978 = vmatprep.subr.bf16.mxu1 %v10505_v40  ;;  %v10584_v39 = vld [vmem:[%s16057_s1 + $0x2c8] ss:$16 sps:$4 sm:$0xff]   ;;  %v10589_v40 = vld [vmem:[%s16057_s1 + $0x2e4] ss:$16 sps:$4 sm:$0xff]  }
  0x27   :  { %7241 = vmatpush1.bf16.msra.mxu0 %v10507_v41  ;;  %7979 = vmatpush1.bf16.msra.mxu1 %v10508_v44  ;;  %v10592_v41 = vld [vmem:[%s16057_s1 + $0x2ec] ss:$16 sps:$4 sm:$0xff]   ;;  %v10590_v44 = vld [vmem:[%s16057_s1 + $0x2e8] ss:$16 sps:$4 sm:$0xff]  }
  0x28   :  { %7242 = vmatprep.subr.bf16.mxu0 %v10509_v45  ;;  %7980 = vmatprep.subr.bf16.mxu1 %v10511_v46  ;;  %v10595_v45 = vld [vmem:[%s16057_s1 + $0x304] ss:$16 sps:$4 sm:$0xff]   ;;  %v10598_v46 = vld [vmem:[%s16057_s1 + $0x30c] ss:$16 sps:$4 sm:$0xff]  }
  0x2b   :  { %7243 = vmatpush1.bf16.msra.mxu0 %v10513_v47  ;;  %7981 = vmatpush1.bf16.msra.mxu1 %v10514_v48  ;;  %v10593_v47 = vld [vmem:[%s16057_s1 + $0x300] ss:$16 sps:$4 sm:$0xff]   ;;  %v10596_v48 = vld [vmem:[%s16057_s1 + $0x308] ss:$16 sps:$4 sm:$0xff]  }
  0x2c   :  { %7244 = vmatprep.subr.bf16.mxu0 %v10515_v50  ;;  %7982 = vmatprep.subr.bf16.mxu1 %v10517_v51  ;;  %v10601_v50 = vld [vmem:[%s16057_s1 + $0x324] ss:$16 sps:$4 sm:$0xff]   ;;  %v10604_v51 = vld [vmem:[%s16057_s1 + $0x32c] ss:$16 sps:$4 sm:$0xff]  }
  0x2f   :  { %7245 = vmatpush1.bf16.msra.mxu0 %v10519_v53  ;;  %7983 = vmatpush1.bf16.msra.mxu1 %v10520_v55  ;;  %v10599_v53 = vld [vmem:[%s16057_s1 + $0x320] ss:$16 sps:$4 sm:$0xff]   ;;  %v10607_v55 = vld [vmem:[%s16057_s1 + $0x344] ss:$16 sps:$4 sm:$0xff]  }
  0x30   :  { %7246 = vmatprep.subr.bf16.mxu0 %v10521_v56  ;;  %7984 = vmatprep.subr.bf16.mxu1 %v10523_v57  ;;  %v10610_v56 = vld [vmem:[%s16057_s1 + $0x34c] ss:$16 sps:$4 sm:$0xff]   ;;  %v10605_v57 = vld [vmem:[%s16057_s1 + $0x340] ss:$16 sps:$4 sm:$0xff]  }
  0x33   :  { %7247 = vmatpush1.bf16.msra.mxu0 %v10525_v59  ;;  %7985 = vmatpush1.bf16.msra.mxu1 %v10526_v61  ;;  %v10613_v59 = vld [vmem:[%s16057_s1 + $0x364] ss:$16 sps:$4 sm:$0xff]   ;;  %v10611_v61 = vld [vmem:[%s16057_s1 + $0x360] ss:$16 sps:$4 sm:$0xff]  }
  0x34   :  { %7248 = vmatprep.subr.bf16.mxu0 %v10527_v62  ;;  %7986 = vmatprep.subr.bf16.mxu1 %v10529_v63  ;;  %v10614_v62 = vld [vmem:[%s16057_s1 + $0x368] ss:$16 sps:$4 sm:$0xff]   ;;  %v10619_v63 = vld [vmem:[%s16057_s1 + $0x384] ss:$16 sps:$4 sm:$0xff]  }
  0x37   :  { %7249 = vmatpush1.bf16.msra.mxu0 %v10531_v0  ;;  %7987 = vmatpush1.bf16.msra.mxu1 %v10532_v1  ;;  %v10622_v0 = vld [vmem:[%s16057_s1 + $0x38c] ss:$16 sps:$4 sm:$0xff]   ;;  %v10617_v1 = vld [vmem:[%s16057_s1 + $0x380] ss:$16 sps:$4 sm:$0xff]  }
  0x38   :  { %7250 = vmatprep.subr.bf16.mxu0 %v10533_v2  ;;  %7988 = vmatprep.subr.bf16.mxu1 %v10535_v3  ;;  %v10620_v2 = vld [vmem:[%s16057_s1 + $0x388] ss:$16 sps:$4 sm:$0xff]   ;;  %v10625_v3 = vld [vmem:[%s16057_s1 + $0x3a4] ss:$16 sps:$4 sm:$0xff]  }
  0x3b   :  { %7251 = vmatpush1.bf16.msra.mxu0 %v10537_v4  ;;  %7989 = vmatpush1.bf16.msra.mxu1 %v10538_v5  ;;  %v10628_v4 = vld [vmem:[%s16057_s1 + $0x3ac] ss:$16 sps:$4 sm:$0xff]   ;;  %v10623_v5 = vld [vmem:[%s16057_s1 + $0x3a0] ss:$16 sps:$4 sm:$0xff]  }
  0x3c   :  { %7252 = vmatprep.subr.bf16.mxu0 %v10539_v6  ;;  %7990 = vmatprep.subr.bf16.mxu1 %v10541_v7  ;;  %v10626_v6 = vld [vmem:[%s16057_s1 + $0x3a8] ss:$16 sps:$4 sm:$0xff]   ;;  %v10631_v7 = vld [vmem:[%s16057_s1 + $0x3c4] ss:$16 sps:$4 sm:$0xff]  }
  0x3f   :  { %7253 = vmatpush1.bf16.msra.mxu0 %v10543_v8  ;;  %7991 = vmatpush1.bf16.msra.mxu1 %v10544_v9  ;;  %v10634_v8 = vld [vmem:[%s16057_s1 + $0x3cc] ss:$16 sps:$4 sm:$0xff]   ;;  %v1206_v9 = vcombine.high %v12423_v52, %v12423_v52 }
  0x40   :  { %7263 = vmatprep.subr.bf16.mxu0 %v10547_v10  ;;  %8001 = vmatprep.subr.bf16.mxu1 %v10550_v11  ;;  %v10629_v10 = vld [vmem:[%s16057_s1 + $0x3c0] ss:$16 sps:$4 sm:$0xff]   ;;  %v10632_v11 = vld [vmem:[%s16057_s1 + $0x3c8] ss:$16 sps:$4 sm:$0xff]   ;;  %v10640_v52 = vld [vmem:[%s16057_s1 + $0x3ec] ss:$16 sps:$4 sm:$0xff]  }
  0x42   :  { %7255 = vmatmul.mubr.bf16.vlgmr.msra.gmra.mrb[0].mxu0 %v12492_v13  ;;  %7993 = vmatmul.mubr.bf16.vlgmr.msra.gmra.mrb[0].mxu1 %v12492_v13 }
  0x43   :  { %7264 = vmatpush1.bf16.msra.mxu0 %v10545_v12  ;;  %8002 = vmatpush1.bf16.msra.mxu1 %v10548_v14  ;;  %v10637_v12 = vld [vmem:[%s16057_s1 + $0x3e4] ss:$16 sps:$4 sm:$0xff]   ;;  %v12676_v14 = vrot.slane %v1206_v9, %v12412_v49  ;;  %v10716_v9 = vld [vmem:[%s16057_s1 + $0x588] ss:$16 sps:$4 sm:$0xff]  }
  0x44   :  { %7265 = vmatprep.subr.bf16.mxu0 %v10553_v15  ;;  %8003 = vmatprep.subr.bf16.mxu1 %v10556_v16  ;;  %v10635_v15 = vld [vmem:[%s16057_s1 + $0x3e0] ss:$16 sps:$4 sm:$0xff]   ;;  %v10638_v16 = vld [vmem:[%s16057_s1 + $0x3e8] ss:$16 sps:$4 sm:$0xff]  }
  0x45   :  { %7295 = vmatprep.mubr.bf16.mxu0 %v1253_v17  ;;  %8033 = vmatprep.mubr.bf16.mxu1 %v1253_v17  ;;  %v10643_v17 = vld [vmem:[%s16057_s1 + $0x404] ss:$16 sps:$4 sm:$0xff]  }
  0x47   :  { %7266 = vmatpush1.bf16.msra.mxu0 %v10551_v18  ;;  %8004 = vmatpush1.bf16.msra.mxu1 %v10554_v19  ;;  %v10646_v18 = vld [vmem:[%s16057_s1 + $0x40c] ss:$16 sps:$4 sm:$0xff]   ;;  %v1222_v19 = vcombine.high %v12676_v14, %v12676_v14 }
  0x48   :  { %7267 = vmatprep.subr.bf16.mxu0 %v10559_v20  ;;  %8005 = vmatprep.subr.bf16.mxu1 %v10562_v21  ;;  %v10641_v20 = vld [vmem:[%s16057_s1 + $0x400] ss:$16 sps:$4 sm:$0xff]   ;;  %v1251_v21 = vcombine.high %v12492_v13, %v12492_v13 }
  0x49   :  { %v10647_v13 = vld [vmem:[%s16057_s1 + $0x420] ss:$16 sps:$4 sm:$0xff]  }
  0x4b   :  { %7268 = vmatpush1.bf16.msra.mxu0 %v10557_v22  ;;  %8006 = vmatpush1.bf16.msra.mxu1 %v10560_v23  ;;  %v10644_v22 = vld [vmem:[%s16057_s1 + $0x408] ss:$16 sps:$4 sm:$0xff]   ;;  %v10649_v23 = vld [vmem:[%s16057_s1 + $0x424] ss:$16 sps:$4 sm:$0xff]  }
  0x4c   :  { %7269 = vmatprep.subr.bf16.mxu0 %v10565_v24  ;;  %8007 = vmatprep.subr.bf16.mxu1 %v10568_v25  ;;  %v10652_v24 = vld [vmem:[%s16057_s1 + $0x42c] ss:$16 sps:$4 sm:$0xff]   ;;  %v12707_v25 = vrot.slane %v1222_v19, %v12412_v49  ;;  %v10733_v19 = vld [vmem:[%s16057_s1 + $0x5e4] ss:$16 sps:$4 sm:$0xff]  }
  0x4f   :  { %7270 = vmatpush1.bf16.msra.mxu0 %v10563_v26  ;;  %8008 = vmatpush1.bf16.msra.mxu1 %v10566_v27  ;;  %v10650_v26 = vld [vmem:[%s16057_s1 + $0x428] ss:$16 sps:$4 sm:$0xff]   ;;  %v10655_v27 = vld [vmem:[%s16057_s1 + $0x444] ss:$16 sps:$4 sm:$0xff]  }
  0x50   :  { %7271 = vmatprep.subr.bf16.mxu0 %v10571_v28  ;;  %8009 = vmatprep.subr.bf16.mxu1 %v10574_v29  ;;  %v10658_v28 = vld [vmem:[%s16057_s1 + $0x44c] ss:$16 sps:$4 sm:$0xff]   ;;  %v10653_v29 = vld [vmem:[%s16057_s1 + $0x440] ss:$16 sps:$4 sm:$0xff]  }
  0x53   :  { %7272 = vmatpush1.bf16.msra.mxu0 %v10569_v30  ;;  %8010 = vmatpush1.bf16.msra.mxu1 %v10572_v31  ;;  %v10656_v30 = vld [vmem:[%s16057_s1 + $0x448] ss:$16 sps:$4 sm:$0xff]   ;;  %v10661_v31 = vld [vmem:[%s16057_s1 + $0x464] ss:$16 sps:$4 sm:$0xff]  }
  0x54   :  { %7273 = vmatprep.subr.bf16.mxu0 %v10577_v32  ;;  %8011 = vmatprep.subr.bf16.mxu1 %v10580_v33  ;;  %v10664_v32 = vld [vmem:[%s16057_s1 + $0x46c] ss:$16 sps:$4 sm:$0xff]   ;;  %v10659_v33 = vld [vmem:[%s16057_s1 + $0x460] ss:$16 sps:$4 sm:$0xff]  }
  0x57   :  { %7274 = vmatpush1.bf16.msra.mxu0 %v10575_v34  ;;  %8012 = vmatpush1.bf16.msra.mxu1 %v10578_v35  ;;  %v10662_v34 = vld [vmem:[%s16057_s1 + $0x468] ss:$16 sps:$4 sm:$0xff]   ;;  %v10667_v35 = vld [vmem:[%s16057_s1 + $0x484] ss:$16 sps:$4 sm:$0xff]  }
  0x58   :  { %7275 = vmatprep.subr.bf16.mxu0 %v10583_v36  ;;  %8013 = vmatprep.subr.bf16.mxu1 %v10586_v37  ;;  %v10670_v36 = vld [vmem:[%s16057_s1 + $0x48c] ss:$16 sps:$4 sm:$0xff]   ;;  %v10665_v37 = vld [vmem:[%s16057_s1 + $0x480] ss:$16 sps:$4 sm:$0xff]  }
  0x5b   :  { %7276 = vmatpush1.bf16.msra.mxu0 %v10581_v38  ;;  %8014 = vmatpush1.bf16.msra.mxu1 %v10584_v39  ;;  %v10668_v38 = vld [vmem:[%s16057_s1 + $0x488] ss:$16 sps:$4 sm:$0xff]   ;;  %v10673_v39 = vld [vmem:[%s16057_s1 + $0x4a4] ss:$16 sps:$4 sm:$0xff]  }
  0x5c   :  { %7277 = vmatprep.subr.bf16.mxu0 %v10589_v40  ;;  %8015 = vmatprep.subr.bf16.mxu1 %v10592_v41  ;;  %v10676_v40 = vld [vmem:[%s16057_s1 + $0x4ac] ss:$16 sps:$4 sm:$0xff]   ;;  %v10671_v41 = vld [vmem:[%s16057_s1 + $0x4a0] ss:$16 sps:$4 sm:$0xff]  }
  0x5f   :  { %7278 = vmatpush1.bf16.msra.mxu0 %v10587_v43  ;;  %8016 = vmatpush1.bf16.msra.mxu1 %v10590_v44  ;;  %v10674_v43 = vld [vmem:[%s16057_s1 + $0x4a8] ss:$16 sps:$4 sm:$0xff]   ;;  %v10679_v44 = vld [vmem:[%s16057_s1 + $0x4c4] ss:$16 sps:$4 sm:$0xff]  }
  0x60   :  { %7279 = vmatprep.subr.bf16.mxu0 %v10595_v45  ;;  %8017 = vmatprep.subr.bf16.mxu1 %v10598_v46  ;;  %v10682_v45 = vld [vmem:[%s16057_s1 + $0x4cc] ss:$16 sps:$4 sm:$0xff]   ;;  %v10677_v46 = vld [vmem:[%s16057_s1 + $0x4c0] ss:$16 sps:$4 sm:$0xff]  }
  0x63   :  { %7280 = vmatpush1.bf16.msra.mxu0 %v10593_v47  ;;  %8018 = vmatpush1.bf16.msra.mxu1 %v10596_v48  ;;  %v10680_v47 = vld [vmem:[%s16057_s1 + $0x4c8] ss:$16 sps:$4 sm:$0xff]   ;;  %v10685_v48 = vld [vmem:[%s16057_s1 + $0x4e4] ss:$16 sps:$4 sm:$0xff]  }
  0x64   :  { %7281 = vmatprep.subr.bf16.mxu0 %v10601_v50  ;;  %8019 = vmatprep.subr.bf16.mxu1 %v10604_v51  ;;  %v10688_v50 = vld [vmem:[%s16057_s1 + $0x4ec] ss:$16 sps:$4 sm:$0xff]   ;;  %v10683_v51 = vld [vmem:[%s16057_s1 + $0x4e0] ss:$16 sps:$4 sm:$0xff]  }
  0x67   :  { %7282 = vmatpush1.bf16.msra.mxu0 %v10599_v53  ;;  %8020 = vmatpush1.bf16.msra.mxu1 %v10602_v54  ;;  %v10686_v53 = vld [vmem:[%s16057_s1 + $0x4e8] ss:$16 sps:$4 sm:$0xff]   ;;  %v10691_v54 = vld [vmem:[%s16057_s1 + $0x504] ss:$16 sps:$4 sm:$0xff]  }
  0x68   :  { %7283 = vmatprep.subr.bf16.mxu0 %v10607_v55  ;;  %8021 = vmatprep.subr.bf16.mxu1 %v10610_v56  ;;  %v10694_v55 = vld [vmem:[%s16057_s1 + $0x50c] ss:$16 sps:$4 sm:$0xff]   ;;  %v10689_v56 = vld [vmem:[%s16057_s1 + $0x500] ss:$16 sps:$4 sm:$0xff]  }
  0x6b   :  { %7284 = vmatpush1.bf16.msra.mxu0 %v10605_v57  ;;  %8022 = vmatpush1.bf16.msra.mxu1 %v10608_v58  ;;  %v10692_v57 = vld [vmem:[%s16057_s1 + $0x508] ss:$16 sps:$4 sm:$0xff]   ;;  %v10697_v58 = vld [vmem:[%s16057_s1 + $0x524] ss:$16 sps:$4 sm:$0xff]  }
  0x6c   :  { %7285 = vmatprep.subr.bf16.mxu0 %v10613_v59  ;;  %8023 = vmatprep.subr.bf16.mxu1 %v10616_v60  ;;  %v10700_v59 = vld [vmem:[%s16057_s1 + $0x52c] ss:$16 sps:$4 sm:$0xff]   ;;  %v10695_v60 = vld [vmem:[%s16057_s1 + $0x520] ss:$16 sps:$4 sm:$0xff]  }
  0x6f   :  { %7286 = vmatpush1.bf16.msra.mxu0 %v10611_v61  ;;  %8024 = vmatpush1.bf16.msra.mxu1 %v10614_v62  ;;  %v10698_v61 = vld [vmem:[%s16057_s1 + $0x528] ss:$16 sps:$4 sm:$0xff]   ;;  %v10703_v62 = vld [vmem:[%s16057_s1 + $0x544] ss:$16 sps:$4 sm:$0xff]  }
  0x70   :  { %7287 = vmatprep.subr.bf16.mxu0 %v10619_v63  ;;  %8025 = vmatprep.subr.bf16.mxu1 %v10622_v0  ;;  %v10706_v63 = vld [vmem:[%s16057_s1 + $0x54c] ss:$16 sps:$4 sm:$0xff]   ;;  %v10701_v0 = vld [vmem:[%s16057_s1 + $0x540] ss:$16 sps:$4 sm:$0xff]  }
  0x73   :  { %7288 = vmatpush1.bf16.msra.mxu0 %v10617_v1  ;;  %8026 = vmatpush1.bf16.msra.mxu1 %v10620_v2  ;;  %v10704_v1 = vld [vmem:[%s16057_s1 + $0x548] ss:$16 sps:$4 sm:$0xff]   ;;  %v10709_v2 = vld [vmem:[%s16057_s1 + $0x564] ss:$16 sps:$4 sm:$0xff]  }
  0x74   :  { %7289 = vmatprep.subr.bf16.mxu0 %v10625_v3  ;;  %8027 = vmatprep.subr.bf16.mxu1 %v10628_v4  ;;  %v10712_v3 = vld [vmem:[%s16057_s1 + $0x56c] ss:$16 sps:$4 sm:$0xff]   ;;  %v10707_v4 = vld [vmem:[%s16057_s1 + $0x560] ss:$16 sps:$4 sm:$0xff]  }
  0x77   :  { %7290 = vmatpush1.bf16.msra.mxu0 %v10623_v5  ;;  %8028 = vmatpush1.bf16.msra.mxu1 %v10626_v6  ;;  %v10710_v5 = vld [vmem:[%s16057_s1 + $0x568] ss:$16 sps:$4 sm:$0xff]   ;;  %v10715_v6 = vld [vmem:[%s16057_s1 + $0x584] ss:$16 sps:$4 sm:$0xff]  }
  0x78   :  { %7291 = vmatprep.subr.bf16.mxu0 %v10631_v7  ;;  %8029 = vmatprep.subr.bf16.mxu1 %v10634_v8  ;;  %v10718_v7 = vld [vmem:[%s16057_s1 + $0x58c] ss:$16 sps:$4 sm:$0xff]   ;;  %v10713_v8 = vld [vmem:[%s16057_s1 + $0x580] ss:$16 sps:$4 sm:$0xff]  }
  0x7b   :  { %7292 = vmatpush1.bf16.msra.mxu0 %v10629_v10  ;;  %8030 = vmatpush1.bf16.msra.mxu1 %v10632_v11  ;;  %v10721_v10 = vld [vmem:[%s16057_s1 + $0x5a4] ss:$16 sps:$4 sm:$0xff]   ;;  %v10724_v11 = vld [vmem:[%s16057_s1 + $0x5ac] ss:$16 sps:$4 sm:$0xff]  }
  0x7c   :  { %7293 = vmatprep.subr.bf16.mxu0 %v10637_v12  ;;  %8031 = vmatprep.subr.bf16.mxu1 %v10640_v52  ;;  %v10719_v12 = vld [vmem:[%s16057_s1 + $0x5a0] ss:$16 sps:$4 sm:$0xff]   ;;  %v10722_v52 = vld [vmem:[%s16057_s1 + $0x5a8] ss:$16 sps:$4 sm:$0xff]  }
  0x7f   :  { %7294 = vmatpush1.bf16.msra.mxu0 %v10635_v15  ;;  %8032 = vmatpush1.bf16.msra.mxu1 %v10638_v16  ;;  %v10727_v15 = vld [vmem:[%s16057_s1 + $0x5c4] ss:$16 sps:$4 sm:$0xff]   ;;  %v10730_v16 = vld [vmem:[%s16057_s1 + $0x5cc] ss:$16 sps:$4 sm:$0xff]  }
  0x80   :  { %7304 = vmatprep.subr.bf16.mxu0 %v10643_v17  ;;  %8042 = vmatprep.subr.bf16.mxu1 %v10646_v18  ;;  %v10725_v17 = vld [vmem:[%s16057_s1 + $0x5c0] ss:$16 sps:$4 sm:$0xff]   ;;  %v10728_v18 = vld [vmem:[%s16057_s1 + $0x5c8] ss:$16 sps:$4 sm:$0xff]  }
  0x82   :  { %7296 = vmatmul.mubr.bf16.vlgmr.msra.gmra.mrb[0].mxu0 %v1251_v21  ;;  %8034 = vmatmul.mubr.bf16.vlgmr.msra.gmra.mrb[0].mxu1 %v1251_v21  ;;  %v10731_v21 = vld [vmem:[%s16057_s1 + $0x5e0] ss:$16 sps:$4 sm:$0xff]  }
  0x83   :  { %7305 = vmatpush1.bf16.msra.mxu0 %v10641_v20  ;;  %8043 = vmatpush1.bf16.msra.mxu1 %v10644_v22  ;;  %v10736_v20 = vld [vmem:[%s16057_s1 + $0x5ec] ss:$16 sps:$4 sm:$0xff]   ;;  %v10734_v22 = vld [vmem:[%s16057_s1 + $0x5e8] ss:$16 sps:$4 sm:$0xff]  }
  0x84   :  { %7306 = vmatprep.subr.bf16.mxu0 %v10649_v23  ;;  %8044 = vmatprep.subr.bf16.mxu1 %v10652_v24  ;;  %v10740_v23 = vld [vmem:[%s16057_s1 + $0x604] ss:$16 sps:$4 sm:$0xff]   ;;  %v10743_v24 = vld [vmem:[%s16057_s1 + $0x60c] ss:$16 sps:$4 sm:$0xff]  }
  0x85   :  { %7336 = vmatprep.mubr.bf16.mxu0 %v12707_v25  ;;  %8074 = vmatprep.mubr.bf16.mxu1 %v12707_v25 }
  0x87   :  { %7307 = vmatpush1.bf16.msra.mxu0 %v10647_v13  ;;  %8045 = vmatpush1.bf16.msra.mxu1 %v10650_v26  ;;  %v10738_v13 = vld [vmem:[%s16057_s1 + $0x600] ss:$16 sps:$4 sm:$0xff]   ;;  %v12896_v26 = vrot.slane %v12676_v14, %v12412_v49  ;;  %v1254_v14 = vcombine.high %v12707_v25, %v12707_v25  ;;  %v10752_v25 = vld [vmem:[%s16057_s1 + $0x644] ss:$16 sps:$4 sm:$0xff]  }
  0x88   :  { %7308 = vmatprep.subr.bf16.mxu0 %v10655_v27  ;;  %8046 = vmatprep.subr.bf16.mxu1 %v10658_v28  ;;  %v10741_v27 = vld [vmem:[%s16057_s1 + $0x608] ss:$16 sps:$4 sm:$0xff]   ;;  %v10746_v28 = vld [vmem:[%s16057_s1 + $0x624] ss:$16 sps:$4 sm:$0xff]  }
  0x8b   :  { %7309 = vmatpush1.bf16.msra.mxu0 %v10653_v29  ;;  %8047 = vmatpush1.bf16.msra.mxu1 %v10656_v30  ;;  %v10749_v29 = vld [vmem:[%s16057_s1 + $0x62c] ss:$16 sps:$4 sm:$0xff]   ;;  %v10744_v30 = vld [vmem:[%s16057_s1 + $0x620] ss:$16 sps:$4 sm:$0xff]  }
  0x8c   :  { %7310 = vmatprep.subr.bf16.mxu0 %v10661_v31  ;;  %8048 = vmatprep.subr.bf16.mxu1 %v10664_v32  ;;  %v10747_v31 = vld [vmem:[%s16057_s1 + $0x628] ss:$16 sps:$4 sm:$0xff]   ;;  %v10755_v32 = vld [vmem:[%s16057_s1 + $0x64c] ss:$16 sps:$4 sm:$0xff]  }
  0x8f   :  { %7311 = vmatpush1.bf16.msra.mxu0 %v10659_v33  ;;  %8049 = vmatpush1.bf16.msra.mxu1 %v10662_v34  ;;  %v10750_v33 = vld [vmem:[%s16057_s1 + $0x640] ss:$16 sps:$4 sm:$0xff]   ;;  %v10753_v34 = vld [vmem:[%s16057_s1 + $0x648] ss:$16 sps:$4 sm:$0xff]  }
  0x90   :  { %7312 = vmatprep.subr.bf16.mxu0 %v10667_v35  ;;  %8050 = vmatprep.subr.bf16.mxu1 %v10670_v36  ;;  %v10758_v35 = vld [vmem:[%s16057_s1 + $0x664] ss:$16 sps:$4 sm:$0xff]   ;;  %v10761_v36 = vld [vmem:[%s16057_s1 + $0x66c] ss:$16 sps:$4 sm:$0xff]  }
  0x93   :  { %7313 = vmatpush1.bf16.msra.mxu0 %v10665_v37  ;;  %8051 = vmatpush1.bf16.msra.mxu1 %v10668_v38  ;;  %v10756_v37 = vld [vmem:[%s16057_s1 + $0x660] ss:$16 sps:$4 sm:$0xff]   ;;  %v10759_v38 = vld [vmem:[%s16057_s1 + $0x668] ss:$16 sps:$4 sm:$0xff]  }
  0x94   :  { %7314 = vmatprep.subr.bf16.mxu0 %v10673_v39  ;;  %8052 = vmatprep.subr.bf16.mxu1 %v10676_v40  ;;  %v10764_v39 = vld [vmem:[%s16057_s1 + $0x684] ss:$16 sps:$4 sm:$0xff]   ;;  %v10767_v40 = vld [vmem:[%s16057_s1 + $0x68c] ss:$16 sps:$4 sm:$0xff]  }
  0x97   :  { %7315 = vmatpush1.bf16.msra.mxu0 %v10671_v41  ;;  %8053 = vmatpush1.bf16.msra.mxu1 %v10674_v43  ;;  %v10762_v41 = vld [vmem:[%s16057_s1 + $0x680] ss:$16 sps:$4 sm:$0xff]   ;;  %v10765_v43 = vld [vmem:[%s16057_s1 + $0x688] ss:$16 sps:$4 sm:$0xff]  }
  0x98   :  { %7316 = vmatprep.subr.bf16.mxu0 %v10679_v44  ;;  %8054 = vmatprep.subr.bf16.mxu1 %v10682_v45  ;;  %v10770_v44 = vld [vmem:[%s16057_s1 + $0x6a4] ss:$16 sps:$4 sm:$0xff]   ;;  %v10773_v45 = vld [vmem:[%s16057_s1 + $0x6ac] ss:$16 sps:$4 sm:$0xff]  }
  0x9b   :  { %7317 = vmatpush1.bf16.msra.mxu0 %v10677_v46  ;;  %8055 = vmatpush1.bf16.msra.mxu1 %v10680_v47  ;;  %v10768_v46 = vld [vmem:[%s16057_s1 + $0x6a0] ss:$16 sps:$4 sm:$0xff]   ;;  %v10771_v47 = vld [vmem:[%s16057_s1 + $0x6a8] ss:$16 sps:$4 sm:$0xff]  }
  0x9c   :  { %7318 = vmatprep.subr.bf16.mxu0 %v10685_v48  ;;  %8056 = vmatprep.subr.bf16.mxu1 %v10688_v50  ;;  %v10776_v48 = vld [vmem:[%s16057_s1 + $0x6c4] ss:$16 sps:$4 sm:$0xff]   ;;  %v10779_v50 = vld [vmem:[%s16057_s1 + $0x6cc] ss:$16 sps:$4 sm:$0xff]  }
  0x9f   :  { %7319 = vmatpush1.bf16.msra.mxu0 %v10683_v51  ;;  %8057 = vmatpush1.bf16.msra.mxu1 %v10686_v53  ;;  %v10774_v51 = vld [vmem:[%s16057_s1 + $0x6c0] ss:$16 sps:$4 sm:$0xff]   ;;  %v10777_v53 = vld [vmem:[%s16057_s1 + $0x6c8] ss:$16 sps:$4 sm:$0xff]  }
  0xa0   :  { %7320 = vmatprep.subr.bf16.mxu0 %v10691_v54  ;;  %8058 = vmatprep.subr.bf16.mxu1 %v10694_v55  ;;  %v10782_v54 = vld [vmem:[%s16057_s1 + $0x6e4] ss:$16 sps:$4 sm:$0xff]   ;;  %v10785_v55 = vld [vmem:[%s16057_s1 + $0x6ec] ss:$16 sps:$4 sm:$0xff]  }
  0xa3   :  { %7321 = vmatpush1.bf16.msra.mxu0 %v10689_v56  ;;  %8059 = vmatpush1.bf16.msra.mxu1 %v10692_v57  ;;  %v10780_v56 = vld [vmem:[%s16057_s1 + $0x6e0] ss:$16 sps:$4 sm:$0xff]   ;;  %v10783_v57 = vld [vmem:[%s16057_s1 + $0x6e8] ss:$16 sps:$4 sm:$0xff]  }
  0xa4   :  { %7322 = vmatprep.subr.bf16.mxu0 %v10697_v58  ;;  %8060 = vmatprep.subr.bf16.mxu1 %v10700_v59  ;;  %v10788_v58 = vld [vmem:[%s16057_s1 + $0x704] ss:$16 sps:$4 sm:$0xff]   ;;  %v10791_v59 = vld [vmem:[%s16057_s1 + $0x70c] ss:$16 sps:$4 sm:$0xff]  }
  0xa7   :  { %7323 = vmatpush1.bf16.msra.mxu0 %v10695_v60  ;;  %8061 = vmatpush1.bf16.msra.mxu1 %v10698_v61  ;;  %v10786_v60 = vld [vmem:[%s16057_s1 + $0x700] ss:$16 sps:$4 sm:$0xff]   ;;  %v10789_v61 = vld [vmem:[%s16057_s1 + $0x708] ss:$16 sps:$4 sm:$0xff]  }
  0xa8   :  { %7324 = vmatprep.subr.bf16.mxu0 %v10703_v62  ;;  %8062 = vmatprep.subr.bf16.mxu1 %v10706_v63  ;;  %v10794_v62 = vld [vmem:[%s16057_s1 + $0x724] ss:$16 sps:$4 sm:$0xff]   ;;  %v10797_v63 = vld [vmem:[%s16057_s1 + $0x72c] ss:$16 sps:$4 sm:$0xff]  }
  0xab   :  { %7325 = vmatpush1.bf16.msra.mxu0 %v10701_v0  ;;  %8063 = vmatpush1.bf16.msra.mxu1 %v10704_v1  ;;  %v10792_v0 = vld [vmem:[%s16057_s1 + $0x720] ss:$16 sps:$4 sm:$0xff]   ;;  %v10795_v1 = vld [vmem:[%s16057_s1 + $0x728] ss:$16 sps:$4 sm:$0xff]  }
  0xac   :  { %7326 = vmatprep.subr.bf16.mxu0 %v10709_v2  ;;  %8064 = vmatprep.subr.bf16.mxu1 %v10712_v3  ;;  %v10800_v2 = vld [vmem:[%s16057_s1 + $0x744] ss:$16 sps:$4 sm:$0xff]   ;;  %v10803_v3 = vld [vmem:[%s16057_s1 + $0x74c] ss:$16 sps:$4 sm:$0xff]  }
  0xaf   :  { %7327 = vmatpush1.bf16.msra.mxu0 %v10707_v4  ;;  %8065 = vmatpush1.bf16.msra.mxu1 %v10710_v5  ;;  %v10798_v4 = vld [vmem:[%s16057_s1 + $0x740] ss:$16 sps:$4 sm:$0xff]   ;;  %v10801_v5 = vld [vmem:[%s16057_s1 + $0x748] ss:$16 sps:$4 sm:$0xff]  }
  0xb0   :  { %7328 = vmatprep.subr.bf16.mxu0 %v10715_v6  ;;  %8066 = vmatprep.subr.bf16.mxu1 %v10718_v7  ;;  %v10806_v6 = vld [vmem:[%s16057_s1 + $0x764] ss:$16 sps:$4 sm:$0xff]   ;;  %v10809_v7 = vld [vmem:[%s16057_s1 + $0x76c] ss:$16 sps:$4 sm:$0xff]  }
  0xb3   :  { %7329 = vmatpush1.bf16.msra.mxu0 %v10713_v8  ;;  %8067 = vmatpush1.bf16.msra.mxu1 %v10716_v9  ;;  %v10804_v8 = vld [vmem:[%s16057_s1 + $0x760] ss:$16 sps:$4 sm:$0xff]   ;;  %v10807_v9 = vld [vmem:[%s16057_s1 + $0x768] ss:$16 sps:$4 sm:$0xff]  }
  0xb4   :  { %7330 = vmatprep.subr.bf16.mxu0 %v10721_v10  ;;  %8068 = vmatprep.subr.bf16.mxu1 %v10724_v11  ;;  %v10812_v10 = vld [vmem:[%s16057_s1 + $0x784] ss:$16 sps:$4 sm:$0xff]   ;;  %v10815_v11 = vld [vmem:[%s16057_s1 + $0x78c] ss:$16 sps:$4 sm:$0xff]  }
  0xb7   :  { %7331 = vmatpush1.bf16.msra.mxu0 %v10719_v12  ;;  %8069 = vmatpush1.bf16.msra.mxu1 %v10722_v52  ;;  %v10810_v12 = vld [vmem:[%s16057_s1 + $0x780] ss:$16 sps:$4 sm:$0xff]   ;;  %v10813_v52 = vld [vmem:[%s16057_s1 + $0x788] ss:$16 sps:$4 sm:$0xff]  }
  0xb8   :  { %7332 = vmatprep.subr.bf16.mxu0 %v10727_v15  ;;  %8070 = vmatprep.subr.bf16.mxu1 %v10730_v16  ;;  %v10818_v15 = vld [vmem:[%s16057_s1 + $0x7a4] ss:$16 sps:$4 sm:$0xff]   ;;  %v10821_v16 = vld [vmem:[%s16057_s1 + $0x7ac] ss:$16 sps:$4 sm:$0xff]  }
  0xbb   :  { %7333 = vmatpush1.bf16.msra.mxu0 %v10725_v17  ;;  %8071 = vmatpush1.bf16.msra.mxu1 %v10728_v18  ;;  %v10816_v17 = vld [vmem:[%s16057_s1 + $0x7a0] ss:$16 sps:$4 sm:$0xff]   ;;  %v10819_v18 = vld [vmem:[%s16057_s1 + $0x7a8] ss:$16 sps:$4 sm:$0xff]  }
  0xbc   :  { %7334 = vmatprep.subr.bf16.mxu0 %v10733_v19  ;;  %8072 = vmatprep.subr.bf16.mxu1 %v10736_v20  ;;  %v10824_v19 = vld [vmem:[%s16057_s1 + $0x7c4] ss:$16 sps:$4 sm:$0xff]   ;;  %v10827_v20 = vld [vmem:[%s16057_s1 + $0x7cc] ss:$16 sps:$4 sm:$0xff]  }
  0xbf   :  { %7335 = vmatpush1.bf16.msra.mxu0 %v10731_v21  ;;  %8073 = vmatpush1.bf16.msra.mxu1 %v10734_v22  ;;  %v13070_v21 = vld.sshfl [vmem:[%s16056_s0 + $0x8] sm:$0xff pattern:$0x75316420]  ;;  %v10822_v22 = vld [vmem:[%s16057_s1 + $0x7c0] ss:$16 sps:$4 sm:$0xff]  }
  0xc0   :  { %7345 = vmatprep.subr.bf16.mxu0 %v10740_v23  ;;  %8083 = vmatprep.subr.bf16.mxu1 %v10743_v24  ;;  %v10825_v23 = vld [vmem:[%s16057_s1 + $0x7c8] ss:$16 sps:$4 sm:$0xff]   ;;  %v10830_v24 = vld [vmem:[%s16057_s1 + $0x7e4] ss:$16 sps:$4 sm:$0xff]  }
  0xc2   :  { %7337 = vmatmul.mubr.bf16.vlgmr.msra.gmra.mrb[0].mxu0 %v12896_v26  ;;  %8075 = vmatmul.mubr.bf16.vlgmr.msra.gmra.mrb[0].mxu1 %v12896_v26 }
  0xc3   :  { %7346 = vmatpush1.bf16.msra.mxu0 %v10738_v13  ;;  %8084 = vmatpush1.bf16.msra.mxu1 %v10741_v27  ;;  %v10833_v13 = vld [vmem:[%s16057_s1 + $0x7ec] ss:$16 sps:$4 sm:$0xff]   ;;  %v10828_v27 = vld [vmem:[%s16057_s1 + $0x7e0] ss:$16 sps:$4 sm:$0xff]  }
  0xc4   :  { %7347 = vmatprep.subr.bf16.mxu0 %v10746_v28  ;;  %8085 = vmatprep.subr.bf16.mxu1 %v10749_v29  ;;  %v10831_v28 = vld [vmem:[%s16057_s1 + $0x7e8] ss:$16 sps:$4 sm:$0xff]   ;;  %v10836_v29 = vld [vmem:[%s16057_s1 + $0x804] ss:$16 sps:$4 sm:$0xff]  }
  0xc5   :  { %7377 = vmatprep.mubr.bf16.mxu0 %v1254_v14  ;;  %8115 = vmatprep.mubr.bf16.mxu1 %v1254_v14  ;;  %v10839_v14 = vld [vmem:[%s16057_s1 + $0x80c] ss:$16 sps:$4 sm:$0xff]  }
  0xc7   :  { %7348 = vmatpush1.bf16.msra.mxu0 %v10744_v30  ;;  %8086 = vmatpush1.bf16.msra.mxu1 %v10747_v31  ;;  %v1270_v30 = vcombine.high %v13070_v21, %v13070_v21  ;;  %v1252_v31 = vcombine.high %v12896_v26, %v12896_v26  ;;  %v10845_v26 = vld [vmem:[%s16057_s1 + $0x82c] ss:$16 sps:$4 sm:$0xff]  }
  0xc8   :  { %7349 = vmatprep.subr.bf16.mxu0 %v10752_v25  ;;  %8087 = vmatprep.subr.bf16.mxu1 %v10755_v32  ;;  %v10834_v25 = vld [vmem:[%s16057_s1 + $0x800] ss:$16 sps:$4 sm:$0xff]   ;;  %v10837_v32 = vld [vmem:[%s16057_s1 + $0x808] ss:$16 sps:$4 sm:$0xff]  }
  0xcb   :  { %7350 = vmatpush1.bf16.msra.mxu0 %v10750_v33  ;;  %8088 = vmatpush1.bf16.msra.mxu1 %v10753_v34  ;;  %v10842_v33 = vld [vmem:[%s16057_s1 + $0x824] ss:$16 sps:$4 sm:$0xff]   ;;  %v13113_v34 = vrot.slane %v1270_v30, %v12412_v49 }
  0xcc   :  { %7351 = vmatprep.subr.bf16.mxu0 %v10758_v35  ;;  %8089 = vmatprep.subr.bf16.mxu1 %v10761_v36  ;;  %v10840_v35 = vld [vmem:[%s16057_s1 + $0x820] ss:$16 sps:$4 sm:$0xff]   ;;  %v10843_v36 = vld [vmem:[%s16057_s1 + $0x828] ss:$16 sps:$4 sm:$0xff]   ;;  %v10926_v30 = vld [vmem:[%s16057_s1 + $0x9e4] ss:$16 sps:$4 sm:$0xff]  }
  0xcf   :  { %7352 = vmatpush1.bf16.msra.mxu0 %v10756_v37  ;;  %8090 = vmatpush1.bf16.msra.mxu1 %v10759_v38  ;;  %v10848_v37 = vld [vmem:[%s16057_s1 + $0x844] ss:$16 sps:$4 sm:$0xff]   ;;  %v10851_v38 = vld [vmem:[%s16057_s1 + $0x84c] ss:$16 sps:$4 sm:$0xff]  }
  0xd0   :  { %7353 = vmatprep.subr.bf16.mxu0 %v10764_v39  ;;  %8091 = vmatprep.subr.bf16.mxu1 %v10767_v40  ;;  %v10846_v39 = vld [vmem:[%s16057_s1 + $0x840] ss:$16 sps:$4 sm:$0xff]   ;;  %v10849_v40 = vld [vmem:[%s16057_s1 + $0x848] ss:$16 sps:$4 sm:$0xff]  }
  0xd3   :  { %7354 = vmatpush1.bf16.msra.mxu0 %v10762_v41  ;;  %8092 = vmatpush1.bf16.msra.mxu1 %v10765_v43  ;;  %v10854_v41 = vld [vmem:[%s16057_s1 + $0x864] ss:$16 sps:$4 sm:$0xff]   ;;  %v10857_v43 = vld [vmem:[%s16057_s1 + $0x86c] ss:$16 sps:$4 sm:$0xff]  }
  0xd4   :  { %7355 = vmatprep.subr.bf16.mxu0 %v10770_v44  ;;  %8093 = vmatprep.subr.bf16.mxu1 %v10773_v45  ;;  %v10852_v44 = vld [vmem:[%s16057_s1 + $0x860] ss:$16 sps:$4 sm:$0xff]   ;;  %v10855_v45 = vld [vmem:[%s16057_s1 + $0x868] ss:$16 sps:$4 sm:$0xff]  }
  0xd7   :  { %7356 = vmatpush1.bf16.msra.mxu0 %v10768_v46  ;;  %8094 = vmatpush1.bf16.msra.mxu1 %v10771_v47  ;;  %v10860_v46 = vld [vmem:[%s16057_s1 + $0x884] ss:$16 sps:$4 sm:$0xff]   ;;  %v10863_v47 = vld [vmem:[%s16057_s1 + $0x88c] ss:$16 sps:$4 sm:$0xff]  }
  0xd8   :  { %7357 = vmatprep.subr.bf16.mxu0 %v10776_v48  ;;  %8095 = vmatprep.subr.bf16.mxu1 %v10779_v50  ;;  %v10858_v48 = vld [vmem:[%s16057_s1 + $0x880] ss:$16 sps:$4 sm:$0xff]   ;;  %v10861_v50 = vld [vmem:[%s16057_s1 + $0x888] ss:$16 sps:$4 sm:$0xff]  }
  0xdb   :  { %7358 = vmatpush1.bf16.msra.mxu0 %v10774_v51  ;;  %8096 = vmatpush1.bf16.msra.mxu1 %v10777_v53  ;;  %v10866_v51 = vld [vmem:[%s16057_s1 + $0x8a4] ss:$16 sps:$4 sm:$0xff]   ;;  %v10869_v53 = vld [vmem:[%s16057_s1 + $0x8ac] ss:$16 sps:$4 sm:$0xff]  }
  0xdc   :  { %7359 = vmatprep.subr.bf16.mxu0 %v10782_v54  ;;  %8097 = vmatprep.subr.bf16.mxu1 %v10785_v55  ;;  %v10864_v54 = vld [vmem:[%s16057_s1 + $0x8a0] ss:$16 sps:$4 sm:$0xff]   ;;  %v10867_v55 = vld [vmem:[%s16057_s1 + $0x8a8] ss:$16 sps:$4 sm:$0xff]  }
  0xdf   :  { %7360 = vmatpush1.bf16.msra.mxu0 %v10780_v56  ;;  %8098 = vmatpush1.bf16.msra.mxu1 %v10783_v57  ;;  %v10872_v56 = vld [vmem:[%s16057_s1 + $0x8c4] ss:$16 sps:$4 sm:$0xff]   ;;  %v10875_v57 = vld [vmem:[%s16057_s1 + $0x8cc] ss:$16 sps:$4 sm:$0xff]  }
  0xe0   :  { %7361 = vmatprep.subr.bf16.mxu0 %v10788_v58  ;;  %8099 = vmatprep.subr.bf16.mxu1 %v10791_v59  ;;  %v10870_v58 = vld [vmem:[%s16057_s1 + $0x8c0] ss:$16 sps:$4 sm:$0xff]   ;;  %v10873_v59 = vld [vmem:[%s16057_s1 + $0x8c8] ss:$16 sps:$4 sm:$0xff]  }
  0xe3   :  { %7362 = vmatpush1.bf16.msra.mxu0 %v10786_v60  ;;  %8100 = vmatpush1.bf16.msra.mxu1 %v10789_v61  ;;  %v10878_v60 = vld [vmem:[%s16057_s1 + $0x8e4] ss:$16 sps:$4 sm:$0xff]   ;;  %v10881_v61 = vld [vmem:[%s16057_s1 + $0x8ec] ss:$16 sps:$4 sm:$0xff]  }
  0xe4   :  { %7363 = vmatprep.subr.bf16.mxu0 %v10794_v62  ;;  %8101 = vmatprep.subr.bf16.mxu1 %v10797_v63  ;;  %v10876_v62 = vld [vmem:[%s16057_s1 + $0x8e0] ss:$16 sps:$4 sm:$0xff]   ;;  %v10879_v63 = vld [vmem:[%s16057_s1 + $0x8e8] ss:$16 sps:$4 sm:$0xff]  }
  0xe7   :  { %7364 = vmatpush1.bf16.msra.mxu0 %v10792_v0  ;;  %8102 = vmatpush1.bf16.msra.mxu1 %v10795_v1  ;;  %v10884_v0 = vld [vmem:[%s16057_s1 + $0x904] ss:$16 sps:$4 sm:$0xff]   ;;  %v10887_v1 = vld [vmem:[%s16057_s1 + $0x90c] ss:$16 sps:$4 sm:$0xff]  }
  0xe8   :  { %7365 = vmatprep.subr.bf16.mxu0 %v10800_v2  ;;  %8103 = vmatprep.subr.bf16.mxu1 %v10803_v3  ;;  %v10882_v2 = vld [vmem:[%s16057_s1 + $0x900] ss:$16 sps:$4 sm:$0xff]   ;;  %v10885_v3 = vld [vmem:[%s16057_s1 + $0x908] ss:$16 sps:$4 sm:$0xff]  }
  0xeb   :  { %7366 = vmatpush1.bf16.msra.mxu0 %v10798_v4  ;;  %8104 = vmatpush1.bf16.msra.mxu1 %v10801_v5  ;;  %v10890_v4 = vld [vmem:[%s16057_s1 + $0x924] ss:$16 sps:$4 sm:$0xff]   ;;  %v10893_v5 = vld [vmem:[%s16057_s1 + $0x92c] ss:$16 sps:$4 sm:$0xff]  }
  0xec   :  { %7367 = vmatprep.subr.bf16.mxu0 %v10806_v6  ;;  %8105 = vmatprep.subr.bf16.mxu1 %v10809_v7  ;;  %v10888_v6 = vld [vmem:[%s16057_s1 + $0x920] ss:$16 sps:$4 sm:$0xff]   ;;  %v10891_v7 = vld [vmem:[%s16057_s1 + $0x928] ss:$16 sps:$4 sm:$0xff]  }
  0xef   :  { %7368 = vmatpush1.bf16.msra.mxu0 %v10804_v8  ;;  %8106 = vmatpush1.bf16.msra.mxu1 %v10807_v9  ;;  %v10896_v8 = vld [vmem:[%s16057_s1 + $0x944] ss:$16 sps:$4 sm:$0xff]   ;;  %v10899_v9 = vld [vmem:[%s16057_s1 + $0x94c] ss:$16 sps:$4 sm:$0xff]  }
  0xf0   :  { %7369 = vmatprep.subr.bf16.mxu0 %v10812_v10  ;;  %8107 = vmatprep.subr.bf16.mxu1 %v10815_v11  ;;  %v10894_v10 = vld [vmem:[%s16057_s1 + $0x940] ss:$16 sps:$4 sm:$0xff]   ;;  %v10897_v11 = vld [vmem:[%s16057_s1 + $0x948] ss:$16 sps:$4 sm:$0xff]  }
  0xf3   :  { %7370 = vmatpush1.bf16.msra.mxu0 %v10810_v12  ;;  %8108 = vmatpush1.bf16.msra.mxu1 %v10813_v52  ;;  %v10902_v12 = vld [vmem:[%s16057_s1 + $0x964] ss:$16 sps:$4 sm:$0xff]   ;;  %v10905_v52 = vld [vmem:[%s16057_s1 + $0x96c] ss:$16 sps:$4 sm:$0xff]  }
  0xf4   :  { %7371 = vmatprep.subr.bf16.mxu0 %v10818_v15  ;;  %8109 = vmatprep.subr.bf16.mxu1 %v10821_v16  ;;  %v10900_v15 = vld [vmem:[%s16057_s1 + $0x960] ss:$16 sps:$4 sm:$0xff]   ;;  %v10903_v16 = vld [vmem:[%s16057_s1 + $0x968] ss:$16 sps:$4 sm:$0xff]  }
  0xf7   :  { %7372 = vmatpush1.bf16.msra.mxu0 %v10816_v17  ;;  %8110 = vmatpush1.bf16.msra.mxu1 %v10819_v18  ;;  %v10908_v17 = vld [vmem:[%s16057_s1 + $0x984] ss:$16 sps:$4 sm:$0xff]   ;;  %v10911_v18 = vld [vmem:[%s16057_s1 + $0x98c] ss:$16 sps:$4 sm:$0xff]  }
  0xf8   :  { %7373 = vmatprep.subr.bf16.mxu0 %v10824_v19  ;;  %8111 = vmatprep.subr.bf16.mxu1 %v10827_v20  ;;  %v10906_v19 = vld [vmem:[%s16057_s1 + $0x980] ss:$16 sps:$4 sm:$0xff]   ;;  %v10909_v20 = vld [vmem:[%s16057_s1 + $0x988] ss:$16 sps:$4 sm:$0xff]  }
  0xfb   :  { %7374 = vmatpush1.bf16.msra.mxu0 %v10822_v22  ;;  %8112 = vmatpush1.bf16.msra.mxu1 %v10825_v23  ;;  %v10914_v22 = vld [vmem:[%s16057_s1 + $0x9a4] ss:$16 sps:$4 sm:$0xff]   ;;  %v10917_v23 = vld [vmem:[%s16057_s1 + $0x9ac] ss:$16 sps:$4 sm:$0xff]  }
  0xfc   :  { %7375 = vmatprep.subr.bf16.mxu0 %v10830_v24  ;;  %8113 = vmatprep.subr.bf16.mxu1 %v10833_v13  ;;  %v10912_v24 = vld [vmem:[%s16057_s1 + $0x9a0] ss:$16 sps:$4 sm:$0xff]   ;;  %v10915_v13 = vld [vmem:[%s16057_s1 + $0x9a8] ss:$16 sps:$4 sm:$0xff]  }
  0xff   :  { %7376 = vmatpush1.bf16.msra.mxu0 %v10828_v27  ;;  %8114 = vmatpush1.bf16.msra.mxu1 %v10831_v28  ;;  %v10920_v27 = vld [vmem:[%s16057_s1 + $0x9c4] ss:$16 sps:$4 sm:$0xff]   ;;  %v10923_v28 = vld [vmem:[%s16057_s1 + $0x9cc] ss:$16 sps:$4 sm:$0xff]  }
 0x100   :  { %7386 = vmatprep.subr.bf16.mxu0 %v10836_v29  ;;  %8124 = vmatprep.subr.bf16.mxu1 %v10839_v14  ;;  %v10918_v29 = vld [vmem:[%s16057_s1 + $0x9c0] ss:$16 sps:$4 sm:$0xff]   ;;  %v10921_v14 = vld [vmem:[%s16057_s1 + $0x9c8] ss:$16 sps:$4 sm:$0xff]  }
 0x102   :  { %7378 = vmatmul.mubr.bf16.vlgmr.msra.gmra.mrb[0].mxu0 %v1252_v31  ;;  %8116 = vmatmul.mubr.bf16.vlgmr.msra.gmra.mrb[0].mxu1 %v1252_v31  ;;  %v10929_v31 = vld [vmem:[%s16057_s1 + $0x9ec] ss:$16 sps:$4 sm:$0xff]  }
 0x103   :  { %7387 = vmatpush1.bf16.msra.mxu0 %v10834_v25  ;;  %8125 = vmatpush1.bf16.msra.mxu1 %v10837_v32  ;;  %v10924_v25 = vld [vmem:[%s16057_s1 + $0x9e0] ss:$16 sps:$4 sm:$0xff]   ;;  %v10927_v32 = vld [vmem:[%s16057_s1 + $0x9e8] ss:$16 sps:$4 sm:$0xff]  }
 0x104   :  { %7388 = vmatprep.subr.bf16.mxu0 %v10842_v33  ;;  %8126 = vmatprep.subr.bf16.mxu1 %v10845_v26  ;;  %v10932_v33 = vld [vmem:[%s16057_s1 + $0xa04] ss:$16 sps:$4 sm:$0xff]   ;;  %v10935_v26 = vld [vmem:[%s16057_s1 + $0xa0c] ss:$16 sps:$4 sm:$0xff]  }
 0x105   :  { %7418 = vmatprep.mubr.bf16.mxu0 %v13113_v34  ;;  %8156 = vmatprep.mubr.bf16.mxu1 %v13113_v34 }
 0x107   :  { %7389 = vmatpush1.bf16.msra.mxu0 %v10840_v35  ;;  %8127 = vmatpush1.bf16.msra.mxu1 %v10843_v36  ;;  %v13299_v35 = vrot.slane %v13070_v21, %v12412_v49  ;;  %v10930_v36 = vld [vmem:[%s16057_s1 + $0xa00] ss:$16 sps:$4 sm:$0xff]   ;;  %v10941_v21 = vld [vmem:[%s16057_s1 + $0xa2c] ss:$16 sps:$4 sm:$0xff]  }
 0x108   :  { %7390 = vmatprep.subr.bf16.mxu0 %v10848_v37  ;;  %8128 = vmatprep.subr.bf16.mxu1 %v10851_v38  ;;  %v10933_v37 = vld [vmem:[%s16057_s1 + $0xa08] ss:$16 sps:$4 sm:$0xff]   ;;  %v10938_v38 = vld [vmem:[%s16057_s1 + $0xa24] ss:$16 sps:$4 sm:$0xff]  }
 0x10b   :  { %7391 = vmatpush1.bf16.msra.mxu0 %v10846_v39  ;;  %8129 = vmatpush1.bf16.msra.mxu1 %v10849_v40  ;;  %v1302_v39 = vcombine.high %v13113_v34, %v13113_v34  ;;  %v10936_v40 = vld [vmem:[%s16057_s1 + $0xa20] ss:$16 sps:$4 sm:$0xff]   ;;  %v10944_v34 = vld [vmem:[%s16057_s1 + $0xa44] ss:$16 sps:$4 sm:$0xff]  }
 0x10c   :  { %7392 = vmatprep.subr.bf16.mxu0 %v10854_v41  ;;  %8130 = vmatprep.subr.bf16.mxu1 %v10857_v43  ;;  %v10939_v41 = vld [vmem:[%s16057_s1 + $0xa28] ss:$16 sps:$4 sm:$0xff]   ;;  %v10947_v43 = vld [vmem:[%s16057_s1 + $0xa4c] ss:$16 sps:$4 sm:$0xff]  }
 0x10f   :  { %7393 = vmatpush1.bf16.msra.mxu0 %v10852_v44  ;;  %8131 = vmatpush1.bf16.msra.mxu1 %v10855_v45  ;;  %v10942_v44 = vld [vmem:[%s16057_s1 + $0xa40] ss:$16 sps:$4 sm:$0xff]   ;;  %v10945_v45 = vld [vmem:[%s16057_s1 + $0xa48] ss:$16 sps:$4 sm:$0xff]  }
 0x110   :  { %7394 = vmatprep.subr.bf16.mxu0 %v10860_v46  ;;  %8132 = vmatprep.subr.bf16.mxu1 %v10863_v47  ;;  %v10950_v46 = vld [vmem:[%s16057_s1 + $0xa64] ss:$16 sps:$4 sm:$0xff]   ;;  %v10953_v47 = vld [vmem:[%s16057_s1 + $0xa6c] ss:$16 sps:$4 sm:$0xff]  }
 0x113   :  { %7395 = vmatpush1.bf16.msra.mxu0 %v10858_v48  ;;  %8133 = vmatpush1.bf16.msra.mxu1 %v10861_v50  ;;  %v10948_v48 = vld [vmem:[%s16057_s1 + $0xa60] ss:$16 sps:$4 sm:$0xff]   ;;  %v10951_v50 = vld [vmem:[%s16057_s1 + $0xa68] ss:$16 sps:$4 sm:$0xff]  }
 0x114   :  { %7396 = vmatprep.subr.bf16.mxu0 %v10866_v51  ;;  %8134 = vmatprep.subr.bf16.mxu1 %v10869_v53  ;;  %v10956_v51 = vld [vmem:[%s16057_s1 + $0xa84] ss:$16 sps:$4 sm:$0xff]   ;;  %v10959_v53 = vld [vmem:[%s16057_s1 + $0xa8c] ss:$16 sps:$4 sm:$0xff]  }
 0x117   :  { %7397 = vmatpush1.bf16.msra.mxu0 %v10864_v54  ;;  %8135 = vmatpush1.bf16.msra.mxu1 %v10867_v55  ;;  %v10954_v54 = vld [vmem:[%s16057_s1 + $0xa80] ss:$16 sps:$4 sm:$0xff]   ;;  %v10957_v55 = vld [vmem:[%s16057_s1 + $0xa88] ss:$16 sps:$4 sm:$0xff]  }
 0x118   :  { %7398 = vmatprep.subr.bf16.mxu0 %v10872_v56  ;;  %8136 = vmatprep.subr.bf16.mxu1 %v10875_v57  ;;  %v10962_v56 = vld [vmem:[%s16057_s1 + $0xaa4] ss:$16 sps:$4 sm:$0xff]   ;;  %v10965_v57 = vld [vmem:[%s16057_s1 + $0xaac] ss:$16 sps:$4 sm:$0xff]  }
 0x11b   :  { %7399 = vmatpush1.bf16.msra.mxu0 %v10870_v58  ;;  %8137 = vmatpush1.bf16.msra.mxu1 %v10873_v59  ;;  %v10960_v58 = vld [vmem:[%s16057_s1 + $0xaa0] ss:$16 sps:$4 sm:$0xff]   ;;  %v10963_v59 = vld [vmem:[%s16057_s1 + $0xaa8] ss:$16 sps:$4 sm:$0xff]  }
 0x11c   :  { %7400 = vmatprep.subr.bf16.mxu0 %v10878_v60  ;;  %8138 = vmatprep.subr.bf16.mxu1 %v10881_v61  ;;  %v10968_v60 = vld [vmem:[%s16057_s1 + $0xac4] ss:$16 sps:$4 sm:$0xff]   ;;  %v10971_v61 = vld [vmem:[%s16057_s1 + $0xacc] ss:$16 sps:$4 sm:$0xff]  }
 0x11f   :  { %7401 = vmatpush1.bf16.msra.mxu0 %v10876_v62  ;;  %8139 = vmatpush1.bf16.msra.mxu1 %v10879_v63  ;;  %v10966_v62 = vld [vmem:[%s16057_s1 + $0xac0] ss:$16 sps:$4 sm:$0xff]   ;;  %v10969_v63 = vld [vmem:[%s16057_s1 + $0xac8] ss:$16 sps:$4 sm:$0xff]  }
 0x120   :  { %7402 = vmatprep.subr.bf16.mxu0 %v10884_v0  ;;  %8140 = vmatprep.subr.bf16.mxu1 %v10887_v1  ;;  %v10974_v0 = vld [vmem:[%s16057_s1 + $0xae4] ss:$16 sps:$4 sm:$0xff]   ;;  %v10977_v1 = vld [vmem:[%s16057_s1 + $0xaec] ss:$16 sps:$4 sm:$0xff]  }
 0x123   :  { %7403 = vmatpush1.bf16.msra.mxu0 %v10882_v2  ;;  %8141 = vmatpush1.bf16.msra.mxu1 %v10885_v3  ;;  %v10972_v2 = vld [vmem:[%s16057_s1 + $0xae0] ss:$16 sps:$4 sm:$0xff]   ;;  %v10975_v3 = vld [vmem:[%s16057_s1 + $0xae8] ss:$16 sps:$4 sm:$0xff]  }
 0x124   :  { %7404 = vmatprep.subr.bf16.mxu0 %v10890_v4  ;;  %8142 = vmatprep.subr.bf16.mxu1 %v10893_v5  ;;  %v10980_v4 = vld [vmem:[%s16057_s1 + $0xb04] ss:$16 sps:$4 sm:$0xff]   ;;  %v10983_v5 = vld [vmem:[%s16057_s1 + $0xb0c] ss:$16 sps:$4 sm:$0xff]  }
 0x127   :  { %7405 = vmatpush1.bf16.msra.mxu0 %v10888_v6  ;;  %8143 = vmatpush1.bf16.msra.mxu1 %v10891_v7  ;;  %v10978_v6 = vld [vmem:[%s16057_s1 + $0xb00] ss:$16 sps:$4 sm:$0xff]   ;;  %v10981_v7 = vld [vmem:[%s16057_s1 + $0xb08] ss:$16 sps:$4 sm:$0xff]  }
 0x128   :  { %7406 = vmatprep.subr.bf16.mxu0 %v10896_v8  ;;  %8144 = vmatprep.subr.bf16.mxu1 %v10899_v9  ;;  %v10986_v8 = vld [vmem:[%s16057_s1 + $0xb24] ss:$16 sps:$4 sm:$0xff]   ;;  %v10989_v9 = vld [vmem:[%s16057_s1 + $0xb2c] ss:$16 sps:$4 sm:$0xff]  }
 0x12b   :  { %7407 = vmatpush1.bf16.msra.mxu0 %v10894_v10  ;;  %8145 = vmatpush1.bf16.msra.mxu1 %v10897_v11  ;;  %v10984_v10 = vld [vmem:[%s16057_s1 + $0xb20] ss:$16 sps:$4 sm:$0xff]   ;;  %v10987_v11 = vld [vmem:[%s16057_s1 + $0xb28] ss:$16 sps:$4 sm:$0xff]  }
 0x12c   :  { %7408 = vmatprep.subr.bf16.mxu0 %v10902_v12  ;;  %8146 = vmatprep.subr.bf16.mxu1 %v10905_v52  ;;  %v10992_v12 = vld [vmem:[%s16057_s1 + $0xb44] ss:$16 sps:$4 sm:$0xff]   ;;  %v10995_v52 = vld [vmem:[%s16057_s1 + $0xb4c] ss:$16 sps:$4 sm:$0xff]  }
 0x12f   :  { %7409 = vmatpush1.bf16.msra.mxu0 %v10900_v15  ;;  %8147 = vmatpush1.bf16.msra.mxu1 %v10903_v16  ;;  %v10990_v15 = vld [vmem:[%s16057_s1 + $0xb40] ss:$16 sps:$4 sm:$0xff]   ;;  %v10993_v16 = vld [vmem:[%s16057_s1 + $0xb48] ss:$16 sps:$4 sm:$0xff]  }
 0x130   :  { %7410 = vmatprep.subr.bf16.mxu0 %v10908_v17  ;;  %8148 = vmatprep.subr.bf16.mxu1 %v10911_v18  ;;  %v10998_v17 = vld [vmem:[%s16057_s1 + $0xb64] ss:$16 sps:$4 sm:$0xff]   ;;  %v11001_v18 = vld [vmem:[%s16057_s1 + $0xb6c] ss:$16 sps:$4 sm:$0xff]  }
 0x133   :  { %7411 = vmatpush1.bf16.msra.mxu0 %v10906_v19  ;;  %8149 = vmatpush1.bf16.msra.mxu1 %v10909_v20  ;;  %v10996_v19 = vld [vmem:[%s16057_s1 + $0xb60] ss:$16 sps:$4 sm:$0xff]   ;;  %v10999_v20 = vld [vmem:[%s16057_s1 + $0xb68] ss:$16 sps:$4 sm:$0xff]  }
 0x134   :  { %7412 = vmatprep.subr.bf16.mxu0 %v10914_v22  ;;  %8150 = vmatprep.subr.bf16.mxu1 %v10917_v23  ;;  %v11004_v22 = vld [vmem:[%s16057_s1 + $0xb84] ss:$16 sps:$4 sm:$0xff]   ;;  %v11007_v23 = vld [vmem:[%s16057_s1 + $0xb8c] ss:$16 sps:$4 sm:$0xff]  }
 0x137   :  { %7413 = vmatpush1.bf16.msra.mxu0 %v10912_v24  ;;  %8151 = vmatpush1.bf16.msra.mxu1 %v10915_v13  ;;  %v11002_v24 = vld [vmem:[%s16057_s1 + $0xb80] ss:$16 sps:$4 sm:$0xff]   ;;  %v11005_v13 = vld [vmem:[%s16057_s1 + $0xb88] ss:$16 sps:$4 sm:$0xff]  }
 0x138   :  { %7414 = vmatprep.subr.bf16.mxu0 %v10920_v27  ;;  %8152 = vmatprep.subr.bf16.mxu1 %v10923_v28  ;;  %v11010_v27 = vld [vmem:[%s16057_s1 + $0xba4] ss:$16 sps:$4 sm:$0xff]   ;;  %v11013_v28 = vld [vmem:[%s16057_s1 + $0xbac] ss:$16 sps:$4 sm:$0xff]  }
 0x13b   :  { %7415 = vmatpush1.bf16.msra.mxu0 %v10918_v29  ;;  %8153 = vmatpush1.bf16.msra.mxu1 %v10921_v14  ;;  %v11008_v29 = vld [vmem:[%s16057_s1 + $0xba0] ss:$16 sps:$4 sm:$0xff]   ;;  %v11011_v14 = vld [vmem:[%s16057_s1 + $0xba8] ss:$16 sps:$4 sm:$0xff]  }
 0x13c   :  { %7416 = vmatprep.subr.bf16.mxu0 %v10926_v30  ;;  %8154 = vmatprep.subr.bf16.mxu1 %v10929_v31  ;;  %v11016_v30 = vld [vmem:[%s16057_s1 + $0xbc4] ss:$16 sps:$4 sm:$0xff]   ;;  %v11019_v31 = vld [vmem:[%s16057_s1 + $0xbcc] ss:$16 sps:$4 sm:$0xff]  }
 0x13f   :  { %7417 = vmatpush1.bf16.msra.mxu0 %v10924_v25  ;;  %8155 = vmatpush1.bf16.msra.mxu1 %v10927_v32  ;;  %v12217_v25 = vld [vmem:[%s16056_s0 + $0x8] sm:$0xff] }
 0x140   :  { %7427 = vmatprep.subr.bf16.mxu0 %v10932_v33  ;;  %8165 = vmatprep.subr.bf16.mxu1 %v10935_v26  ;;  %v1255_v32 = vcombine.high %v12217_v25, %v12217_v25  ;;  %v11014_v33 = vld [vmem:[%s16057_s1 + $0xbc0] ss:$16 sps:$4 sm:$0xff]   ;;  %v11017_v26 = vld [vmem:[%s16057_s1 + $0xbc8] ss:$16 sps:$4 sm:$0xff]  }
 0x141   :  { %v11098_v25 = vld [vmem:[%s16057_s1 + $0xd80] ss:$16 sps:$4 sm:$0xff]  }
 0x142   :  { %7419 = vmatmul.mubr.bf16.vlgmr.msra.gmra.mrb[0].mxu0 %v13299_v35  ;;  %8157 = vmatmul.mubr.bf16.vlgmr.msra.gmra.mrb[0].mxu1 %v13299_v35 }
 0x143   :  { %7428 = vmatpush1.bf16.msra.mxu0 %v10930_v36  ;;  %8166 = vmatpush1.bf16.msra.mxu1 %v10933_v37  ;;  %v11022_v36 = vld [vmem:[%s16057_s1 + $0xbe4] ss:$16 sps:$4 sm:$0xff]   ;;  %v11025_v37 = vld [vmem:[%s16057_s1 + $0xbec] ss:$16 sps:$4 sm:$0xff]  }
 0x144   :  { %7429 = vmatprep.subr.bf16.mxu0 %v10938_v38  ;;  %8167 = vmatprep.subr.bf16.mxu1 %v10941_v21  ;;  %v13489_v38 = vrot.slane %v1255_v32, %v12412_v49  ;;  %v11020_v21 = vld [vmem:[%s16057_s1 + $0xbe0] ss:$16 sps:$4 sm:$0xff]   ;;  %v11101_v32 = vld [vmem:[%s16057_s1 + $0xd88] ss:$16 sps:$4 sm:$0xff]  }
 0x145   :  { %7459 = vmatprep.mubr.bf16.mxu0 %v1302_v39  ;;  %8197 = vmatprep.mubr.bf16.mxu1 %v1302_v39  ;;  %v11023_v39 = vld [vmem:[%s16057_s1 + $0xbe8] ss:$16 sps:$4 sm:$0xff]  }
 0x147   :  { %7430 = vmatpush1.bf16.msra.mxu0 %v10936_v40  ;;  %8168 = vmatpush1.bf16.msra.mxu1 %v10939_v41  ;;  %v11028_v40 = vld [vmem:[%s16057_s1 + $0xc04] ss:$16 sps:$4 sm:$0xff]   ;;  %v11031_v41 = vld [vmem:[%s16057_s1 + $0xc0c] ss:$16 sps:$4 sm:$0xff]  }
 0x148   :  { %7431 = vmatprep.subr.bf16.mxu0 %v10944_v34  ;;  %8169 = vmatprep.subr.bf16.mxu1 %v10947_v43  ;;  %v1271_v34 = vcombine.high %v13489_v38, %v13489_v38  ;;  %v1300_v43 = vcombine.high %v13299_v35, %v13299_v35  ;;  %v11037_v35 = vld [vmem:[%s16057_s1 + $0xc2c] ss:$16 sps:$4 sm:$0xff]  }
 0x14b   :  { %7432 = vmatpush1.bf16.msra.mxu0 %v10942_v44  ;;  %8170 = vmatpush1.bf16.msra.mxu1 %v10945_v45  ;;  %v11026_v44 = vld [vmem:[%s16057_s1 + $0xc00] ss:$16 sps:$4 sm:$0xff]   ;;  %v11029_v45 = vld [vmem:[%s16057_s1 + $0xc08] ss:$16 sps:$4 sm:$0xff]  }
 0x14c   :  { %7433 = vmatprep.subr.bf16.mxu0 %v10950_v46  ;;  %8171 = vmatprep.subr.bf16.mxu1 %v10953_v47  ;;  %v11034_v46 = vld [vmem:[%s16057_s1 + $0xc24] ss:$16 sps:$4 sm:$0xff]   ;;  %v13520_v47 = vrot.slane %v1271_v34, %v12412_v49 }
 0x14d   :  { %v11118_v34 = vld [vmem:[%s16057_s1 + $0xde4] ss:$16 sps:$4 sm:$0xff]  }
 0x14f   :  { %7434 = vmatpush1.bf16.msra.mxu0 %v10948_v48  ;;  %8172 = vmatpush1.bf16.msra.mxu1 %v10951_v50  ;;  %v11032_v48 = vld [vmem:[%s16057_s1 + $0xc20] ss:$16 sps:$4 sm:$0xff]   ;;  %v11035_v50 = vld [vmem:[%s16057_s1 + $0xc28] ss:$16 sps:$4 sm:$0xff]  }
 0x150   :  { %7435 = vmatprep.subr.bf16.mxu0 %v10956_v51  ;;  %8173 = vmatprep.subr.bf16.mxu1 %v10959_v53  ;;  %v11040_v51 = vld [vmem:[%s16057_s1 + $0xc44] ss:$16 sps:$4 sm:$0xff]   ;;  %v11043_v53 = vld [vmem:[%s16057_s1 + $0xc4c] ss:$16 sps:$4 sm:$0xff]  }
 0x153   :  { %7436 = vmatpush1.bf16.msra.mxu0 %v10954_v54  ;;  %8174 = vmatpush1.bf16.msra.mxu1 %v10957_v55  ;;  %v11038_v54 = vld [vmem:[%s16057_s1 + $0xc40] ss:$16 sps:$4 sm:$0xff]   ;;  %v11041_v55 = vld [vmem:[%s16057_s1 + $0xc48] ss:$16 sps:$4 sm:$0xff]  }
 0x154   :  { %7437 = vmatprep.subr.bf16.mxu0 %v10962_v56  ;;  %8175 = vmatprep.subr.bf16.mxu1 %v10965_v57  ;;  %v11046_v56 = vld [vmem:[%s16057_s1 + $0xc64] ss:$16 sps:$4 sm:$0xff]   ;;  %v11049_v57 = vld [vmem:[%s16057_s1 + $0xc6c] ss:$16 sps:$4 sm:$0xff]  }
 0x157   :  { %7438 = vmatpush1.bf16.msra.mxu0 %v10960_v58  ;;  %8176 = vmatpush1.bf16.msra.mxu1 %v10963_v59  ;;  %v11044_v58 = vld [vmem:[%s16057_s1 + $0xc60] ss:$16 sps:$4 sm:$0xff]   ;;  %v11047_v59 = vld [vmem:[%s16057_s1 + $0xc68] ss:$16 sps:$4 sm:$0xff]  }
 0x158   :  { %7439 = vmatprep.subr.bf16.mxu0 %v10968_v60  ;;  %8177 = vmatprep.subr.bf16.mxu1 %v10971_v61  ;;  %v11052_v60 = vld [vmem:[%s16057_s1 + $0xc84] ss:$16 sps:$4 sm:$0xff]   ;;  %v11055_v61 = vld [vmem:[%s16057_s1 + $0xc8c] ss:$16 sps:$4 sm:$0xff]  }
 0x15b   :  { %7440 = vmatpush1.bf16.msra.mxu0 %v10966_v62  ;;  %8178 = vmatpush1.bf16.msra.mxu1 %v10969_v63  ;;  %v11050_v62 = vld [vmem:[%s16057_s1 + $0xc80] ss:$16 sps:$4 sm:$0xff]   ;;  %v11053_v63 = vld [vmem:[%s16057_s1 + $0xc88] ss:$16 sps:$4 sm:$0xff]  }
 0x15c   :  { %7441 = vmatprep.subr.bf16.mxu0 %v10974_v0  ;;  %8179 = vmatprep.subr.bf16.mxu1 %v10977_v1  ;;  %v11058_v0 = vld [vmem:[%s16057_s1 + $0xca4] ss:$16 sps:$4 sm:$0xff]   ;;  %v11061_v1 = vld [vmem:[%s16057_s1 + $0xcac] ss:$16 sps:$4 sm:$0xff]  }
 0x15f   :  { %7442 = vmatpush1.bf16.msra.mxu0 %v10972_v2  ;;  %8180 = vmatpush1.bf16.msra.mxu1 %v10975_v3  ;;  %v11056_v2 = vld [vmem:[%s16057_s1 + $0xca0] ss:$16 sps:$4 sm:$0xff]   ;;  %v11059_v3 = vld [vmem:[%s16057_s1 + $0xca8] ss:$16 sps:$4 sm:$0xff]  }
 0x160   :  { %7443 = vmatprep.subr.bf16.mxu0 %v10980_v4  ;;  %8181 = vmatprep.subr.bf16.mxu1 %v10983_v5  ;;  %v11064_v4 = vld [vmem:[%s16057_s1 + $0xcc4] ss:$16 sps:$4 sm:$0xff]   ;;  %v11067_v5 = vld [vmem:[%s16057_s1 + $0xccc] ss:$16 sps:$4 sm:$0xff]  }
 0x163   :  { %7444 = vmatpush1.bf16.msra.mxu0 %v10978_v6  ;;  %8182 = vmatpush1.bf16.msra.mxu1 %v10981_v7  ;;  %v11062_v6 = vld [vmem:[%s16057_s1 + $0xcc0] ss:$16 sps:$4 sm:$0xff]   ;;  %v11065_v7 = vld [vmem:[%s16057_s1 + $0xcc8] ss:$16 sps:$4 sm:$0xff]  }
 0x164   :  { %7445 = vmatprep.subr.bf16.mxu0 %v10986_v8  ;;  %8183 = vmatprep.subr.bf16.mxu1 %v10989_v9  ;;  %v11070_v8 = vld [vmem:[%s16057_s1 + $0xce4] ss:$16 sps:$4 sm:$0xff]   ;;  %v11073_v9 = vld [vmem:[%s16057_s1 + $0xcec] ss:$16 sps:$4 sm:$0xff]  }
 0x167   :  { %7446 = vmatpush1.bf16.msra.mxu0 %v10984_v10  ;;  %8184 = vmatpush1.bf16.msra.mxu1 %v10987_v11  ;;  %v11068_v10 = vld [vmem:[%s16057_s1 + $0xce0] ss:$16 sps:$4 sm:$0xff]   ;;  %v11071_v11 = vld [vmem:[%s16057_s1 + $0xce8] ss:$16 sps:$4 sm:$0xff]  }
 0x168   :  { %7447 = vmatprep.subr.bf16.mxu0 %v10992_v12  ;;  %8185 = vmatprep.subr.bf16.mxu1 %v10995_v52  ;;  %v11076_v12 = vld [vmem:[%s16057_s1 + $0xd04] ss:$16 sps:$4 sm:$0xff]   ;;  %v11079_v52 = vld [vmem:[%s16057_s1 + $0xd0c] ss:$16 sps:$4 sm:$0xff]  }
 0x16b   :  { %7448 = vmatpush1.bf16.msra.mxu0 %v10990_v15  ;;  %8186 = vmatpush1.bf16.msra.mxu1 %v10993_v16  ;;  %v11074_v15 = vld [vmem:[%s16057_s1 + $0xd00] ss:$16 sps:$4 sm:$0xff]   ;;  %v11077_v16 = vld [vmem:[%s16057_s1 + $0xd08] ss:$16 sps:$4 sm:$0xff]  }
 0x16c   :  { %7449 = vmatprep.subr.bf16.mxu0 %v10998_v17  ;;  %8187 = vmatprep.subr.bf16.mxu1 %v11001_v18  ;;  %v11082_v17 = vld [vmem:[%s16057_s1 + $0xd24] ss:$16 sps:$4 sm:$0xff]   ;;  %v11085_v18 = vld [vmem:[%s16057_s1 + $0xd2c] ss:$16 sps:$4 sm:$0xff]  }
 0x16f   :  { %7450 = vmatpush1.bf16.msra.mxu0 %v10996_v19  ;;  %8188 = vmatpush1.bf16.msra.mxu1 %v10999_v20  ;;  %v11080_v19 = vld [vmem:[%s16057_s1 + $0xd20] ss:$16 sps:$4 sm:$0xff]   ;;  %v11083_v20 = vld [vmem:[%s16057_s1 + $0xd28] ss:$16 sps:$4 sm:$0xff]  }
 0x170   :  { %7451 = vmatprep.subr.bf16.mxu0 %v11004_v22  ;;  %8189 = vmatprep.subr.bf16.mxu1 %v11007_v23  ;;  %v11088_v22 = vld [vmem:[%s16057_s1 + $0xd44] ss:$16 sps:$4 sm:$0xff]   ;;  %v11091_v23 = vld [vmem:[%s16057_s1 + $0xd4c] ss:$16 sps:$4 sm:$0xff]  }
 0x173   :  { %7452 = vmatpush1.bf16.msra.mxu0 %v11002_v24  ;;  %8190 = vmatpush1.bf16.msra.mxu1 %v11005_v13  ;;  %v11086_v24 = vld [vmem:[%s16057_s1 + $0xd40] ss:$16 sps:$4 sm:$0xff]   ;;  %v11089_v13 = vld [vmem:[%s16057_s1 + $0xd48] ss:$16 sps:$4 sm:$0xff]  }
 0x174   :  { %7453 = vmatprep.subr.bf16.mxu0 %v11010_v27  ;;  %8191 = vmatprep.subr.bf16.mxu1 %v11013_v28  ;;  %v11094_v27 = vld [vmem:[%s16057_s1 + $0xd64] ss:$16 sps:$4 sm:$0xff]   ;;  %v11097_v28 = vld [vmem:[%s16057_s1 + $0xd6c] ss:$16 sps:$4 sm:$0xff]  }
 0x177   :  { %7454 = vmatpush1.bf16.msra.mxu0 %v11008_v29  ;;  %8192 = vmatpush1.bf16.msra.mxu1 %v11011_v14  ;;  %v11092_v29 = vld [vmem:[%s16057_s1 + $0xd60] ss:$16 sps:$4 sm:$0xff]   ;;  %v11095_v14 = vld [vmem:[%s16057_s1 + $0xd68] ss:$16 sps:$4 sm:$0xff]  }
 0x178   :  { %7455 = vmatprep.subr.bf16.mxu0 %v11016_v30  ;;  %8193 = vmatprep.subr.bf16.mxu1 %v11019_v31  ;;  %v11100_v30 = vld [vmem:[%s16057_s1 + $0xd84] ss:$16 sps:$4 sm:$0xff]   ;;  %v11103_v31 = vld [vmem:[%s16057_s1 + $0xd8c] ss:$16 sps:$4 sm:$0xff]  }
 0x17b   :  { %7456 = vmatpush1.bf16.msra.mxu0 %v11014_v33  ;;  %8194 = vmatpush1.bf16.msra.mxu1 %v11017_v26  ;;  %v11106_v33 = vld [vmem:[%s16057_s1 + $0xda4] ss:$16 sps:$4 sm:$0xff]   ;;  %v11109_v26 = vld [vmem:[%s16057_s1 + $0xdac] ss:$16 sps:$4 sm:$0xff]  }
 0x17c   :  { %7457 = vmatprep.subr.bf16.mxu0 %v11022_v36  ;;  %8195 = vmatprep.subr.bf16.mxu1 %v11025_v37  ;;  %v11104_v36 = vld [vmem:[%s16057_s1 + $0xda0] ss:$16 sps:$4 sm:$0xff]   ;;  %v11107_v37 = vld [vmem:[%s16057_s1 + $0xda8] ss:$16 sps:$4 sm:$0xff]  }
 0x17f   :  { %7458 = vmatpush1.bf16.msra.mxu0 %v11020_v21  ;;  %8196 = vmatpush1.bf16.msra.mxu1 %v11023_v39  ;;  %v11112_v21 = vld [vmem:[%s16057_s1 + $0xdc4] ss:$16 sps:$4 sm:$0xff]   ;;  %v11115_v39 = vld [vmem:[%s16057_s1 + $0xdcc] ss:$16 sps:$4 sm:$0xff]  }
 0x180   :  { %7468 = vmatprep.subr.bf16.mxu0 %v11028_v40  ;;  %8206 = vmatprep.subr.bf16.mxu1 %v11031_v41  ;;  %v11110_v40 = vld [vmem:[%s16057_s1 + $0xdc0] ss:$16 sps:$4 sm:$0xff]   ;;  %v11113_v41 = vld [vmem:[%s16057_s1 + $0xdc8] ss:$16 sps:$4 sm:$0xff]  }
 0x182   :  { %7460 = vmatmul.mubr.bf16.vlgmr.msra.gmra.mrb[0].mxu0 %v1300_v43  ;;  %8198 = vmatmul.mubr.bf16.vlgmr.msra.gmra.mrb[0].mxu1 %v1300_v43  ;;  %v11121_v43 = vld [vmem:[%s16057_s1 + $0xdec] ss:$16 sps:$4 sm:$0xff]  }
 0x183   :  { %7469 = vmatpush1.bf16.msra.mxu0 %v11026_v44  ;;  %8207 = vmatpush1.bf16.msra.mxu1 %v11029_v45  ;;  %v11116_v44 = vld [vmem:[%s16057_s1 + $0xde0] ss:$16 sps:$4 sm:$0xff]   ;;  %v11119_v45 = vld [vmem:[%s16057_s1 + $0xde8] ss:$16 sps:$4 sm:$0xff]  }
 0x184   :  { %7470 = vmatprep.subr.bf16.mxu0 %v11034_v46  ;;  %8208 = vmatprep.subr.bf16.mxu1 %v11037_v35  ;;  %v11125_v46 = vld [vmem:[%s16057_s1 + $0xe04] ss:$16 sps:$4 sm:$0xff]   ;;  %v11128_v35 = vld [vmem:[%s16057_s1 + $0xe0c] ss:$16 sps:$4 sm:$0xff]  }
 0x185   :  { %7500 = vmatprep.mubr.bf16.mxu0 %v13520_v47  ;;  %8238 = vmatprep.mubr.bf16.mxu1 %v13520_v47 }
 0x187   :  { %7471 = vmatpush1.bf16.msra.mxu0 %v11032_v48  ;;  %8209 = vmatpush1.bf16.msra.mxu1 %v11035_v50  ;;  %v13706_v48 = vrot.slane %v13489_v38, %v12412_v49  ;;  %v11123_v50 = vld [vmem:[%s16057_s1 + $0xe00] ss:$16 sps:$4 sm:$0xff]   ;;  %v11134_v38 = vld [vmem:[%s16057_s1 + $0xe2c] ss:$16 sps:$4 sm:$0xff]  }
 0x188   :  { %7472 = vmatprep.subr.bf16.mxu0 %v11040_v51  ;;  %8210 = vmatprep.subr.bf16.mxu1 %v11043_v53  ;;  %v11126_v51 = vld [vmem:[%s16057_s1 + $0xe08] ss:$16 sps:$4 sm:$0xff]   ;;  %v11131_v53 = vld [vmem:[%s16057_s1 + $0xe24] ss:$16 sps:$4 sm:$0xff]  }
 0x18b   :  { %7473 = vmatpush1.bf16.msra.mxu0 %v11038_v54  ;;  %8211 = vmatpush1.bf16.msra.mxu1 %v11041_v55  ;;  %v1303_v54 = vcombine.high %v13520_v47, %v13520_v47  ;;  %v11129_v55 = vld [vmem:[%s16057_s1 + $0xe20] ss:$16 sps:$4 sm:$0xff]   ;;  %v11137_v47 = vld [vmem:[%s16057_s1 + $0xe44] ss:$16 sps:$4 sm:$0xff]  }
 0x18c   :  { %7474 = vmatprep.subr.bf16.mxu0 %v11046_v56  ;;  %8212 = vmatprep.subr.bf16.mxu1 %v11049_v57  ;;  %v11132_v56 = vld [vmem:[%s16057_s1 + $0xe28] ss:$16 sps:$4 sm:$0xff]   ;;  %v11140_v57 = vld [vmem:[%s16057_s1 + $0xe4c] ss:$16 sps:$4 sm:$0xff]  }
 0x18f   :  { %7475 = vmatpush1.bf16.msra.mxu0 %v11044_v58  ;;  %8213 = vmatpush1.bf16.msra.mxu1 %v11047_v59  ;;  %v11135_v58 = vld [vmem:[%s16057_s1 + $0xe40] ss:$16 sps:$4 sm:$0xff]   ;;  %v11138_v59 = vld [vmem:[%s16057_s1 + $0xe48] ss:$16 sps:$4 sm:$0xff]  }
 0x190   :  { %7476 = vmatprep.subr.bf16.mxu0 %v11052_v60  ;;  %8214 = vmatprep.subr.bf16.mxu1 %v11055_v61  ;;  %v11143_v60 = vld [vmem:[%s16057_s1 + $0xe64] ss:$16 sps:$4 sm:$0xff]   ;;  %v11146_v61 = vld [vmem:[%s16057_s1 + $0xe6c] ss:$16 sps:$4 sm:$0xff]  }
 0x193   :  { %7477 = vmatpush1.bf16.msra.mxu0 %v11050_v62  ;;  %8215 = vmatpush1.bf16.msra.mxu1 %v11053_v63  ;;  %v11141_v62 = vld [vmem:[%s16057_s1 + $0xe60] ss:$16 sps:$4 sm:$0xff]   ;;  %v11144_v63 = vld [vmem:[%s16057_s1 + $0xe68] ss:$16 sps:$4 sm:$0xff]  }
 0x194   :  { %7478 = vmatprep.subr.bf16.mxu0 %v11058_v0  ;;  %8216 = vmatprep.subr.bf16.mxu1 %v11061_v1  ;;  %v11149_v0 = vld [vmem:[%s16057_s1 + $0xe84] ss:$16 sps:$4 sm:$0xff]   ;;  %v11152_v1 = vld [vmem:[%s16057_s1 + $0xe8c] ss:$16 sps:$4 sm:$0xff]  }
 0x197   :  { %7479 = vmatpush1.bf16.msra.mxu0 %v11056_v2  ;;  %8217 = vmatpush1.bf16.msra.mxu1 %v11059_v3  ;;  %v11147_v2 = vld [vmem:[%s16057_s1 + $0xe80] ss:$16 sps:$4 sm:$0xff]   ;;  %v11150_v3 = vld [vmem:[%s16057_s1 + $0xe88] ss:$16 sps:$4 sm:$0xff]  }
 0x198   :  { %7480 = vmatprep.subr.bf16.mxu0 %v11064_v4  ;;  %8218 = vmatprep.subr.bf16.mxu1 %v11067_v5  ;;  %v11155_v4 = vld [vmem:[%s16057_s1 + $0xea4] ss:$16 sps:$4 sm:$0xff]   ;;  %v11158_v5 = vld [vmem:[%s16057_s1 + $0xeac] ss:$16 sps:$4 sm:$0xff]  }
 0x19b   :  { %7481 = vmatpush1.bf16.msra.mxu0 %v11062_v6  ;;  %8219 = vmatpush1.bf16.msra.mxu1 %v11065_v7  ;;  %v11153_v6 = vld [vmem:[%s16057_s1 + $0xea0] ss:$16 sps:$4 sm:$0xff]   ;;  %v11156_v7 = vld [vmem:[%s16057_s1 + $0xea8] ss:$16 sps:$4 sm:$0xff]  }
 0x19c   :  { %7482 = vmatprep.subr.bf16.mxu0 %v11070_v8  ;;  %8220 = vmatprep.subr.bf16.mxu1 %v11073_v9  ;;  %v11161_v8 = vld [vmem:[%s16057_s1 + $0xec4] ss:$16 sps:$4 sm:$0xff]   ;;  %v11164_v9 = vld [vmem:[%s16057_s1 + $0xecc] ss:$16 sps:$4 sm:$0xff]  }
 0x19f   :  { %7483 = vmatpush1.bf16.msra.mxu0 %v11068_v10  ;;  %8221 = vmatpush1.bf16.msra.mxu1 %v11071_v11  ;;  %v11159_v10 = vld [vmem:[%s16057_s1 + $0xec0] ss:$16 sps:$4 sm:$0xff]   ;;  %v11162_v11 = vld [vmem:[%s16057_s1 + $0xec8] ss:$16 sps:$4 sm:$0xff]  }
 0x1a0   :  { %7484 = vmatprep.subr.bf16.mxu0 %v11076_v12  ;;  %8222 = vmatprep.subr.bf16.mxu1 %v11079_v52  ;;  %v11167_v12 = vld [vmem:[%s16057_s1 + $0xee4] ss:$16 sps:$4 sm:$0xff]   ;;  %v11170_v52 = vld [vmem:[%s16057_s1 + $0xeec] ss:$16 sps:$4 sm:$0xff]  }
 0x1a3   :  { %7485 = vmatpush1.bf16.msra.mxu0 %v11074_v15  ;;  %8223 = vmatpush1.bf16.msra.mxu1 %v11077_v16  ;;  %v11165_v15 = vld [vmem:[%s16057_s1 + $0xee0] ss:$16 sps:$4 sm:$0xff]   ;;  %v11168_v16 = vld [vmem:[%s16057_s1 + $0xee8] ss:$16 sps:$4 sm:$0xff]  }
 0x1a4   :  { %7486 = vmatprep.subr.bf16.mxu0 %v11082_v17  ;;  %8224 = vmatprep.subr.bf16.mxu1 %v11085_v18  ;;  %v11173_v17 = vld [vmem:[%s16057_s1 + $0xf04] ss:$16 sps:$4 sm:$0xff]   ;;  %v11176_v18 = vld [vmem:[%s16057_s1 + $0xf0c] ss:$16 sps:$4 sm:$0xff]  }
 0x1a7   :  { %7487 = vmatpush1.bf16.msra.mxu0 %v11080_v19  ;;  %8225 = vmatpush1.bf16.msra.mxu1 %v11083_v20  ;;  %v11171_v19 = vld [vmem:[%s16057_s1 + $0xf00] ss:$16 sps:$4 sm:$0xff]   ;;  %v11174_v20 = vld [vmem:[%s16057_s1 + $0xf08] ss:$16 sps:$4 sm:$0xff]  }
 0x1a8   :  { %7488 = vmatprep.subr.bf16.mxu0 %v11088_v22  ;;  %8226 = vmatprep.subr.bf16.mxu1 %v11091_v23  ;;  %v11179_v22 = vld [vmem:[%s16057_s1 + $0xf24] ss:$16 sps:$4 sm:$0xff]   ;;  %v11182_v23 = vld [vmem:[%s16057_s1 + $0xf2c] ss:$16 sps:$4 sm:$0xff]  }
 0x1ab   :  { %7489 = vmatpush1.bf16.msra.mxu0 %v11086_v24  ;;  %8227 = vmatpush1.bf16.msra.mxu1 %v11089_v13  ;;  %v11177_v24 = vld [vmem:[%s16057_s1 + $0xf20] ss:$16 sps:$4 sm:$0xff]   ;;  %v11180_v13 = vld [vmem:[%s16057_s1 + $0xf28] ss:$16 sps:$4 sm:$0xff]  }
 0x1ac   :  { %7490 = vmatprep.subr.bf16.mxu0 %v11094_v27  ;;  %8228 = vmatprep.subr.bf16.mxu1 %v11097_v28  ;;  %v11185_v27 = vld [vmem:[%s16057_s1 + $0xf44] ss:$16 sps:$4 sm:$0xff]   ;;  %v11188_v28 = vld [vmem:[%s16057_s1 + $0xf4c] ss:$16 sps:$4 sm:$0xff]  }
 0x1af   :  { %7491 = vmatpush1.bf16.msra.mxu0 %v11092_v29  ;;  %8229 = vmatpush1.bf16.msra.mxu1 %v11095_v14  ;;  %v11183_v29 = vld [vmem:[%s16057_s1 + $0xf40] ss:$16 sps:$4 sm:$0xff]   ;;  %v11186_v14 = vld [vmem:[%s16057_s1 + $0xf48] ss:$16 sps:$4 sm:$0xff]  }
 0x1b0   :  { %7492 = vmatprep.subr.bf16.mxu0 %v11100_v30  ;;  %8230 = vmatprep.subr.bf16.mxu1 %v11103_v31  ;;  %v11191_v30 = vld [vmem:[%s16057_s1 + $0xf64] ss:$16 sps:$4 sm:$0xff]   ;;  %v11194_v31 = vld [vmem:[%s16057_s1 + $0xf6c] ss:$16 sps:$4 sm:$0xff]  }
 0x1b3   :  { %7493 = vmatpush1.bf16.msra.mxu0 %v11098_v25  ;;  %8231 = vmatpush1.bf16.msra.mxu1 %v11101_v32  ;;  %v11189_v25 = vld [vmem:[%s16057_s1 + $0xf60] ss:$16 sps:$4 sm:$0xff]   ;;  %v11192_v32 = vld [vmem:[%s16057_s1 + $0xf68] ss:$16 sps:$4 sm:$0xff]  }
 0x1b4   :  { %7494 = vmatprep.subr.bf16.mxu0 %v11106_v33  ;;  %8232 = vmatprep.subr.bf16.mxu1 %v11109_v26  ;;  %v11197_v33 = vld [vmem:[%s16057_s1 + $0xf84] ss:$16 sps:$4 sm:$0xff]   ;;  %v11200_v26 = vld [vmem:[%s16057_s1 + $0xf8c] ss:$16 sps:$4 sm:$0xff]  }
 0x1b7   :  { %7495 = vmatpush1.bf16.msra.mxu0 %v11104_v36  ;;  %8233 = vmatpush1.bf16.msra.mxu1 %v11107_v37  ;;  %v11195_v36 = vld [vmem:[%s16057_s1 + $0xf80] ss:$16 sps:$4 sm:$0xff]   ;;  %v11198_v37 = vld [vmem:[%s16057_s1 + $0xf88] ss:$16 sps:$4 sm:$0xff]  }
 0x1b8   :  { %7496 = vmatprep.subr.bf16.mxu0 %v11112_v21  ;;  %8234 = vmatprep.subr.bf16.mxu1 %v11115_v39  ;;  %v11203_v21 = vld [vmem:[%s16057_s1 + $0xfa4] ss:$16 sps:$4 sm:$0xff]   ;;  %v11206_v39 = vld [vmem:[%s16057_s1 + $0xfac] ss:$16 sps:$4 sm:$0xff]  }
 0x1bb   :  { %7497 = vmatpush1.bf16.msra.mxu0 %v11110_v40  ;;  %8235 = vmatpush1.bf16.msra.mxu1 %v11113_v41  ;;  %v11201_v40 = vld [vmem:[%s16057_s1 + $0xfa0] ss:$16 sps:$4 sm:$0xff]   ;;  %v11204_v41 = vld [vmem:[%s16057_s1 + $0xfa8] ss:$16 sps:$4 sm:$0xff]  }
 0x1bc   :  { %7498 = vmatprep.subr.bf16.mxu0 %v11118_v34  ;;  %8236 = vmatprep.subr.bf16.mxu1 %v11121_v43  ;;  %v11209_v34 = vld [vmem:[%s16057_s1 + $0xfc4] ss:$16 sps:$4 sm:$0xff]   ;;  %v11212_v43 = vld [vmem:[%s16057_s1 + $0xfcc] ss:$16 sps:$4 sm:$0xff]  }
 0x1bf   :  { %7499 = vmatpush1.bf16.msra.mxu0 %v11116_v44  ;;  %8237 = vmatpush1.bf16.msra.mxu1 %v11119_v45  ;;  %v13883_v44 = vld.sshfl [vmem:[%s16056_s0 + $0x10] sm:$0xff pattern:$0x75316420] }
 0x1c0   :  { %7509 = vmatprep.subr.bf16.mxu0 %v11125_v46  ;;  %8247 = vmatprep.subr.bf16.mxu1 %v11128_v35  ;;  %v11207_v45 = vld [vmem:[%s16057_s1 + $0xfc0] ss:$16 sps:$4 sm:$0xff]   ;;  %v11210_v46 = vld [vmem:[%s16057_s1 + $0xfc8] ss:$16 sps:$4 sm:$0xff]   ;;  %v11215_v35 = vld [vmem:[%s16057_s1 + $0xfe4] ss:$16 sps:$4 sm:$0xff]  }
 0x1c2   :  { %7501 = vmatmul.mubr.bf16.vlgmr.msra.gmra.mrb[0].mxu0 %v13706_v48  ;;  %8239 = vmatmul.mubr.bf16.vlgmr.msra.gmra.mrb[0].mxu1 %v13706_v48 }
 0x1c3   :  { %7510 = vmatpush1.bf16.msra.mxu0 %v11123_v50  ;;  %8248 = vmatpush1.bf16.msra.mxu1 %v11126_v51  ;;  %v11218_v50 = vld [vmem:[%s16057_s1 + $0xfec] ss:$16 sps:$4 sm:$0xff]   ;;  %v11213_v51 = vld [vmem:[%s16057_s1 + $0xfe0] ss:$16 sps:$4 sm:$0xff]  }
 0x1c4   :  { %7511 = vmatprep.subr.bf16.mxu0 %v11131_v53  ;;  %8249 = vmatprep.subr.bf16.mxu1 %v11134_v38  ;;  %v11216_v53 = vld [vmem:[%s16057_s1 + $0xfe8] ss:$16 sps:$4 sm:$0xff]   ;;  %v11221_v38 = vld [vmem:[%s16057_s1 + $0x1004] ss:$16 sps:$4 sm:$0xff]  }
 0x1c5   :  { %7541 = vmatprep.mubr.bf16.mxu0 %v1303_v54  ;;  %8279 = vmatprep.mubr.bf16.mxu1 %v1303_v54  ;;  %v11224_v54 = vld [vmem:[%s16057_s1 + $0x100c] ss:$16 sps:$4 sm:$0xff]  }
 0x1c7   :  { %7512 = vmatpush1.bf16.msra.mxu0 %v11129_v55  ;;  %8250 = vmatpush1.bf16.msra.mxu1 %v11132_v56  ;;  %v1319_v55 = vcombine.high %v13883_v44, %v13883_v44  ;;  %v1301_v56 = vcombine.high %v13706_v48, %v13706_v48  ;;  %v11230_v48 = vld [vmem:[%s16057_s1 + $0x102c] ss:$16 sps:$4 sm:$0xff]  }
 0x1c8   :  { %7513 = vmatprep.subr.bf16.mxu0 %v11137_v47  ;;  %8251 = vmatprep.subr.bf16.mxu1 %v11140_v57  ;;  %v11219_v47 = vld [vmem:[%s16057_s1 + $0x1000] ss:$16 sps:$4 sm:$0xff]   ;;  %v11222_v57 = vld [vmem:[%s16057_s1 + $0x1008] ss:$16 sps:$4 sm:$0xff]  }
 0x1cb   :  { %7514 = vmatpush1.bf16.msra.mxu0 %v11135_v58  ;;  %8252 = vmatpush1.bf16.msra.mxu1 %v11138_v59  ;;  %v11227_v58 = vld [vmem:[%s16057_s1 + $0x1024] ss:$16 sps:$4 sm:$0xff]   ;;  %v13926_v59 = vrot.slane %v1319_v55, %v12412_v49 }
 0x1cc   :  { %7515 = vmatprep.subr.bf16.mxu0 %v11143_v60  ;;  %8253 = vmatprep.subr.bf16.mxu1 %v11146_v61  ;;  %v11225_v60 = vld [vmem:[%s16057_s1 + $0x1020] ss:$16 sps:$4 sm:$0xff]   ;;  %v11228_v61 = vld [vmem:[%s16057_s1 + $0x1028] ss:$16 sps:$4 sm:$0xff]   ;;  %v11311_v55 = vld [vmem:[%s16057_s1 + $0x11e4] ss:$16 sps:$4 sm:$0xff]  }
 0x1cf   :  { %7516 = vmatpush1.bf16.msra.mxu0 %v11141_v62  ;;  %8254 = vmatpush1.bf16.msra.mxu1 %v11144_v63  ;;  %v11233_v62 = vld [vmem:[%s16057_s1 + $0x1044] ss:$16 sps:$4 sm:$0xff]   ;;  %v11236_v63 = vld [vmem:[%s16057_s1 + $0x104c] ss:$16 sps:$4 sm:$0xff]  }
 0x1d0   :  { %7517 = vmatprep.subr.bf16.mxu0 %v11149_v0  ;;  %8255 = vmatprep.subr.bf16.mxu1 %v11152_v1  ;;  %v11231_v0 = vld [vmem:[%s16057_s1 + $0x1040] ss:$16 sps:$4 sm:$0xff]   ;;  %v11234_v1 = vld [vmem:[%s16057_s1 + $0x1048] ss:$16 sps:$4 sm:$0xff]  }
 0x1d3   :  { %7518 = vmatpush1.bf16.msra.mxu0 %v11147_v2  ;;  %8256 = vmatpush1.bf16.msra.mxu1 %v11150_v3  ;;  %v11239_v2 = vld [vmem:[%s16057_s1 + $0x1064] ss:$16 sps:$4 sm:$0xff]   ;;  %v11242_v3 = vld [vmem:[%s16057_s1 + $0x106c] ss:$16 sps:$4 sm:$0xff]  }
 0x1d4   :  { %7519 = vmatprep.subr.bf16.mxu0 %v11155_v4  ;;  %8257 = vmatprep.subr.bf16.mxu1 %v11158_v5  ;;  %v11237_v4 = vld [vmem:[%s16057_s1 + $0x1060] ss:$16 sps:$4 sm:$0xff]   ;;  %v11240_v5 = vld [vmem:[%s16057_s1 + $0x1068] ss:$16 sps:$4 sm:$0xff]  }
 0x1d7   :  { %7520 = vmatpush1.bf16.msra.mxu0 %v11153_v6  ;;  %8258 = vmatpush1.bf16.msra.mxu1 %v11156_v7  ;;  %v11245_v6 = vld [vmem:[%s16057_s1 + $0x1084] ss:$16 sps:$4 sm:$0xff]   ;;  %v11248_v7 = vld [vmem:[%s16057_s1 + $0x108c] ss:$16 sps:$4 sm:$0xff]  }
 0x1d8   :  { %7521 = vmatprep.subr.bf16.mxu0 %v11161_v8  ;;  %8259 = vmatprep.subr.bf16.mxu1 %v11164_v9  ;;  %v11243_v8 = vld [vmem:[%s16057_s1 + $0x1080] ss:$16 sps:$4 sm:$0xff]   ;;  %v11246_v9 = vld [vmem:[%s16057_s1 + $0x1088] ss:$16 sps:$4 sm:$0xff]  }
 0x1db   :  { %7522 = vmatpush1.bf16.msra.mxu0 %v11159_v10  ;;  %8260 = vmatpush1.bf16.msra.mxu1 %v11162_v11  ;;  %v11251_v10 = vld [vmem:[%s16057_s1 + $0x10a4] ss:$16 sps:$4 sm:$0xff]   ;;  %v11254_v11 = vld [vmem:[%s16057_s1 + $0x10ac] ss:$16 sps:$4 sm:$0xff]  }
 0x1dc   :  { %7523 = vmatprep.subr.bf16.mxu0 %v11167_v12  ;;  %8261 = vmatprep.subr.bf16.mxu1 %v11170_v52  ;;  %v11249_v12 = vld [vmem:[%s16057_s1 + $0x10a0] ss:$16 sps:$4 sm:$0xff]   ;;  %v11252_v52 = vld [vmem:[%s16057_s1 + $0x10a8] ss:$16 sps:$4 sm:$0xff]  }
 0x1df   :  { %7524 = vmatpush1.bf16.msra.mxu0 %v11165_v15  ;;  %8262 = vmatpush1.bf16.msra.mxu1 %v11168_v16  ;;  %v11257_v15 = vld [vmem:[%s16057_s1 + $0x10c4] ss:$16 sps:$4 sm:$0xff]   ;;  %v11260_v16 = vld [vmem:[%s16057_s1 + $0x10cc] ss:$16 sps:$4 sm:$0xff]  }
 0x1e0   :  { %7525 = vmatprep.subr.bf16.mxu0 %v11173_v17  ;;  %8263 = vmatprep.subr.bf16.mxu1 %v11176_v18  ;;  %v11255_v17 = vld [vmem:[%s16057_s1 + $0x10c0] ss:$16 sps:$4 sm:$0xff]   ;;  %v11258_v18 = vld [vmem:[%s16057_s1 + $0x10c8] ss:$16 sps:$4 sm:$0xff]  }
 0x1e3   :  { %7526 = vmatpush1.bf16.msra.mxu0 %v11171_v19  ;;  %8264 = vmatpush1.bf16.msra.mxu1 %v11174_v20  ;;  %v11263_v19 = vld [vmem:[%s16057_s1 + $0x10e4] ss:$16 sps:$4 sm:$0xff]   ;;  %v11266_v20 = vld [vmem:[%s16057_s1 + $0x10ec] ss:$16 sps:$4 sm:$0xff]  }
 0x1e4   :  { %7527 = vmatprep.subr.bf16.mxu0 %v11179_v22  ;;  %8265 = vmatprep.subr.bf16.mxu1 %v11182_v23  ;;  %v11261_v22 = vld [vmem:[%s16057_s1 + $0x10e0] ss:$16 sps:$4 sm:$0xff]   ;;  %v11264_v23 = vld [vmem:[%s16057_s1 + $0x10e8] ss:$16 sps:$4 sm:$0xff]  }
 0x1e7   :  { %7528 = vmatpush1.bf16.msra.mxu0 %v11177_v24  ;;  %8266 = vmatpush1.bf16.msra.mxu1 %v11180_v13  ;;  %v11269_v24 = vld [vmem:[%s16057_s1 + $0x1104] ss:$16 sps:$4 sm:$0xff]   ;;  %v11272_v13 = vld [vmem:[%s16057_s1 + $0x110c] ss:$16 sps:$4 sm:$0xff]  }
 0x1e8   :  { %7529 = vmatprep.subr.bf16.mxu0 %v11185_v27  ;;  %8267 = vmatprep.subr.bf16.mxu1 %v11188_v28  ;;  %v11267_v27 = vld [vmem:[%s16057_s1 + $0x1100] ss:$16 sps:$4 sm:$0xff]   ;;  %v11270_v28 = vld [vmem:[%s16057_s1 + $0x1108] ss:$16 sps:$4 sm:$0xff]  }
 0x1eb   :  { %7530 = vmatpush1.bf16.msra.mxu0 %v11183_v29  ;;  %8268 = vmatpush1.bf16.msra.mxu1 %v11186_v14  ;;  %v11275_v29 = vld [vmem:[%s16057_s1 + $0x1124] ss:$16 sps:$4 sm:$0xff]   ;;  %v11278_v14 = vld [vmem:[%s16057_s1 + $0x112c] ss:$16 sps:$4 sm:$0xff]  }
 0x1ec   :  { %7531 = vmatprep.subr.bf16.mxu0 %v11191_v30  ;;  %8269 = vmatprep.subr.bf16.mxu1 %v11194_v31  ;;  %v11273_v30 = vld [vmem:[%s16057_s1 + $0x1120] ss:$16 sps:$4 sm:$0xff]   ;;  %v11276_v31 = vld [vmem:[%s16057_s1 + $0x1128] ss:$16 sps:$4 sm:$0xff]  }
 0x1ef   :  { %7532 = vmatpush1.bf16.msra.mxu0 %v11189_v25  ;;  %8270 = vmatpush1.bf16.msra.mxu1 %v11192_v32  ;;  %v11281_v25 = vld [vmem:[%s16057_s1 + $0x1144] ss:$16 sps:$4 sm:$0xff]   ;;  %v11284_v32 = vld [vmem:[%s16057_s1 + $0x114c] ss:$16 sps:$4 sm:$0xff]  }
 0x1f0   :  { %7533 = vmatprep.subr.bf16.mxu0 %v11197_v33  ;;  %8271 = vmatprep.subr.bf16.mxu1 %v11200_v26  ;;  %v11279_v33 = vld [vmem:[%s16057_s1 + $0x1140] ss:$16 sps:$4 sm:$0xff]   ;;  %v11282_v26 = vld [vmem:[%s16057_s1 + $0x1148] ss:$16 sps:$4 sm:$0xff]  }
 0x1f3   :  { %7534 = vmatpush1.bf16.msra.mxu0 %v11195_v36  ;;  %8272 = vmatpush1.bf16.msra.mxu1 %v11198_v37  ;;  %v11287_v36 = vld [vmem:[%s16057_s1 + $0x1164] ss:$16 sps:$4 sm:$0xff]   ;;  %v11290_v37 = vld [vmem:[%s16057_s1 + $0x116c] ss:$16 sps:$4 sm:$0xff]  }
 0x1f4   :  { %7535 = vmatprep.subr.bf16.mxu0 %v11203_v21  ;;  %8273 = vmatprep.subr.bf16.mxu1 %v11206_v39  ;;  %v11285_v21 = vld [vmem:[%s16057_s1 + $0x1160] ss:$16 sps:$4 sm:$0xff]   ;;  %v11288_v39 = vld [vmem:[%s16057_s1 + $0x1168] ss:$16 sps:$4 sm:$0xff]  }
 0x1f7   :  { %7536 = vmatpush1.bf16.msra.mxu0 %v11201_v40  ;;  %8274 = vmatpush1.bf16.msra.mxu1 %v11204_v41  ;;  %v11293_v40 = vld [vmem:[%s16057_s1 + $0x1184] ss:$16 sps:$4 sm:$0xff]   ;;  %v11296_v41 = vld [vmem:[%s16057_s1 + $0x118c] ss:$16 sps:$4 sm:$0xff]  }
 0x1f8   :  { %7537 = vmatprep.subr.bf16.mxu0 %v11209_v34  ;;  %8275 = vmatprep.subr.bf16.mxu1 %v11212_v43  ;;  %v11291_v34 = vld [vmem:[%s16057_s1 + $0x1180] ss:$16 sps:$4 sm:$0xff]   ;;  %v11294_v43 = vld [vmem:[%s16057_s1 + $0x1188] ss:$16 sps:$4 sm:$0xff]  }
 0x1fb   :  { %7538 = vmatpush1.bf16.msra.mxu0 %v11207_v45  ;;  %8276 = vmatpush1.bf16.msra.mxu1 %v11210_v46  ;;  %v11299_v45 = vld [vmem:[%s16057_s1 + $0x11a4] ss:$16 sps:$4 sm:$0xff]   ;;  %v11302_v46 = vld [vmem:[%s16057_s1 + $0x11ac] ss:$16 sps:$4 sm:$0xff]  }
 0x1fc   :  { %7539 = vmatprep.subr.bf16.mxu0 %v11215_v35  ;;  %8277 = vmatprep.subr.bf16.mxu1 %v11218_v50  ;;  %v11297_v35 = vld [vmem:[%s16057_s1 + $0x11a0] ss:$16 sps:$4 sm:$0xff]   ;;  %v11300_v50 = vld [vmem:[%s16057_s1 + $0x11a8] ss:$16 sps:$4 sm:$0xff]  }
 0x1ff   :  { %7540 = vmatpush1.bf16.msra.mxu0 %v11213_v51  ;;  %8278 = vmatpush1.bf16.msra.mxu1 %v11216_v53  ;;  %v11305_v51 = vld [vmem:[%s16057_s1 + $0x11c4] ss:$16 sps:$4 sm:$0xff]   ;;  %v11308_v53 = vld [vmem:[%s16057_s1 + $0x11cc] ss:$16 sps:$4 sm:$0xff]  }
 0x200   :  { %7550 = vmatprep.subr.bf16.mxu0 %v11221_v38  ;;  %8288 = vmatprep.subr.bf16.mxu1 %v11224_v54  ;;  %v11303_v38 = vld [vmem:[%s16057_s1 + $0x11c0] ss:$16 sps:$4 sm:$0xff]   ;;  %v11306_v54 = vld [vmem:[%s16057_s1 + $0x11c8] ss:$16 sps:$4 sm:$0xff]  }
 0x202   :  { %7542 = vmatmul.mubr.bf16.vlgmr.msra.gmra.mrb[0].mxu0 %v1301_v56  ;;  %8280 = vmatmul.mubr.bf16.vlgmr.msra.gmra.mrb[0].mxu1 %v1301_v56  ;;  %v11314_v56 = vld [vmem:[%s16057_s1 + $0x11ec] ss:$16 sps:$4 sm:$0xff]  }
 0x203   :  { %7551 = vmatpush1.bf16.msra.mxu0 %v11219_v47  ;;  %8289 = vmatpush1.bf16.msra.mxu1 %v11222_v57  ;;  %v11309_v47 = vld [vmem:[%s16057_s1 + $0x11e0] ss:$16 sps:$4 sm:$0xff]   ;;  %v11312_v57 = vld [vmem:[%s16057_s1 + $0x11e8] ss:$16 sps:$4 sm:$0xff]  }
 0x204   :  { %7552 = vmatprep.subr.bf16.mxu0 %v11227_v58  ;;  %8290 = vmatprep.subr.bf16.mxu1 %v11230_v48  ;;  %v11317_v58 = vld [vmem:[%s16057_s1 + $0x1204] ss:$16 sps:$4 sm:$0xff]   ;;  %v11320_v48 = vld [vmem:[%s16057_s1 + $0x120c] ss:$16 sps:$4 sm:$0xff]  }
 0x205   :  { %7582 = vmatprep.mubr.bf16.mxu0 %v13926_v59  ;;  %8320 = vmatprep.mubr.bf16.mxu1 %v13926_v59 }
 0x207   :  { %7553 = vmatpush1.bf16.msra.mxu0 %v11225_v60  ;;  %8291 = vmatpush1.bf16.msra.mxu1 %v11228_v61  ;;  %v14112_v60 = vrot.slane %v13883_v44, %v12412_v49  ;;  %v11315_v61 = vld [vmem:[%s16057_s1 + $0x1200] ss:$16 sps:$4 sm:$0xff]   ;;  %v11326_v44 = vld [vmem:[%s16057_s1 + $0x122c] ss:$16 sps:$4 sm:$0xff]  }
 0x208   :  { %7554 = vmatprep.subr.bf16.mxu0 %v11233_v62  ;;  %8292 = vmatprep.subr.bf16.mxu1 %v11236_v63  ;;  %v11318_v62 = vld [vmem:[%s16057_s1 + $0x1208] ss:$16 sps:$4 sm:$0xff]   ;;  %v11323_v63 = vld [vmem:[%s16057_s1 + $0x1224] ss:$16 sps:$4 sm:$0xff]  }
 0x20b   :  { %7555 = vmatpush1.bf16.msra.mxu0 %v11231_v0  ;;  %8293 = vmatpush1.bf16.msra.mxu1 %v11234_v1  ;;  %v1351_v0 = vcombine.high %v13926_v59, %v13926_v59  ;;  %v11321_v1 = vld [vmem:[%s16057_s1 + $0x1220] ss:$16 sps:$4 sm:$0xff]   ;;  %v11329_v59 = vld [vmem:[%s16057_s1 + $0x1244] ss:$16 sps:$4 sm:$0xff]  }
 0x20c   :  { %7556 = vmatprep.subr.bf16.mxu0 %v11239_v2  ;;  %8294 = vmatprep.subr.bf16.mxu1 %v11242_v3  ;;  %v11324_v2 = vld [vmem:[%s16057_s1 + $0x1228] ss:$16 sps:$4 sm:$0xff]   ;;  %v11332_v3 = vld [vmem:[%s16057_s1 + $0x124c] ss:$16 sps:$4 sm:$0xff]  }
 0x20f   :  { %7557 = vmatpush1.bf16.msra.mxu0 %v11237_v4  ;;  %8295 = vmatpush1.bf16.msra.mxu1 %v11240_v5  ;;  %v11327_v4 = vld [vmem:[%s16057_s1 + $0x1240] ss:$16 sps:$4 sm:$0xff]   ;;  %v11330_v5 = vld [vmem:[%s16057_s1 + $0x1248] ss:$16 sps:$4 sm:$0xff]  }
 0x210   :  { %7558 = vmatprep.subr.bf16.mxu0 %v11245_v6  ;;  %8296 = vmatprep.subr.bf16.mxu1 %v11248_v7  ;;  %v11335_v6 = vld [vmem:[%s16057_s1 + $0x1264] ss:$16 sps:$4 sm:$0xff]   ;;  %v11338_v7 = vld [vmem:[%s16057_s1 + $0x126c] ss:$16 sps:$4 sm:$0xff]  }
 0x213   :  { %7559 = vmatpush1.bf16.msra.mxu0 %v11243_v8  ;;  %8297 = vmatpush1.bf16.msra.mxu1 %v11246_v9  ;;  %v11333_v8 = vld [vmem:[%s16057_s1 + $0x1260] ss:$16 sps:$4 sm:$0xff]   ;;  %v11336_v9 = vld [vmem:[%s16057_s1 + $0x1268] ss:$16 sps:$4 sm:$0xff]  }
 0x214   :  { %7560 = vmatprep.subr.bf16.mxu0 %v11251_v10  ;;  %8298 = vmatprep.subr.bf16.mxu1 %v11254_v11  ;;  %v11341_v10 = vld [vmem:[%s16057_s1 + $0x1284] ss:$16 sps:$4 sm:$0xff]   ;;  %v11344_v11 = vld [vmem:[%s16057_s1 + $0x128c] ss:$16 sps:$4 sm:$0xff]  }
 0x217   :  { %7561 = vmatpush1.bf16.msra.mxu0 %v11249_v12  ;;  %8299 = vmatpush1.bf16.msra.mxu1 %v11252_v52  ;;  %v11339_v12 = vld [vmem:[%s16057_s1 + $0x1280] ss:$16 sps:$4 sm:$0xff]   ;;  %v11342_v52 = vld [vmem:[%s16057_s1 + $0x1288] ss:$16 sps:$4 sm:$0xff]  }
 0x218   :  { %7562 = vmatprep.subr.bf16.mxu0 %v11257_v15  ;;  %8300 = vmatprep.subr.bf16.mxu1 %v11260_v16  ;;  %v11347_v15 = vld [vmem:[%s16057_s1 + $0x12a4] ss:$16 sps:$4 sm:$0xff]   ;;  %v11350_v16 = vld [vmem:[%s16057_s1 + $0x12ac] ss:$16 sps:$4 sm:$0xff]  }
 0x21b   :  { %7563 = vmatpush1.bf16.msra.mxu0 %v11255_v17  ;;  %8301 = vmatpush1.bf16.msra.mxu1 %v11258_v18  ;;  %v11345_v17 = vld [vmem:[%s16057_s1 + $0x12a0] ss:$16 sps:$4 sm:$0xff]   ;;  %v11348_v18 = vld [vmem:[%s16057_s1 + $0x12a8] ss:$16 sps:$4 sm:$0xff]  }
 0x21c   :  { %7564 = vmatprep.subr.bf16.mxu0 %v11263_v19  ;;  %8302 = vmatprep.subr.bf16.mxu1 %v11266_v20  ;;  %v11353_v19 = vld [vmem:[%s16057_s1 + $0x12c4] ss:$16 sps:$4 sm:$0xff]   ;;  %v11356_v20 = vld [vmem:[%s16057_s1 + $0x12cc] ss:$16 sps:$4 sm:$0xff]  }
 0x21f   :  { %7565 = vmatpush1.bf16.msra.mxu0 %v11261_v22  ;;  %8303 = vmatpush1.bf16.msra.mxu1 %v11264_v23  ;;  %v11351_v22 = vld [vmem:[%s16057_s1 + $0x12c0] ss:$16 sps:$4 sm:$0xff]   ;;  %v11354_v23 = vld [vmem:[%s16057_s1 + $0x12c8] ss:$16 sps:$4 sm:$0xff]  }
 0x220   :  { %7566 = vmatprep.subr.bf16.mxu0 %v11269_v24  ;;  %8304 = vmatprep.subr.bf16.mxu1 %v11272_v13  ;;  %v11359_v24 = vld [vmem:[%s16057_s1 + $0x12e4] ss:$16 sps:$4 sm:$0xff]   ;;  %v11362_v13 = vld [vmem:[%s16057_s1 + $0x12ec] ss:$16 sps:$4 sm:$0xff]  }
 0x223   :  { %7567 = vmatpush1.bf16.msra.mxu0 %v11267_v27  ;;  %8305 = vmatpush1.bf16.msra.mxu1 %v11270_v28  ;;  %v11357_v27 = vld [vmem:[%s16057_s1 + $0x12e0] ss:$16 sps:$4 sm:$0xff]   ;;  %v11360_v28 = vld [vmem:[%s16057_s1 + $0x12e8] ss:$16 sps:$4 sm:$0xff]  }
 0x224   :  { %7568 = vmatprep.subr.bf16.mxu0 %v11275_v29  ;;  %8306 = vmatprep.subr.bf16.mxu1 %v11278_v14  ;;  %v11365_v29 = vld [vmem:[%s16057_s1 + $0x1304] ss:$16 sps:$4 sm:$0xff]   ;;  %v11368_v14 = vld [vmem:[%s16057_s1 + $0x130c] ss:$16 sps:$4 sm:$0xff]  }
 0x227   :  { %7569 = vmatpush1.bf16.msra.mxu0 %v11273_v30  ;;  %8307 = vmatpush1.bf16.msra.mxu1 %v11276_v31  ;;  %v11363_v30 = vld [vmem:[%s16057_s1 + $0x1300] ss:$16 sps:$4 sm:$0xff]   ;;  %v11366_v31 = vld [vmem:[%s16057_s1 + $0x1308] ss:$16 sps:$4 sm:$0xff]  }
 0x228   :  { %7570 = vmatprep.subr.bf16.mxu0 %v11281_v25  ;;  %8308 = vmatprep.subr.bf16.mxu1 %v11284_v32  ;;  %v11371_v25 = vld [vmem:[%s16057_s1 + $0x1324] ss:$16 sps:$4 sm:$0xff]   ;;  %v11374_v32 = vld [vmem:[%s16057_s1 + $0x132c] ss:$16 sps:$4 sm:$0xff]  }
 0x22b   :  { %7571 = vmatpush1.bf16.msra.mxu0 %v11279_v33  ;;  %8309 = vmatpush1.bf16.msra.mxu1 %v11282_v26  ;;  %v11369_v33 = vld [vmem:[%s16057_s1 + $0x1320] ss:$16 sps:$4 sm:$0xff]   ;;  %v11372_v26 = vld [vmem:[%s16057_s1 + $0x1328] ss:$16 sps:$4 sm:$0xff]  }
 0x22c   :  { %7572 = vmatprep.subr.bf16.mxu0 %v11287_v36  ;;  %8310 = vmatprep.subr.bf16.mxu1 %v11290_v37  ;;  %v11377_v36 = vld [vmem:[%s16057_s1 + $0x1344] ss:$16 sps:$4 sm:$0xff]   ;;  %v11380_v37 = vld [vmem:[%s16057_s1 + $0x134c] ss:$16 sps:$4 sm:$0xff]  }
 0x22f   :  { %7573 = vmatpush1.bf16.msra.mxu0 %v11285_v21  ;;  %8311 = vmatpush1.bf16.msra.mxu1 %v11288_v39  ;;  %v11375_v21 = vld [vmem:[%s16057_s1 + $0x1340] ss:$16 sps:$4 sm:$0xff]   ;;  %v11378_v39 = vld [vmem:[%s16057_s1 + $0x1348] ss:$16 sps:$4 sm:$0xff]  }
 0x230   :  { %7574 = vmatprep.subr.bf16.mxu0 %v11293_v40  ;;  %8312 = vmatprep.subr.bf16.mxu1 %v11296_v41  ;;  %v11383_v40 = vld [vmem:[%s16057_s1 + $0x1364] ss:$16 sps:$4 sm:$0xff]   ;;  %v11386_v41 = vld [vmem:[%s16057_s1 + $0x136c] ss:$16 sps:$4 sm:$0xff]  }
 0x233   :  { %7575 = vmatpush1.bf16.msra.mxu0 %v11291_v34  ;;  %8313 = vmatpush1.bf16.msra.mxu1 %v11294_v43  ;;  %v11381_v34 = vld [vmem:[%s16057_s1 + $0x1360] ss:$16 sps:$4 sm:$0xff]   ;;  %v11384_v43 = vld [vmem:[%s16057_s1 + $0x1368] ss:$16 sps:$4 sm:$0xff]  }
 0x234   :  { %7576 = vmatprep.subr.bf16.mxu0 %v11299_v45  ;;  %8314 = vmatprep.subr.bf16.mxu1 %v11302_v46  ;;  %v11389_v45 = vld [vmem:[%s16057_s1 + $0x1384] ss:$16 sps:$4 sm:$0xff]   ;;  %v11392_v46 = vld [vmem:[%s16057_s1 + $0x138c] ss:$16 sps:$4 sm:$0xff]  }
 0x237   :  { %7577 = vmatpush1.bf16.msra.mxu0 %v11297_v35  ;;  %8315 = vmatpush1.bf16.msra.mxu1 %v11300_v50  ;;  %v11387_v35 = vld [vmem:[%s16057_s1 + $0x1380] ss:$16 sps:$4 sm:$0xff]   ;;  %v11390_v50 = vld [vmem:[%s16057_s1 + $0x1388] ss:$16 sps:$4 sm:$0xff]  }
 0x238   :  { %7578 = vmatprep.subr.bf16.mxu0 %v11305_v51  ;;  %8316 = vmatprep.subr.bf16.mxu1 %v11308_v53  ;;  %v11395_v51 = vld [vmem:[%s16057_s1 + $0x13a4] ss:$16 sps:$4 sm:$0xff]   ;;  %v11398_v53 = vld [vmem:[%s16057_s1 + $0x13ac] ss:$16 sps:$4 sm:$0xff]  }
 0x23b   :  { %7579 = vmatpush1.bf16.msra.mxu0 %v11303_v38  ;;  %8317 = vmatpush1.bf16.msra.mxu1 %v11306_v54  ;;  %v11393_v38 = vld [vmem:[%s16057_s1 + $0x13a0] ss:$16 sps:$4 sm:$0xff]   ;;  %v11396_v54 = vld [vmem:[%s16057_s1 + $0x13a8] ss:$16 sps:$4 sm:$0xff]  }
 0x23c   :  { %7580 = vmatprep.subr.bf16.mxu0 %v11311_v55  ;;  %8318 = vmatprep.subr.bf16.mxu1 %v11314_v56  ;;  %v11401_v55 = vld [vmem:[%s16057_s1 + $0x13c4] ss:$16 sps:$4 sm:$0xff]   ;;  %v11404_v56 = vld [vmem:[%s16057_s1 + $0x13cc] ss:$16 sps:$4 sm:$0xff]  }
 0x23f   :  { %7581 = vmatpush1.bf16.msra.mxu0 %v11309_v47  ;;  %8319 = vmatpush1.bf16.msra.mxu1 %v11312_v57  ;;  %v12218_v47 = vld [vmem:[%s16056_s0 + $0x10] sm:$0xff] }
 0x240   :  { %7591 = vmatprep.subr.bf16.mxu0 %v11317_v58  ;;  %8329 = vmatprep.subr.bf16.mxu1 %v11320_v48  ;;  %v1304_v57 = vcombine.high %v12218_v47, %v12218_v47  ;;  %v11399_v58 = vld [vmem:[%s16057_s1 + $0x13c0] ss:$16 sps:$4 sm:$0xff]   ;;  %v11402_v48 = vld [vmem:[%s16057_s1 + $0x13c8] ss:$16 sps:$4 sm:$0xff]  }
 0x242   :  { %7583 = vmatmul.mubr.bf16.vlgmr.msra.gmra.mrb[0].mxu0 %v14112_v60  ;;  %8321 = vmatmul.mubr.bf16.vlgmr.msra.gmra.mrb[0].mxu1 %v14112_v60 }
 0x243   :  { %7592 = vmatpush1.bf16.msra.mxu0 %v11315_v61  ;;  %8330 = vmatpush1.bf16.msra.mxu1 %v11318_v62  ;;  %v11407_v61 = vld [vmem:[%s16057_s1 + $0x13e4] ss:$16 sps:$4 sm:$0xff]   ;;  %v11410_v62 = vld [vmem:[%s16057_s1 + $0x13ec] ss:$16 sps:$4 sm:$0xff]  }
 0x244   :  { %7593 = vmatprep.subr.bf16.mxu0 %v11323_v63  ;;  %8331 = vmatprep.subr.bf16.mxu1 %v11326_v44  ;;  %v14302_v63 = vrot.slane %v1304_v57, %v12412_v49  ;;  %v11405_v44 = vld [vmem:[%s16057_s1 + $0x13e0] ss:$16 sps:$4 sm:$0xff]  }
 0x245   :  { %7623 = vmatprep.mubr.bf16.mxu0 %v1351_v0  ;;  %8361 = vmatprep.mubr.bf16.mxu1 %v1351_v0  ;;  %v11408_v0 = vld [vmem:[%s16057_s1 + $0x13e8] ss:$16 sps:$4 sm:$0xff]  }
 0x247   :  { %7594 = vmatpush1.bf16.msra.mxu0 %v11321_v1  ;;  %8332 = vmatpush1.bf16.msra.mxu1 %v11324_v2  ;;  %v11413_v1 = vld [vmem:[%s16057_s1 + $0x1404] ss:$16 sps:$4 sm:$0xff]   ;;  %v11416_v2 = vld [vmem:[%s16057_s1 + $0x140c] ss:$16 sps:$4 sm:$0xff]  }
 0x248   :  { %7595 = vmatprep.subr.bf16.mxu0 %v11329_v59  ;;  %8333 = vmatprep.subr.bf16.mxu1 %v11332_v3  ;;  %v1320_v59 = vcombine.high %v14302_v63, %v14302_v63  ;;  %v1349_v3 = vcombine.high %v14112_v60, %v14112_v60  ;;  %v11422_v60 = vld [vmem:[%s16057_s1 + $0x142c] ss:$16 sps:$4 sm:$0xff]  }
 0x24b   :  { %7596 = vmatpush1.bf16.msra.mxu0 %v11327_v4  ;;  %8334 = vmatpush1.bf16.msra.mxu1 %v11330_v5  ;;  %v11411_v4 = vld [vmem:[%s16057_s1 + $0x1400] ss:$16 sps:$4 sm:$0xff]   ;;  %v11414_v5 = vld [vmem:[%s16057_s1 + $0x1408] ss:$16 sps:$4 sm:$0xff]  }
 0x24c   :  { %7597 = vmatprep.subr.bf16.mxu0 %v11335_v6  ;;  %8335 = vmatprep.subr.bf16.mxu1 %v11338_v7  ;;  %v11419_v6 = vld [vmem:[%s16057_s1 + $0x1424] ss:$16 sps:$4 sm:$0xff]   ;;  %v14333_v7 = vrot.slane %v1320_v59, %v12412_v49 }
 0x24f   :  { %7598 = vmatpush1.bf16.msra.mxu0 %v11333_v8  ;;  %8336 = vmatpush1.bf16.msra.mxu1 %v11336_v9  ;;  %v11417_v8 = vld [vmem:[%s16057_s1 + $0x1420] ss:$16 sps:$4 sm:$0xff]   ;;  %v11420_v9 = vld [vmem:[%s16057_s1 + $0x1428] ss:$16 sps:$4 sm:$0xff]  }
 0x250   :  { %7599 = vmatprep.subr.bf16.mxu0 %v11341_v10  ;;  %8337 = vmatprep.subr.bf16.mxu1 %v11344_v11  ;;  %v11425_v10 = vld [vmem:[%s16057_s1 + $0x1444] ss:$16 sps:$4 sm:$0xff]   ;;  %v11428_v11 = vld [vmem:[%s16057_s1 + $0x144c] ss:$16 sps:$4 sm:$0xff]  }
 0x253   :  { %7600 = vmatpush1.bf16.msra.mxu0 %v11339_v12  ;;  %8338 = vmatpush1.bf16.msra.mxu1 %v11342_v52  ;;  %v11423_v12 = vld [vmem:[%s16057_s1 + $0x1440] ss:$16 sps:$4 sm:$0xff]   ;;  %v11426_v52 = vld [vmem:[%s16057_s1 + $0x1448] ss:$16 sps:$4 sm:$0xff]  }
 0x254   :  { %7601 = vmatprep.subr.bf16.mxu0 %v11347_v15  ;;  %8339 = vmatprep.subr.bf16.mxu1 %v11350_v16  ;;  %v11431_v15 = vld [vmem:[%s16057_s1 + $0x1464] ss:$16 sps:$4 sm:$0xff]   ;;  %v11434_v16 = vld [vmem:[%s16057_s1 + $0x146c] ss:$16 sps:$4 sm:$0xff]  }
 0x257   :  { %7602 = vmatpush1.bf16.msra.mxu0 %v11345_v17  ;;  %8340 = vmatpush1.bf16.msra.mxu1 %v11348_v18  ;;  %v11429_v17 = vld [vmem:[%s16057_s1 + $0x1460] ss:$16 sps:$4 sm:$0xff]   ;;  %v11432_v18 = vld [vmem:[%s16057_s1 + $0x1468] ss:$16 sps:$4 sm:$0xff]  }
 0x258   :  { %7603 = vmatprep.subr.bf16.mxu0 %v11353_v19  ;;  %8341 = vmatprep.subr.bf16.mxu1 %v11356_v20  ;;  %v11437_v19 = vld [vmem:[%s16057_s1 + $0x1484] ss:$16 sps:$4 sm:$0xff]   ;;  %v11440_v20 = vld [vmem:[%s16057_s1 + $0x148c] ss:$16 sps:$4 sm:$0xff]  }
 0x25b   :  { %7604 = vmatpush1.bf16.msra.mxu0 %v11351_v22  ;;  %8342 = vmatpush1.bf16.msra.mxu1 %v11354_v23  ;;  %v11435_v22 = vld [vmem:[%s16057_s1 + $0x1480] ss:$16 sps:$4 sm:$0xff]   ;;  %v11438_v23 = vld [vmem:[%s16057_s1 + $0x1488] ss:$16 sps:$4 sm:$0xff]  }
 0x25c   :  { %7605 = vmatprep.subr.bf16.mxu0 %v11359_v24  ;;  %8343 = vmatprep.subr.bf16.mxu1 %v11362_v13  ;;  %v11443_v24 = vld [vmem:[%s16057_s1 + $0x14a4] ss:$16 sps:$4 sm:$0xff]   ;;  %v11446_v13 = vld [vmem:[%s16057_s1 + $0x14ac] ss:$16 sps:$4 sm:$0xff]  }
 0x25f   :  { %7606 = vmatpush1.bf16.msra.mxu0 %v11357_v27  ;;  %8344 = vmatpush1.bf16.msra.mxu1 %v11360_v28  ;;  %v11441_v27 = vld [vmem:[%s16057_s1 + $0x14a0] ss:$16 sps:$4 sm:$0xff]   ;;  %v11444_v28 = vld [vmem:[%s16057_s1 + $0x14a8] ss:$16 sps:$4 sm:$0xff]  }
 0x260   :  { %7607 = vmatprep.subr.bf16.mxu0 %v11365_v29  ;;  %8345 = vmatprep.subr.bf16.mxu1 %v11368_v14  ;;  %v11449_v29 = vld [vmem:[%s16057_s1 + $0x14c4] ss:$16 sps:$4 sm:$0xff]   ;;  %v11452_v14 = vld [vmem:[%s16057_s1 + $0x14cc] ss:$16 sps:$4 sm:$0xff]  }
 0x263   :  { %7608 = vmatpush1.bf16.msra.mxu0 %v11363_v30  ;;  %8346 = vmatpush1.bf16.msra.mxu1 %v11366_v31  ;;  %v11447_v30 = vld [vmem:[%s16057_s1 + $0x14c0] ss:$16 sps:$4 sm:$0xff]   ;;  %v11450_v31 = vld [vmem:[%s16057_s1 + $0x14c8] ss:$16 sps:$4 sm:$0xff]  }
 0x264   :  { %7609 = vmatprep.subr.bf16.mxu0 %v11371_v25  ;;  %8347 = vmatprep.subr.bf16.mxu1 %v11374_v32  ;;  %v11455_v25 = vld [vmem:[%s16057_s1 + $0x14e4] ss:$16 sps:$4 sm:$0xff]   ;;  %v11458_v32 = vld [vmem:[%s16057_s1 + $0x14ec] ss:$16 sps:$4 sm:$0xff]  }
 0x267   :  { %7610 = vmatpush1.bf16.msra.mxu0 %v11369_v33  ;;  %8348 = vmatpush1.bf16.msra.mxu1 %v11372_v26  ;;  %v11453_v33 = vld [vmem:[%s16057_s1 + $0x14e0] ss:$16 sps:$4 sm:$0xff]   ;;  %v11456_v26 = vld [vmem:[%s16057_s1 + $0x14e8] ss:$16 sps:$4 sm:$0xff]  }
 0x268   :  { %7611 = vmatprep.subr.bf16.mxu0 %v11377_v36  ;;  %8349 = vmatprep.subr.bf16.mxu1 %v11380_v37  ;;  %v11461_v36 = vld [vmem:[%s16057_s1 + $0x1504] ss:$16 sps:$4 sm:$0xff]   ;;  %v11464_v37 = vld [vmem:[%s16057_s1 + $0x150c] ss:$16 sps:$4 sm:$0xff]  }
 0x26b   :  { %7612 = vmatpush1.bf16.msra.mxu0 %v11375_v21  ;;  %8350 = vmatpush1.bf16.msra.mxu1 %v11378_v39  ;;  %v11459_v21 = vld [vmem:[%s16057_s1 + $0x1500] ss:$16 sps:$4 sm:$0xff]   ;;  %v11462_v39 = vld [vmem:[%s16057_s1 + $0x1508] ss:$16 sps:$4 sm:$0xff]  }
 0x26c   :  { %7613 = vmatprep.subr.bf16.mxu0 %v11383_v40  ;;  %8351 = vmatprep.subr.bf16.mxu1 %v11386_v41  ;;  %v11467_v40 = vld [vmem:[%s16057_s1 + $0x1524] ss:$16 sps:$4 sm:$0xff]   ;;  %v11470_v41 = vld [vmem:[%s16057_s1 + $0x152c] ss:$16 sps:$4 sm:$0xff]  }
 0x26f   :  { %7614 = vmatpush1.bf16.msra.mxu0 %v11381_v34  ;;  %8352 = vmatpush1.bf16.msra.mxu1 %v11384_v43 }
 0x270   :  { %7615 = vmatprep.subr.bf16.mxu0 %v11389_v45  ;;  %8353 = vmatprep.subr.bf16.mxu1 %v11392_v46 }
 0x273   :  { %7616 = vmatpush1.bf16.msra.mxu0 %v11387_v35  ;;  %8354 = vmatpush1.bf16.msra.mxu1 %v11390_v50 }
 0x274   :  { %7617 = vmatprep.subr.bf16.mxu0 %v11395_v51  ;;  %8355 = vmatprep.subr.bf16.mxu1 %v11398_v53 }
 0x277   :  { %7618 = vmatpush1.bf16.msra.mxu0 %v11393_v38  ;;  %8356 = vmatpush1.bf16.msra.mxu1 %v11396_v54 }
 0x278   :  { %7619 = vmatprep.subr.bf16.mxu0 %v11401_v55  ;;  %8357 = vmatprep.subr.bf16.mxu1 %v11404_v56 }
 0x27b   :  { %7620 = vmatpush1.bf16.msra.mxu0 %v11399_v58  ;;  %8358 = vmatpush1.bf16.msra.mxu1 %v11402_v48 }
 0x27c   :  { %7621 = vmatprep.subr.bf16.mxu0 %v11407_v61  ;;  %8359 = vmatprep.subr.bf16.mxu1 %v11410_v62 }
 0x27f   :  { %7622 = vmatpush1.bf16.msra.mxu0 %v11405_v44  ;;  %8360 = vmatpush1.bf16.msra.mxu1 %v11408_v0 }
 0x280   :  { %7632 = vmatprep.subr.bf16.mxu0 %v11413_v1  ;;  %8370 = vmatprep.subr.bf16.mxu1 %v11416_v2 }
 0x282   :  { %7624 = vmatmul.mubr.bf16.vlgmr.msra.gmra.mrb[0].mxu0 %v1349_v3  ;;  %8362 = vmatmul.mubr.bf16.vlgmr.msra.gmra.mrb[0].mxu1 %v1349_v3 }
 0x283   :  { %7633 = vmatpush1.bf16.msra.mxu0 %v11411_v4  ;;  %8371 = vmatpush1.bf16.msra.mxu1 %v11414_v5 }
 0x284   :  { %7634 = vmatprep.subr.bf16.mxu0 %v11419_v6  ;;  %8372 = vmatprep.subr.bf16.mxu1 %v11422_v60 }
 0x285   :  { %7664 = vmatprep.mubr.bf16.mxu0 %v14333_v7  ;;  %8402 = vmatprep.mubr.bf16.mxu1 %v14333_v7 }
 0x287   :  { %7635 = vmatpush1.bf16.msra.mxu0 %v11417_v8  ;;  %8373 = vmatpush1.bf16.msra.mxu1 %v11420_v9 }
 0x288   :  { %7636 = vmatprep.subr.bf16.mxu0 %v11425_v10  ;;  %8374 = vmatprep.subr.bf16.mxu1 %v11428_v11 }
 0x28b   :  { %7637 = vmatpush1.bf16.msra.mxu0 %v11423_v12  ;;  %8375 = vmatpush1.bf16.msra.mxu1 %v11426_v52 }
 0x28c   :  { %7638 = vmatprep.subr.bf16.mxu0 %v11431_v15  ;;  %8376 = vmatprep.subr.bf16.mxu1 %v11434_v16 }
 0x28f   :  { %7639 = vmatpush1.bf16.msra.mxu0 %v11429_v17  ;;  %8377 = vmatpush1.bf16.msra.mxu1 %v11432_v18 }
 0x290   :  { %7640 = vmatprep.subr.bf16.mxu0 %v11437_v19  ;;  %8378 = vmatprep.subr.bf16.mxu1 %v11440_v20 }
 0x293   :  { %7641 = vmatpush1.bf16.msra.mxu0 %v11435_v22  ;;  %8379 = vmatpush1.bf16.msra.mxu1 %v11438_v23 }
 0x294   :  { %7642 = vmatprep.subr.bf16.mxu0 %v11443_v24  ;;  %8380 = vmatprep.subr.bf16.mxu1 %v11446_v13 }
 0x297   :  { %7643 = vmatpush1.bf16.msra.mxu0 %v11441_v27  ;;  %8381 = vmatpush1.bf16.msra.mxu1 %v11444_v28 }
 0x298   :  { %7644 = vmatprep.subr.bf16.mxu0 %v11449_v29  ;;  %8382 = vmatprep.subr.bf16.mxu1 %v11452_v14 }
 0x29b   :  { %7645 = vmatpush1.bf16.msra.mxu0 %v11447_v30  ;;  %8383 = vmatpush1.bf16.msra.mxu1 %v11450_v31 }
 0x29c   :  { %7646 = vmatprep.subr.bf16.mxu0 %v11455_v25  ;;  %8384 = vmatprep.subr.bf16.mxu1 %v11458_v32 }
 0x29f   :  { %7647 = vmatpush1.bf16.msra.mxu0 %v11453_v33  ;;  %8385 = vmatpush1.bf16.msra.mxu1 %v11456_v26 }
 0x2a0   :  { %7648 = vmatprep.subr.bf16.mxu0 %v11461_v36  ;;  %8386 = vmatprep.subr.bf16.mxu1 %v11464_v37 }
 0x2a1   :  { %10 = vsyncpa [#allocation3], 0  ;;  %v11465_v34 = vld [vmem:[%s16057_s1 + $0x1520] ss:$16 sps:$4 sm:$0xff]   ;;  %v11468_v43 = vld [vmem:[%s16057_s1 + $0x1528] ss:$16 sps:$4 sm:$0xff]   ;;  %v14519_v8 = vrot.slane %v14302_v63, %v12412_v49  ;;  %v1352_v12 = vcombine.high %v14333_v7, %v14333_v7 }
 0x2a2   :  { %v11473_v45 = vld [vmem:[%s16057_s1 + $0x1544] ss:$16 sps:$4 sm:$0xff]   ;;  %v11476_v46 = vld [vmem:[%s16057_s1 + $0x154c] ss:$16 sps:$4 sm:$0xff]   ;;  %v11471_v35 = vld [vmem:[%s16057_s1 + $0x1540] ss:$16 sps:$4 sm:$0xff]  }
 0x2a3   :  { %7649 = vmatpush1.bf16.msra.mxu0 %v11459_v21  ;;  %8387 = vmatpush1.bf16.msra.mxu1 %v11462_v39  ;;  %v11474_v50 = vld [vmem:[%s16057_s1 + $0x1548] ss:$16 sps:$4 sm:$0xff]   ;;  %v11479_v51 = vld [vmem:[%s16057_s1 + $0x1564] ss:$16 sps:$4 sm:$0xff]   ;;  %v11482_v53 = vld [vmem:[%s16057_s1 + $0x156c] ss:$16 sps:$4 sm:$0xff]  }
 0x2a4   :  { %7650 = vmatprep.subr.bf16.mxu0 %v11467_v40  ;;  %8388 = vmatprep.subr.bf16.mxu1 %v11470_v41  ;;  %v11477_v38 = vld [vmem:[%s16057_s1 + $0x1560] ss:$16 sps:$4 sm:$0xff]   ;;  %v11480_v54 = vld [vmem:[%s16057_s1 + $0x1568] ss:$16 sps:$4 sm:$0xff]   ;;  %v11485_v55 = vld [vmem:[%s16057_s1 + $0x1584] ss:$16 sps:$4 sm:$0xff]  }
 0x2a5   :  { %v11488_v56 = vld [vmem:[%s16057_s1 + $0x158c] ss:$16 sps:$4 sm:$0xff]   ;;  %v11483_v47 = vld [vmem:[%s16057_s1 + $0x1580] ss:$16 sps:$4 sm:$0xff]   ;;  %v11486_v57 = vld [vmem:[%s16057_s1 + $0x1588] ss:$16 sps:$4 sm:$0xff]  }
 0x2a6   :  { %v11491_v58 = vld [vmem:[%s16057_s1 + $0x15a4] ss:$16 sps:$4 sm:$0xff]   ;;  %v11494_v48 = vld [vmem:[%s16057_s1 + $0x15ac] ss:$16 sps:$4 sm:$0xff]   ;;  %v11489_v61 = vld [vmem:[%s16057_s1 + $0x15a0] ss:$16 sps:$4 sm:$0xff]  }
 0x2a7   :  { %7651 = vmatpush1.bf16.msra.mxu0 %v11465_v34  ;;  %8389 = vmatpush1.bf16.msra.mxu1 %v11468_v43  ;;  %v11492_v62 = vld [vmem:[%s16057_s1 + $0x15a8] ss:$16 sps:$4 sm:$0xff]   ;;  %v11497_v44 = vld [vmem:[%s16057_s1 + $0x15c4] ss:$16 sps:$4 sm:$0xff]   ;;  %v11500_v0 = vld [vmem:[%s16057_s1 + $0x15cc] ss:$16 sps:$4 sm:$0xff]  }
 0x2a8   :  { %7652 = vmatprep.subr.bf16.mxu0 %v11473_v45  ;;  %8390 = vmatprep.subr.bf16.mxu1 %v11476_v46  ;;  %v11495_v1 = vld [vmem:[%s16057_s1 + $0x15c0] ss:$16 sps:$4 sm:$0xff]   ;;  %v11498_v2 = vld [vmem:[%s16057_s1 + $0x15c8] ss:$16 sps:$4 sm:$0xff]   ;;  %v11503_v59 = vld [vmem:[%s16057_s1 + $0x15e4] ss:$16 sps:$4 sm:$0xff]  }
 0x2a9   :  { %v11506_v3 = vld [vmem:[%s16057_s1 + $0x15ec] ss:$16 sps:$4 sm:$0xff]   ;;  %v11501_v4 = vld [vmem:[%s16057_s1 + $0x15e0] ss:$16 sps:$4 sm:$0xff]   ;;  %v11504_v5 = vld [vmem:[%s16057_s1 + $0x15e8] ss:$16 sps:$4 sm:$0xff]  }
 0x2aa   :  { %v11510_v6 = vld [vmem:[%s16057_s1 + $0x1604] ss:$16 sps:$4 sm:$0xff]   ;;  %v11513_v60 = vld [vmem:[%s16057_s1 + $0x160c] ss:$16 sps:$4 sm:$0xff]   ;;  %v11508_v9 = vld [vmem:[%s16057_s1 + $0x1600] ss:$16 sps:$4 sm:$0xff]  }
 0x2ab   :  { %7653 = vmatpush1.bf16.msra.mxu0 %v11471_v35  ;;  %8391 = vmatpush1.bf16.msra.mxu1 %v11474_v50  ;;  %v11511_v10 = vld [vmem:[%s16057_s1 + $0x1608] ss:$16 sps:$4 sm:$0xff]   ;;  %v11516_v11 = vld [vmem:[%s16057_s1 + $0x1624] ss:$16 sps:$4 sm:$0xff]   ;;  %v11519_v63 = vld [vmem:[%s16057_s1 + $0x162c] ss:$16 sps:$4 sm:$0xff]  }
 0x2ac   :  { %7654 = vmatprep.subr.bf16.mxu0 %v11479_v51  ;;  %8392 = vmatprep.subr.bf16.mxu1 %v11482_v53  ;;  %v11514_v52 = vld [vmem:[%s16057_s1 + $0x1620] ss:$16 sps:$4 sm:$0xff]   ;;  %v11517_v15 = vld [vmem:[%s16057_s1 + $0x1628] ss:$16 sps:$4 sm:$0xff]   ;;  %v11522_v7 = vld [vmem:[%s16057_s1 + $0x1644] ss:$16 sps:$4 sm:$0xff]  }
 0x2ad   :  { %v11525_v16 = vld [vmem:[%s16057_s1 + $0x164c] ss:$16 sps:$4 sm:$0xff]   ;;  %v11520_v17 = vld [vmem:[%s16057_s1 + $0x1640] ss:$16 sps:$4 sm:$0xff]   ;;  %v11523_v18 = vld [vmem:[%s16057_s1 + $0x1648] ss:$16 sps:$4 sm:$0xff]  }
 0x2ae   :  { %v11528_v19 = vld [vmem:[%s16057_s1 + $0x1664] ss:$16 sps:$4 sm:$0xff]   ;;  %v11531_v20 = vld [vmem:[%s16057_s1 + $0x166c] ss:$16 sps:$4 sm:$0xff]   ;;  %v11526_v22 = vld [vmem:[%s16057_s1 + $0x1660] ss:$16 sps:$4 sm:$0xff]  }
 0x2af   :  { %7655 = vmatpush1.bf16.msra.mxu0 %v11477_v38  ;;  %8393 = vmatpush1.bf16.msra.mxu1 %v11480_v54  ;;  %v11529_v23 = vld [vmem:[%s16057_s1 + $0x1668] ss:$16 sps:$4 sm:$0xff]   ;;  %v11534_v24 = vld [vmem:[%s16057_s1 + $0x1684] ss:$16 sps:$4 sm:$0xff]   ;;  %v11537_v13 = vld [vmem:[%s16057_s1 + $0x168c] ss:$16 sps:$4 sm:$0xff]  }
 0x2b0   :  { %7656 = vmatprep.subr.bf16.mxu0 %v11485_v55  ;;  %8394 = vmatprep.subr.bf16.mxu1 %v11488_v56  ;;  %v11532_v27 = vld [vmem:[%s16057_s1 + $0x1680] ss:$16 sps:$4 sm:$0xff]   ;;  %v11535_v28 = vld [vmem:[%s16057_s1 + $0x1688] ss:$16 sps:$4 sm:$0xff]   ;;  %v11540_v29 = vld [vmem:[%s16057_s1 + $0x16a4] ss:$16 sps:$4 sm:$0xff]  }
 0x2b1   :  { %v11543_v14 = vld [vmem:[%s16057_s1 + $0x16ac] ss:$16 sps:$4 sm:$0xff]   ;;  %v11538_v30 = vld [vmem:[%s16057_s1 + $0x16a0] ss:$16 sps:$4 sm:$0xff]   ;;  %v11541_v31 = vld [vmem:[%s16057_s1 + $0x16a8] ss:$16 sps:$4 sm:$0xff]  }
 0x2b2   :  { %v11546_v25 = vld [vmem:[%s16057_s1 + $0x16c4] ss:$16 sps:$4 sm:$0xff]   ;;  %v11549_v32 = vld [vmem:[%s16057_s1 + $0x16cc] ss:$16 sps:$4 sm:$0xff]   ;;  %v11544_v33 = vld [vmem:[%s16057_s1 + $0x16c0] ss:$16 sps:$4 sm:$0xff]  }
 0x2b3   :  { %7657 = vmatpush1.bf16.msra.mxu0 %v11483_v47  ;;  %8395 = vmatpush1.bf16.msra.mxu1 %v11486_v57  ;;  %v11547_v26 = vld [vmem:[%s16057_s1 + $0x16c8] ss:$16 sps:$4 sm:$0xff]   ;;  %v11552_v36 = vld [vmem:[%s16057_s1 + $0x16e4] ss:$16 sps:$4 sm:$0xff]   ;;  %v11555_v37 = vld [vmem:[%s16057_s1 + $0x16ec] ss:$16 sps:$4 sm:$0xff]  }
 0x2b4   :  { %7658 = vmatprep.subr.bf16.mxu0 %v11491_v58  ;;  %8396 = vmatprep.subr.bf16.mxu1 %v11494_v48  ;;  %v11550_v21 = vld [vmem:[%s16057_s1 + $0x16e0] ss:$16 sps:$4 sm:$0xff]   ;;  %v11553_v39 = vld [vmem:[%s16057_s1 + $0x16e8] ss:$16 sps:$4 sm:$0xff]   ;;  %v11558_v40 = vld [vmem:[%s16057_s1 + $0x1704] ss:$16 sps:$4 sm:$0xff]  }
 0x2b5   :  { %v11561_v41 = vld [vmem:[%s16057_s1 + $0x170c] ss:$16 sps:$4 sm:$0xff]   ;;  %v11556_v34 = vld [vmem:[%s16057_s1 + $0x1700] ss:$16 sps:$4 sm:$0xff]   ;;  %v11559_v43 = vld [vmem:[%s16057_s1 + $0x1708] ss:$16 sps:$4 sm:$0xff]  }
 0x2b6   :  { %v11564_v45 = vld [vmem:[%s16057_s1 + $0x1724] ss:$16 sps:$4 sm:$0xff]   ;;  %v11567_v46 = vld [vmem:[%s16057_s1 + $0x172c] ss:$16 sps:$4 sm:$0xff]   ;;  %v11562_v35 = vld [vmem:[%s16057_s1 + $0x1720] ss:$16 sps:$4 sm:$0xff]  }
 0x2b7   :  { %7659 = vmatpush1.bf16.msra.mxu0 %v11489_v61  ;;  %8397 = vmatpush1.bf16.msra.mxu1 %v11492_v62  ;;  %v11565_v50 = vld [vmem:[%s16057_s1 + $0x1728] ss:$16 sps:$4 sm:$0xff]   ;;  %v11570_v51 = vld [vmem:[%s16057_s1 + $0x1744] ss:$16 sps:$4 sm:$0xff]   ;;  %v11573_v53 = vld [vmem:[%s16057_s1 + $0x174c] ss:$16 sps:$4 sm:$0xff]  }
 0x2b8   :  { %7660 = vmatprep.subr.bf16.mxu0 %v11497_v44  ;;  %8398 = vmatprep.subr.bf16.mxu1 %v11500_v0  ;;  %v11568_v38 = vld [vmem:[%s16057_s1 + $0x1740] ss:$16 sps:$4 sm:$0xff]   ;;  %v11571_v54 = vld [vmem:[%s16057_s1 + $0x1748] ss:$16 sps:$4 sm:$0xff]   ;;  %v11576_v55 = vld [vmem:[%s16057_s1 + $0x1764] ss:$16 sps:$4 sm:$0xff]  }
 0x2b9   :  { %v11579_v56 = vld [vmem:[%s16057_s1 + $0x176c] ss:$16 sps:$4 sm:$0xff]   ;;  %v11574_v47 = vld [vmem:[%s16057_s1 + $0x1760] ss:$16 sps:$4 sm:$0xff]   ;;  %v11577_v57 = vld [vmem:[%s16057_s1 + $0x1768] ss:$16 sps:$4 sm:$0xff]  }
 0x2ba   :  { %v11582_v58 = vld [vmem:[%s16057_s1 + $0x1784] ss:$16 sps:$4 sm:$0xff]   ;;  %v11585_v48 = vld [vmem:[%s16057_s1 + $0x178c] ss:$16 sps:$4 sm:$0xff]   ;;  %v11580_v61 = vld [vmem:[%s16057_s1 + $0x1780] ss:$16 sps:$4 sm:$0xff]  }
 0x2bb   :  { %7661 = vmatpush1.bf16.msra.mxu0 %v11495_v1  ;;  %8399 = vmatpush1.bf16.msra.mxu1 %v11498_v2  ;;  %v11583_v62 = vld [vmem:[%s16057_s1 + $0x1788] ss:$16 sps:$4 sm:$0xff]   ;;  %v11588_v44 = vld [vmem:[%s16057_s1 + $0x17a4] ss:$16 sps:$4 sm:$0xff]   ;;  %v11591_v0 = vld [vmem:[%s16057_s1 + $0x17ac] ss:$16 sps:$4 sm:$0xff]  }
 0x2bc   :  { %7662 = vmatprep.subr.bf16.mxu0 %v11503_v59  ;;  %8400 = vmatprep.subr.bf16.mxu1 %v11506_v3  ;;  %v11586_v1 = vld [vmem:[%s16057_s1 + $0x17a0] ss:$16 sps:$4 sm:$0xff]   ;;  %v11589_v2 = vld [vmem:[%s16057_s1 + $0x17a8] ss:$16 sps:$4 sm:$0xff]   ;;  %v11594_v59 = vld [vmem:[%s16057_s1 + $0x17c4] ss:$16 sps:$4 sm:$0xff]  }
 0x2bd   :  { %v11597_v3 = vld [vmem:[%s16057_s1 + $0x17cc] ss:$16 sps:$4 sm:$0xff]   ;;  %vm9049_vm0 = vcmask 74752  }
 0x2bf   :  { %7663 = vmatpush1.bf16.msra.mxu0 %v11501_v4  ;;  %8401 = vmatpush1.bf16.msra.mxu1 %v11504_v5  ;;  %v14696_v4 = vld [vmem:[%s16056_s0 + $0x18] sm:$0xff]  ;;  %v11592_v5 = vld [vmem:[%s16057_s1 + $0x17c0] ss:$16 sps:$4 sm:$0xff]  }
 0x2c0   :  { %7673 = vmatprep.subr.bf16.mxu0 %v11510_v6  ;;  %8411 = vmatprep.subr.bf16.mxu1 %v11513_v60  ;;  %v11595_v6 = vld [vmem:[%s16057_s1 + $0x17c8] ss:$16 sps:$4 sm:$0xff]   ;;  %v11600_v60 = vld [vmem:[%s16057_s1 + $0x17e4] ss:$16 sps:$4 sm:$0xff]  }
 0x2c2   :  { %7665 = vmatmul.mubr.bf16.vlgmr.msra.gmra.mrb[0].mxu0 %v14519_v8  ;;  %8403 = vmatmul.mubr.bf16.vlgmr.msra.gmra.mrb[0].mxu1 %v14519_v8 }
 0x2c3   :  { %7674 = vmatpush1.bf16.msra.mxu0 %v11508_v9  ;;  %8412 = vmatpush1.bf16.msra.mxu1 %v11511_v10  ;;  %v11603_v9 = vld [vmem:[%s16057_s1 + $0x17ec] ss:$16 sps:$4 sm:$0xff]   ;;  %v14712_v10 = vrot.slane %v14696_v4, %v12412_v49 }
 0x2c4   :  { %7675 = vmatprep.subr.bf16.mxu0 %v11516_v11  ;;  %8413 = vmatprep.subr.bf16.mxu1 %v11519_v63  ;;  %v11598_v11 = vld [vmem:[%s16057_s1 + $0x17e0] ss:$16 sps:$4 sm:$0xff]   ;;  %v11601_v63 = vld [vmem:[%s16057_s1 + $0x17e8] ss:$16 sps:$4 sm:$0xff]  }
 0x2c5   :  { %7705 = vmatprep.mubr.bf16.mxu0 %v1352_v12  ;;  %8443 = vmatprep.mubr.bf16.mxu1 %v1352_v12  ;;  %v11606_v12 = vld [vmem:[%s16057_s1 + $0x1804] ss:$16 sps:$4 sm:$0xff]  }
 0x2c7   :  { %7676 = vmatpush1.bf16.msra.mxu0 %v11514_v52  ;;  %8414 = vmatpush1.bf16.msra.mxu1 %v11517_v15  ;;  %v11609_v52 = vld [vmem:[%s16057_s1 + $0x180c] ss:$16 sps:$4 sm:$0xff]   ;;  %v1368_v15 = vcombine.high %v14712_v10, %v14712_v10 }
 0x2c8   :  { %7677 = vmatprep.subr.bf16.mxu0 %v11522_v7  ;;  %8415 = vmatprep.subr.bf16.mxu1 %v11525_v16  ;;  %v1350_v7 = vcombine.high %v14519_v8, %v14519_v8  ;;  %v11604_v16 = vld [vmem:[%s16057_s1 + $0x1800] ss:$16 sps:$4 sm:$0xff]   ;;  %v11615_v8 = vld [vmem:[%s16057_s1 + $0x182c] ss:$16 sps:$4 sm:$0xff]  }
 0x2cb   :  { %7678 = vmatpush1.bf16.msra.mxu0 %v11520_v17  ;;  %8416 = vmatpush1.bf16.msra.mxu1 %v11523_v18  ;;  %v11607_v17 = vld [vmem:[%s16057_s1 + $0x1808] ss:$16 sps:$4 sm:$0xff]   ;;  %v11612_v18 = vld [vmem:[%s16057_s1 + $0x1824] ss:$16 sps:$4 sm:$0xff]  }
 0x2cc   :  { %7679 = vmatprep.subr.bf16.mxu0 %v11528_v19  ;;  %8417 = vmatprep.subr.bf16.mxu1 %v11531_v20  ;;  %v14743_v19 = vrot.slane %v1368_v15, %v12412_v49  ;;  %v11610_v20 = vld [vmem:[%s16057_s1 + $0x1820] ss:$16 sps:$4 sm:$0xff]   ;;  %v11691_v15 = vld [vmem:[%s16057_s1 + $0x19c8] ss:$16 sps:$4 sm:$0xff]  }
 0x2cf   :  { %7680 = vmatpush1.bf16.msra.mxu0 %v11526_v22  ;;  %8418 = vmatpush1.bf16.msra.mxu1 %v11529_v23  ;;  %v11613_v22 = vld [vmem:[%s16057_s1 + $0x1828] ss:$16 sps:$4 sm:$0xff]   ;;  %v11618_v23 = vld [vmem:[%s16057_s1 + $0x1844] ss:$16 sps:$4 sm:$0xff]  }
 0x2d0   :  { %7681 = vmatprep.subr.bf16.mxu0 %v11534_v24  ;;  %8419 = vmatprep.subr.bf16.mxu1 %v11537_v13  ;;  %v11621_v24 = vld [vmem:[%s16057_s1 + $0x184c] ss:$16 sps:$4 sm:$0xff]   ;;  %v11616_v13 = vld [vmem:[%s16057_s1 + $0x1840] ss:$16 sps:$4 sm:$0xff]  }
 0x2d3   :  { %7682 = vmatpush1.bf16.msra.mxu0 %v11532_v27  ;;  %8420 = vmatpush1.bf16.msra.mxu1 %v11535_v28  ;;  %v11619_v27 = vld [vmem:[%s16057_s1 + $0x1848] ss:$16 sps:$4 sm:$0xff]   ;;  %v11624_v28 = vld [vmem:[%s16057_s1 + $0x1864] ss:$16 sps:$4 sm:$0xff]  }
 0x2d4   :  { %7683 = vmatprep.subr.bf16.mxu0 %v11540_v29  ;;  %8421 = vmatprep.subr.bf16.mxu1 %v11543_v14  ;;  %v11627_v29 = vld [vmem:[%s16057_s1 + $0x186c] ss:$16 sps:$4 sm:$0xff]   ;;  %v11622_v14 = vld [vmem:[%s16057_s1 + $0x1860] ss:$16 sps:$4 sm:$0xff]  }
 0x2d7   :  { %7684 = vmatpush1.bf16.msra.mxu0 %v11538_v30  ;;  %8422 = vmatpush1.bf16.msra.mxu1 %v11541_v31  ;;  %v11625_v30 = vld [vmem:[%s16057_s1 + $0x1868] ss:$16 sps:$4 sm:$0xff]   ;;  %v11630_v31 = vld [vmem:[%s16057_s1 + $0x1884] ss:$16 sps:$4 sm:$0xff]  }
 0x2d8   :  { %7685 = vmatprep.subr.bf16.mxu0 %v11546_v25  ;;  %8423 = vmatprep.subr.bf16.mxu1 %v11549_v32  ;;  %v11633_v25 = vld [vmem:[%s16057_s1 + $0x188c] ss:$16 sps:$4 sm:$0xff]   ;;  %v11628_v32 = vld [vmem:[%s16057_s1 + $0x1880] ss:$16 sps:$4 sm:$0xff]  }
 0x2db   :  { %7686 = vmatpush1.bf16.msra.mxu0 %v11544_v33  ;;  %8424 = vmatpush1.bf16.msra.mxu1 %v11547_v26  ;;  %v11631_v33 = vld [vmem:[%s16057_s1 + $0x1888] ss:$16 sps:$4 sm:$0xff]   ;;  %v11636_v26 = vld [vmem:[%s16057_s1 + $0x18a4] ss:$16 sps:$4 sm:$0xff]  }
 0x2dc   :  { %7687 = vmatprep.subr.bf16.mxu0 %v11552_v36  ;;  %8425 = vmatprep.subr.bf16.mxu1 %v11555_v37  ;;  %v11639_v36 = vld [vmem:[%s16057_s1 + $0x18ac] ss:$16 sps:$4 sm:$0xff]   ;;  %v11634_v37 = vld [vmem:[%s16057_s1 + $0x18a0] ss:$16 sps:$4 sm:$0xff]  }
 0x2df   :  { %7688 = vmatpush1.bf16.msra.mxu0 %v11550_v21  ;;  %8426 = vmatpush1.bf16.msra.mxu1 %v11553_v39  ;;  %v11637_v21 = vld [vmem:[%s16057_s1 + $0x18a8] ss:$16 sps:$4 sm:$0xff]   ;;  %v11642_v39 = vld [vmem:[%s16057_s1 + $0x18c4] ss:$16 sps:$4 sm:$0xff]  }
 0x2e0   :  { %7689 = vmatprep.subr.bf16.mxu0 %v11558_v40  ;;  %8427 = vmatprep.subr.bf16.mxu1 %v11561_v41  ;;  %v11645_v40 = vld [vmem:[%s16057_s1 + $0x18cc] ss:$16 sps:$4 sm:$0xff]   ;;  %v11640_v41 = vld [vmem:[%s16057_s1 + $0x18c0] ss:$16 sps:$4 sm:$0xff]  }
 0x2e3   :  { %7690 = vmatpush1.bf16.msra.mxu0 %v11556_v34  ;;  %8428 = vmatpush1.bf16.msra.mxu1 %v11559_v43  ;;  %v11643_v34 = vld [vmem:[%s16057_s1 + $0x18c8] ss:$16 sps:$4 sm:$0xff]   ;;  %v11648_v43 = vld [vmem:[%s16057_s1 + $0x18e4] ss:$16 sps:$4 sm:$0xff]  }
 0x2e4   :  { %7691 = vmatprep.subr.bf16.mxu0 %v11564_v45  ;;  %8429 = vmatprep.subr.bf16.mxu1 %v11567_v46  ;;  %v11651_v45 = vld [vmem:[%s16057_s1 + $0x18ec] ss:$16 sps:$4 sm:$0xff]   ;;  %v11646_v46 = vld [vmem:[%s16057_s1 + $0x18e0] ss:$16 sps:$4 sm:$0xff]  }
 0x2e7   :  { %7692 = vmatpush1.bf16.msra.mxu0 %v11562_v35  ;;  %8430 = vmatpush1.bf16.msra.mxu1 %v11565_v50  ;;  %v11649_v35 = vld [vmem:[%s16057_s1 + $0x18e8] ss:$16 sps:$4 sm:$0xff]   ;;  %v11654_v50 = vld [vmem:[%s16057_s1 + $0x1904] ss:$16 sps:$4 sm:$0xff]  }
 0x2e8   :  { %7693 = vmatprep.subr.bf16.mxu0 %v11570_v51  ;;  %8431 = vmatprep.subr.bf16.mxu1 %v11573_v53  ;;  %v11657_v51 = vld [vmem:[%s16057_s1 + $0x190c] ss:$16 sps:$4 sm:$0xff]   ;;  %v11652_v53 = vld [vmem:[%s16057_s1 + $0x1900] ss:$16 sps:$4 sm:$0xff]  }
 0x2eb   :  { %7694 = vmatpush1.bf16.msra.mxu0 %v11568_v38  ;;  %8432 = vmatpush1.bf16.msra.mxu1 %v11571_v54  ;;  %v11655_v38 = vld [vmem:[%s16057_s1 + $0x1908] ss:$16 sps:$4 sm:$0xff]   ;;  %v11660_v54 = vld [vmem:[%s16057_s1 + $0x1924] ss:$16 sps:$4 sm:$0xff]  }
 0x2ec   :  { %7695 = vmatprep.subr.bf16.mxu0 %v11576_v55  ;;  %8433 = vmatprep.subr.bf16.mxu1 %v11579_v56  ;;  %v11663_v55 = vld [vmem:[%s16057_s1 + $0x192c] ss:$16 sps:$4 sm:$0xff]   ;;  %v11658_v56 = vld [vmem:[%s16057_s1 + $0x1920] ss:$16 sps:$4 sm:$0xff]  }
 0x2ef   :  { %7696 = vmatpush1.bf16.msra.mxu0 %v11574_v47  ;;  %8434 = vmatpush1.bf16.msra.mxu1 %v11577_v57  ;;  %v11661_v47 = vld [vmem:[%s16057_s1 + $0x1928] ss:$16 sps:$4 sm:$0xff]   ;;  %v11666_v57 = vld [vmem:[%s16057_s1 + $0x1944] ss:$16 sps:$4 sm:$0xff]  }
 0x2f0   :  { %7697 = vmatprep.subr.bf16.mxu0 %v11582_v58  ;;  %8435 = vmatprep.subr.bf16.mxu1 %v11585_v48  ;;  %v11669_v58 = vld [vmem:[%s16057_s1 + $0x194c] ss:$16 sps:$4 sm:$0xff]   ;;  %v11664_v48 = vld [vmem:[%s16057_s1 + $0x1940] ss:$16 sps:$4 sm:$0xff]  }
 0x2f3   :  { %7698 = vmatpush1.bf16.msra.mxu0 %v11580_v61  ;;  %8436 = vmatpush1.bf16.msra.mxu1 %v11583_v62  ;;  %v11667_v61 = vld [vmem:[%s16057_s1 + $0x1948] ss:$16 sps:$4 sm:$0xff]   ;;  %v11672_v62 = vld [vmem:[%s16057_s1 + $0x1964] ss:$16 sps:$4 sm:$0xff]  }
 0x2f4   :  { %7699 = vmatprep.subr.bf16.mxu0 %v11588_v44  ;;  %8437 = vmatprep.subr.bf16.mxu1 %v11591_v0  ;;  %v11675_v44 = vld [vmem:[%s16057_s1 + $0x196c] ss:$16 sps:$4 sm:$0xff]   ;;  %v11670_v0 = vld [vmem:[%s16057_s1 + $0x1960] ss:$16 sps:$4 sm:$0xff]  }
 0x2f7   :  { %7700 = vmatpush1.bf16.msra.mxu0 %v11586_v1  ;;  %8438 = vmatpush1.bf16.msra.mxu1 %v11589_v2  ;;  %v11673_v1 = vld [vmem:[%s16057_s1 + $0x1968] ss:$16 sps:$4 sm:$0xff]   ;;  %v11678_v2 = vld [vmem:[%s16057_s1 + $0x1984] ss:$16 sps:$4 sm:$0xff]  }
 0x2f8   :  { %7701 = vmatprep.subr.bf16.mxu0 %v11594_v59  ;;  %8439 = vmatprep.subr.bf16.mxu1 %v11597_v3  ;;  %v11681_v59 = vld [vmem:[%s16057_s1 + $0x198c] ss:$16 sps:$4 sm:$0xff]   ;;  %v11676_v3 = vld [vmem:[%s16057_s1 + $0x1980] ss:$16 sps:$4 sm:$0xff]  }
 0x2fb   :  { %7702 = vmatpush1.bf16.msra.mxu0 %v11592_v5  ;;  %8440 = vmatpush1.bf16.msra.mxu1 %v11595_v6  ;;  %v11679_v5 = vld [vmem:[%s16057_s1 + $0x1988] ss:$16 sps:$4 sm:$0xff]   ;;  %v11684_v6 = vld [vmem:[%s16057_s1 + $0x19a4] ss:$16 sps:$4 sm:$0xff]  }
 0x2fc   :  { %7703 = vmatprep.subr.bf16.mxu0 %v11600_v60  ;;  %8441 = vmatprep.subr.bf16.mxu1 %v11603_v9  ;;  %v11687_v60 = vld [vmem:[%s16057_s1 + $0x19ac] ss:$16 sps:$4 sm:$0xff]   ;;  %v11682_v9 = vld [vmem:[%s16057_s1 + $0x19a0] ss:$16 sps:$4 sm:$0xff]  }
 0x2ff   :  { %7704 = vmatpush1.bf16.msra.mxu0 %v11598_v11  ;;  %8442 = vmatpush1.bf16.msra.mxu1 %v11601_v63  ;;  %v11685_v11 = vld [vmem:[%s16057_s1 + $0x19a8] ss:$16 sps:$4 sm:$0xff]   ;;  %v11690_v63 = vld [vmem:[%s16057_s1 + $0x19c4] ss:$16 sps:$4 sm:$0xff]  }
 0x300   :  { %7714 = vmatprep.subr.bf16.mxu0 %v11606_v12  ;;  %8452 = vmatprep.subr.bf16.mxu1 %v11609_v52  ;;  %v11693_v12 = vld [vmem:[%s16057_s1 + $0x19cc] ss:$16 sps:$4 sm:$0xff]   ;;  %v11688_v52 = vld [vmem:[%s16057_s1 + $0x19c0] ss:$16 sps:$4 sm:$0xff]  }
 0x302   :  { %7706 = vmatmul.mubr.bf16.vlgmr.msra.gmra.mrb[0].mxu0 %v1350_v7  ;;  %8444 = vmatmul.mubr.bf16.vlgmr.msra.gmra.mrb[0].mxu1 %v1350_v7  ;;  %v11696_v7 = vld [vmem:[%s16057_s1 + $0x19e4] ss:$16 sps:$4 sm:$0xff]  }
 0x303   :  { %7715 = vmatpush1.bf16.msra.mxu0 %v11604_v16  ;;  %8453 = vmatpush1.bf16.msra.mxu1 %v11607_v17  ;;  %v11699_v16 = vld [vmem:[%s16057_s1 + $0x19ec] ss:$16 sps:$4 sm:$0xff]   ;;  %v11694_v17 = vld [vmem:[%s16057_s1 + $0x19e0] ss:$16 sps:$4 sm:$0xff]  }
 0x304   :  { %7716 = vmatprep.subr.bf16.mxu0 %v11612_v18  ;;  %8454 = vmatprep.subr.bf16.mxu1 %v11615_v8  ;;  %v11697_v18 = vld [vmem:[%s16057_s1 + $0x19e8] ss:$16 sps:$4 sm:$0xff]   ;;  %v11702_v8 = vld [vmem:[%s16057_s1 + $0x1a04] ss:$16 sps:$4 sm:$0xff]  }
 0x305   :  { %7746 = vmatprep.mubr.bf16.mxu0 %v14743_v19  ;;  %8484 = vmatprep.mubr.bf16.mxu1 %v14743_v19 }
 0x307   :  { %7717 = vmatpush1.bf16.msra.mxu0 %v11610_v20  ;;  %8455 = vmatpush1.bf16.msra.mxu1 %v11613_v22  ;;  %v11705_v20 = vld [vmem:[%s16057_s1 + $0x1a0c] ss:$16 sps:$4 sm:$0xff]   ;;  %v14929_v22 = vrot.slane %v14712_v10, %v12412_v49 }
 0x308   :  { %7718 = vmatprep.subr.bf16.mxu0 %v11618_v23  ;;  %8456 = vmatprep.subr.bf16.mxu1 %v11621_v24  ;;  %v11700_v23 = vld [vmem:[%s16057_s1 + $0x1a00] ss:$16 sps:$4 sm:$0xff]   ;;  %v11703_v24 = vld [vmem:[%s16057_s1 + $0x1a08] ss:$16 sps:$4 sm:$0xff]   ;;  %v11711_v10 = vld [vmem:[%s16057_s1 + $0x1a2c] ss:$16 sps:$4 sm:$0xff]  }
 0x30b   :  { %7719 = vmatpush1.bf16.msra.mxu0 %v11616_v13  ;;  %8457 = vmatpush1.bf16.msra.mxu1 %v11619_v27  ;;  %v11708_v13 = vld [vmem:[%s16057_s1 + $0x1a24] ss:$16 sps:$4 sm:$0xff]   ;;  %v1400_v27 = vcombine.high %v14743_v19, %v14743_v19 }
 0x30c   :  { %7720 = vmatprep.subr.bf16.mxu0 %v11624_v28  ;;  %8458 = vmatprep.subr.bf16.mxu1 %v11627_v29  ;;  %v11706_v28 = vld [vmem:[%s16057_s1 + $0x1a20] ss:$16 sps:$4 sm:$0xff]   ;;  %v11709_v29 = vld [vmem:[%s16057_s1 + $0x1a28] ss:$16 sps:$4 sm:$0xff]   ;;  %v11714_v19 = vld [vmem:[%s16057_s1 + $0x1a44] ss:$16 sps:$4 sm:$0xff]  }
 0x30f   :  { %7721 = vmatpush1.bf16.msra.mxu0 %v11622_v14  ;;  %8459 = vmatpush1.bf16.msra.mxu1 %v11625_v30  ;;  %v11717_v14 = vld [vmem:[%s16057_s1 + $0x1a4c] ss:$16 sps:$4 sm:$0xff]   ;;  %v11712_v30 = vld [vmem:[%s16057_s1 + $0x1a40] ss:$16 sps:$4 sm:$0xff]  }
 0x310   :  { %7722 = vmatprep.subr.bf16.mxu0 %v11630_v31  ;;  %8460 = vmatprep.subr.bf16.mxu1 %v11633_v25  ;;  %v11715_v31 = vld [vmem:[%s16057_s1 + $0x1a48] ss:$16 sps:$4 sm:$0xff]   ;;  %v11720_v25 = vld [vmem:[%s16057_s1 + $0x1a64] ss:$16 sps:$4 sm:$0xff]  }
 0x313   :  { %7723 = vmatpush1.bf16.msra.mxu0 %v11628_v32  ;;  %8461 = vmatpush1.bf16.msra.mxu1 %v11631_v33  ;;  %v11723_v32 = vld [vmem:[%s16057_s1 + $0x1a6c] ss:$16 sps:$4 sm:$0xff]   ;;  %v11718_v33 = vld [vmem:[%s16057_s1 + $0x1a60] ss:$16 sps:$4 sm:$0xff]  }
 0x314   :  { %7724 = vmatprep.subr.bf16.mxu0 %v11636_v26  ;;  %8462 = vmatprep.subr.bf16.mxu1 %v11639_v36  ;;  %v11721_v26 = vld [vmem:[%s16057_s1 + $0x1a68] ss:$16 sps:$4 sm:$0xff]   ;;  %v11726_v36 = vld [vmem:[%s16057_s1 + $0x1a84] ss:$16 sps:$4 sm:$0xff]  }
 0x317   :  { %7725 = vmatpush1.bf16.msra.mxu0 %v11634_v37  ;;  %8463 = vmatpush1.bf16.msra.mxu1 %v11637_v21  ;;  %v11729_v37 = vld [vmem:[%s16057_s1 + $0x1a8c] ss:$16 sps:$4 sm:$0xff]   ;;  %v11724_v21 = vld [vmem:[%s16057_s1 + $0x1a80] ss:$16 sps:$4 sm:$0xff]  }
 0x318   :  { %7726 = vmatprep.subr.bf16.mxu0 %v11642_v39  ;;  %8464 = vmatprep.subr.bf16.mxu1 %v11645_v40  ;;  %v11727_v39 = vld [vmem:[%s16057_s1 + $0x1a88] ss:$16 sps:$4 sm:$0xff]   ;;  %v11732_v40 = vld [vmem:[%s16057_s1 + $0x1aa4] ss:$16 sps:$4 sm:$0xff]  }
 0x31b   :  { %7727 = vmatpush1.bf16.msra.mxu0 %v11640_v41  ;;  %8465 = vmatpush1.bf16.msra.mxu1 %v11643_v34  ;;  %v11735_v41 = vld [vmem:[%s16057_s1 + $0x1aac] ss:$16 sps:$4 sm:$0xff]   ;;  %v11730_v34 = vld [vmem:[%s16057_s1 + $0x1aa0] ss:$16 sps:$4 sm:$0xff]  }
 0x31c   :  { %7728 = vmatprep.subr.bf16.mxu0 %v11648_v43  ;;  %8466 = vmatprep.subr.bf16.mxu1 %v11651_v45  ;;  %v11733_v43 = vld [vmem:[%s16057_s1 + $0x1aa8] ss:$16 sps:$4 sm:$0xff]   ;;  %v11738_v45 = vld [vmem:[%s16057_s1 + $0x1ac4] ss:$16 sps:$4 sm:$0xff]  }
 0x31f   :  { %7729 = vmatpush1.bf16.msra.mxu0 %v11646_v46  ;;  %8467 = vmatpush1.bf16.msra.mxu1 %v11649_v35  ;;  %v11741_v46 = vld [vmem:[%s16057_s1 + $0x1acc] ss:$16 sps:$4 sm:$0xff]   ;;  %v11736_v35 = vld [vmem:[%s16057_s1 + $0x1ac0] ss:$16 sps:$4 sm:$0xff]  }
 0x320   :  { %7730 = vmatprep.subr.bf16.mxu0 %v11654_v50  ;;  %8468 = vmatprep.subr.bf16.mxu1 %v11657_v51  ;;  %v11739_v50 = vld [vmem:[%s16057_s1 + $0x1ac8] ss:$16 sps:$4 sm:$0xff]   ;;  %v11744_v51 = vld [vmem:[%s16057_s1 + $0x1ae4] ss:$16 sps:$4 sm:$0xff]  }
 0x323   :  { %7731 = vmatpush1.bf16.msra.mxu0 %v11652_v53  ;;  %8469 = vmatpush1.bf16.msra.mxu1 %v11655_v38  ;;  %v11747_v53 = vld [vmem:[%s16057_s1 + $0x1aec] ss:$16 sps:$4 sm:$0xff]   ;;  %v11742_v38 = vld [vmem:[%s16057_s1 + $0x1ae0] ss:$16 sps:$4 sm:$0xff]  }
 0x324   :  { %7732 = vmatprep.subr.bf16.mxu0 %v11660_v54  ;;  %8470 = vmatprep.subr.bf16.mxu1 %v11663_v55  ;;  %v11745_v54 = vld [vmem:[%s16057_s1 + $0x1ae8] ss:$16 sps:$4 sm:$0xff]   ;;  %v11750_v55 = vld [vmem:[%s16057_s1 + $0x1b04] ss:$16 sps:$4 sm:$0xff]  }
 0x327   :  { %7733 = vmatpush1.bf16.msra.mxu0 %v11658_v56  ;;  %8471 = vmatpush1.bf16.msra.mxu1 %v11661_v47  ;;  %v11753_v56 = vld [vmem:[%s16057_s1 + $0x1b0c] ss:$16 sps:$4 sm:$0xff]   ;;  %v11748_v47 = vld [vmem:[%s16057_s1 + $0x1b00] ss:$16 sps:$4 sm:$0xff]  }
 0x328   :  { %7734 = vmatprep.subr.bf16.mxu0 %v11666_v57  ;;  %8472 = vmatprep.subr.bf16.mxu1 %v11669_v58  ;;  %v11751_v57 = vld [vmem:[%s16057_s1 + $0x1b08] ss:$16 sps:$4 sm:$0xff]   ;;  %v11756_v58 = vld [vmem:[%s16057_s1 + $0x1b24] ss:$16 sps:$4 sm:$0xff]  }
 0x32b   :  { %7735 = vmatpush1.bf16.msra.mxu0 %v11664_v48  ;;  %8473 = vmatpush1.bf16.msra.mxu1 %v11667_v61  ;;  %v11759_v48 = vld [vmem:[%s16057_s1 + $0x1b2c] ss:$16 sps:$4 sm:$0xff]   ;;  %v11754_v61 = vld [vmem:[%s16057_s1 + $0x1b20] ss:$16 sps:$4 sm:$0xff]  }
 0x32c   :  { %7736 = vmatprep.subr.bf16.mxu0 %v11672_v62  ;;  %8474 = vmatprep.subr.bf16.mxu1 %v11675_v44  ;;  %v11757_v62 = vld [vmem:[%s16057_s1 + $0x1b28] ss:$16 sps:$4 sm:$0xff]   ;;  %v11762_v44 = vld [vmem:[%s16057_s1 + $0x1b44] ss:$16 sps:$4 sm:$0xff]  }
 0x32f   :  { %7737 = vmatpush1.bf16.msra.mxu0 %v11670_v0  ;;  %8475 = vmatpush1.bf16.msra.mxu1 %v11673_v1  ;;  %v11765_v0 = vld [vmem:[%s16057_s1 + $0x1b4c] ss:$16 sps:$4 sm:$0xff]   ;;  %v11760_v1 = vld [vmem:[%s16057_s1 + $0x1b40] ss:$16 sps:$4 sm:$0xff]  }
 0x330   :  { %7738 = vmatprep.subr.bf16.mxu0 %v11678_v2  ;;  %8476 = vmatprep.subr.bf16.mxu1 %v11681_v59  ;;  %v11763_v2 = vld [vmem:[%s16057_s1 + $0x1b48] ss:$16 sps:$4 sm:$0xff]   ;;  %v11768_v59 = vld [vmem:[%s16057_s1 + $0x1b64] ss:$16 sps:$4 sm:$0xff]  }
 0x333   :  { %7739 = vmatpush1.bf16.msra.mxu0 %v11676_v3  ;;  %8477 = vmatpush1.bf16.msra.mxu1 %v11679_v5  ;;  %v11771_v3 = vld [vmem:[%s16057_s1 + $0x1b6c] ss:$16 sps:$4 sm:$0xff]   ;;  %v11766_v5 = vld [vmem:[%s16057_s1 + $0x1b60] ss:$16 sps:$4 sm:$0xff]  }
 0x334   :  { %7740 = vmatprep.subr.bf16.mxu0 %v11684_v6  ;;  %8478 = vmatprep.subr.bf16.mxu1 %v11687_v60  ;;  %v11769_v6 = vld [vmem:[%s16057_s1 + $0x1b68] ss:$16 sps:$4 sm:$0xff]   ;;  %v11774_v60 = vld [vmem:[%s16057_s1 + $0x1b84] ss:$16 sps:$4 sm:$0xff]  }
 0x337   :  { %7741 = vmatpush1.bf16.msra.mxu0 %v11682_v9  ;;  %8479 = vmatpush1.bf16.msra.mxu1 %v11685_v11  ;;  %v11777_v9 = vld [vmem:[%s16057_s1 + $0x1b8c] ss:$16 sps:$4 sm:$0xff]   ;;  %v11772_v11 = vld [vmem:[%s16057_s1 + $0x1b80] ss:$16 sps:$4 sm:$0xff]  }
 0x338   :  { %7742 = vmatprep.subr.bf16.mxu0 %v11690_v63  ;;  %8480 = vmatprep.subr.bf16.mxu1 %v11693_v12  ;;  %v11775_v63 = vld [vmem:[%s16057_s1 + $0x1b88] ss:$16 sps:$4 sm:$0xff]   ;;  %v11780_v12 = vld [vmem:[%s16057_s1 + $0x1ba4] ss:$16 sps:$4 sm:$0xff]  }
 0x33b   :  { %7743 = vmatpush1.bf16.msra.mxu0 %v11688_v52  ;;  %8481 = vmatpush1.bf16.msra.mxu1 %v11691_v15  ;;  %v11783_v52 = vld [vmem:[%s16057_s1 + $0x1bac] ss:$16 sps:$4 sm:$0xff]   ;;  %v11778_v15 = vld [vmem:[%s16057_s1 + $0x1ba0] ss:$16 sps:$4 sm:$0xff]  }
 0x33c   :  { %7744 = vmatprep.subr.bf16.mxu0 %v11696_v7  ;;  %8482 = vmatprep.subr.bf16.mxu1 %v11699_v16  ;;  %v11781_v7 = vld [vmem:[%s16057_s1 + $0x1ba8] ss:$16 sps:$4 sm:$0xff]   ;;  %v11786_v16 = vld [vmem:[%s16057_s1 + $0x1bc4] ss:$16 sps:$4 sm:$0xff]  }
 0x33f   :  { %7745 = vmatpush1.bf16.msra.mxu0 %v11694_v17  ;;  %8483 = vmatpush1.bf16.msra.mxu1 %v11697_v18  ;;  %v11789_v17 = vld [vmem:[%s16057_s1 + $0x1bcc] ss:$16 sps:$4 sm:$0xff]   ;;  %v1353_v18 = vcombine.high %v14696_v4, %v14696_v4 }
 0x340   :  { %7755 = vmatprep.subr.bf16.mxu0 %v11702_v8  ;;  %8493 = vmatprep.subr.bf16.mxu1 %v11705_v20  ;;  %v11784_v8 = vld [vmem:[%s16057_s1 + $0x1bc0] ss:$16 sps:$4 sm:$0xff]   ;;  %v11787_v20 = vld [vmem:[%s16057_s1 + $0x1bc8] ss:$16 sps:$4 sm:$0xff]   ;;  %v11795_v4 = vld [vmem:[%s16057_s1 + $0x1bec] ss:$16 sps:$4 sm:$0xff]  }
 0x342   :  { %7747 = vmatmul.mubr.bf16.vlgmr.msra.gmra.mrb[0].mxu0 %v14929_v22  ;;  %8485 = vmatmul.mubr.bf16.vlgmr.msra.gmra.mrb[0].mxu1 %v14929_v22 }
 0x343   :  { %7756 = vmatpush1.bf16.msra.mxu0 %v11700_v23  ;;  %8494 = vmatpush1.bf16.msra.mxu1 %v11703_v24  ;;  %v11792_v23 = vld [vmem:[%s16057_s1 + $0x1be4] ss:$16 sps:$4 sm:$0xff]   ;;  %v15118_v24 = vrot.slane %v1353_v18, %v12412_v49  ;;  %v11871_v18 = vld [vmem:[%s16057_s1 + $0x1d88] ss:$16 sps:$4 sm:$0xff]  }
 0x344   :  { %7757 = vmatprep.subr.bf16.mxu0 %v11708_v13  ;;  %8495 = vmatprep.subr.bf16.mxu1 %v11711_v10  ;;  %v11790_v13 = vld [vmem:[%s16057_s1 + $0x1be0] ss:$16 sps:$4 sm:$0xff]   ;;  %v11793_v10 = vld [vmem:[%s16057_s1 + $0x1be8] ss:$16 sps:$4 sm:$0xff]  }
 0x345   :  { %7787 = vmatprep.mubr.bf16.mxu0 %v1400_v27  ;;  %8525 = vmatprep.mubr.bf16.mxu1 %v1400_v27  ;;  %v11798_v27 = vld [vmem:[%s16057_s1 + $0x1c04] ss:$16 sps:$4 sm:$0xff]  }
 0x347   :  { %7758 = vmatpush1.bf16.msra.mxu0 %v11706_v28  ;;  %8496 = vmatpush1.bf16.msra.mxu1 %v11709_v29  ;;  %v11801_v28 = vld [vmem:[%s16057_s1 + $0x1c0c] ss:$16 sps:$4 sm:$0xff]   ;;  %v1369_v29 = vcombine.high %v15118_v24, %v15118_v24 }
 0x348   :  { %7759 = vmatprep.subr.bf16.mxu0 %v11714_v19  ;;  %8497 = vmatprep.subr.bf16.mxu1 %v11717_v14  ;;  %v1398_v19 = vcombine.high %v14929_v22, %v14929_v22  ;;  %v11796_v14 = vld [vmem:[%s16057_s1 + $0x1c00] ss:$16 sps:$4 sm:$0xff]   ;;  %v11807_v22 = vld [vmem:[%s16057_s1 + $0x1c2c] ss:$16 sps:$4 sm:$0xff]  }
 0x34b   :  { %7760 = vmatpush1.bf16.msra.mxu0 %v11712_v30  ;;  %8498 = vmatpush1.bf16.msra.mxu1 %v11715_v31  ;;  %v11799_v30 = vld [vmem:[%s16057_s1 + $0x1c08] ss:$16 sps:$4 sm:$0xff]   ;;  %v11804_v31 = vld [vmem:[%s16057_s1 + $0x1c24] ss:$16 sps:$4 sm:$0xff]  }
 0x34c   :  { %7761 = vmatprep.subr.bf16.mxu0 %v11720_v25  ;;  %8499 = vmatprep.subr.bf16.mxu1 %v11723_v32  ;;  %v15149_v25 = vrot.slane %v1369_v29, %v12412_v49  ;;  %v11802_v32 = vld [vmem:[%s16057_s1 + $0x1c20] ss:$16 sps:$4 sm:$0xff]   ;;  %v11888_v29 = vld [vmem:[%s16057_s1 + $0x1de4] ss:$16 sps:$4 sm:$0xff]  }
 0x34f   :  { %7762 = vmatpush1.bf16.msra.mxu0 %v11718_v33  ;;  %8500 = vmatpush1.bf16.msra.mxu1 %v11721_v26  ;;  %v11805_v33 = vld [vmem:[%s16057_s1 + $0x1c28] ss:$16 sps:$4 sm:$0xff]   ;;  %v11810_v26 = vld [vmem:[%s16057_s1 + $0x1c44] ss:$16 sps:$4 sm:$0xff]  }
 0x350   :  { %7763 = vmatprep.subr.bf16.mxu0 %v11726_v36  ;;  %8501 = vmatprep.subr.bf16.mxu1 %v11729_v37  ;;  %v11813_v36 = vld [vmem:[%s16057_s1 + $0x1c4c] ss:$16 sps:$4 sm:$0xff]   ;;  %v11808_v37 = vld [vmem:[%s16057_s1 + $0x1c40] ss:$16 sps:$4 sm:$0xff]  }
 0x353   :  { %7764 = vmatpush1.bf16.msra.mxu0 %v11724_v21  ;;  %8502 = vmatpush1.bf16.msra.mxu1 %v11727_v39  ;;  %v11811_v21 = vld [vmem:[%s16057_s1 + $0x1c48] ss:$16 sps:$4 sm:$0xff]   ;;  %v11816_v39 = vld [vmem:[%s16057_s1 + $0x1c64] ss:$16 sps:$4 sm:$0xff]  }
 0x354   :  { %7765 = vmatprep.subr.bf16.mxu0 %v11732_v40  ;;  %8503 = vmatprep.subr.bf16.mxu1 %v11735_v41  ;;  %v11819_v40 = vld [vmem:[%s16057_s1 + $0x1c6c] ss:$16 sps:$4 sm:$0xff]   ;;  %v11814_v41 = vld [vmem:[%s16057_s1 + $0x1c60] ss:$16 sps:$4 sm:$0xff]  }
 0x357   :  { %7766 = vmatpush1.bf16.msra.mxu0 %v11730_v34  ;;  %8504 = vmatpush1.bf16.msra.mxu1 %v11733_v43  ;;  %v11817_v34 = vld [vmem:[%s16057_s1 + $0x1c68] ss:$16 sps:$4 sm:$0xff]   ;;  %v11822_v43 = vld [vmem:[%s16057_s1 + $0x1c84] ss:$16 sps:$4 sm:$0xff]  }
 0x358   :  { %7767 = vmatprep.subr.bf16.mxu0 %v11738_v45  ;;  %8505 = vmatprep.subr.bf16.mxu1 %v11741_v46  ;;  %v11825_v45 = vld [vmem:[%s16057_s1 + $0x1c8c] ss:$16 sps:$4 sm:$0xff]   ;;  %v11820_v46 = vld [vmem:[%s16057_s1 + $0x1c80] ss:$16 sps:$4 sm:$0xff]  }
 0x35b   :  { %7768 = vmatpush1.bf16.msra.mxu0 %v11736_v35  ;;  %8506 = vmatpush1.bf16.msra.mxu1 %v11739_v50  ;;  %v11823_v35 = vld [vmem:[%s16057_s1 + $0x1c88] ss:$16 sps:$4 sm:$0xff]   ;;  %v11828_v50 = vld [vmem:[%s16057_s1 + $0x1ca4] ss:$16 sps:$4 sm:$0xff]  }
 0x35c   :  { %7769 = vmatprep.subr.bf16.mxu0 %v11744_v51  ;;  %8507 = vmatprep.subr.bf16.mxu1 %v11747_v53  ;;  %v11831_v51 = vld [vmem:[%s16057_s1 + $0x1cac] ss:$16 sps:$4 sm:$0xff]   ;;  %v11826_v53 = vld [vmem:[%s16057_s1 + $0x1ca0] ss:$16 sps:$4 sm:$0xff]  }
 0x35f   :  { %7770 = vmatpush1.bf16.msra.mxu0 %v11742_v38  ;;  %8508 = vmatpush1.bf16.msra.mxu1 %v11745_v54  ;;  %v11829_v38 = vld [vmem:[%s16057_s1 + $0x1ca8] ss:$16 sps:$4 sm:$0xff]   ;;  %v11834_v54 = vld [vmem:[%s16057_s1 + $0x1cc4] ss:$16 sps:$4 sm:$0xff]  }
 0x360   :  { %7771 = vmatprep.subr.bf16.mxu0 %v11750_v55  ;;  %8509 = vmatprep.subr.bf16.mxu1 %v11753_v56  ;;  %v11837_v55 = vld [vmem:[%s16057_s1 + $0x1ccc] ss:$16 sps:$4 sm:$0xff]   ;;  %v11832_v56 = vld [vmem:[%s16057_s1 + $0x1cc0] ss:$16 sps:$4 sm:$0xff]  }
 0x363   :  { %7772 = vmatpush1.bf16.msra.mxu0 %v11748_v47  ;;  %8510 = vmatpush1.bf16.msra.mxu1 %v11751_v57  ;;  %v11835_v47 = vld [vmem:[%s16057_s1 + $0x1cc8] ss:$16 sps:$4 sm:$0xff]   ;;  %v11840_v57 = vld [vmem:[%s16057_s1 + $0x1ce4] ss:$16 sps:$4 sm:$0xff]  }
 0x364   :  { %7773 = vmatprep.subr.bf16.mxu0 %v11756_v58  ;;  %8511 = vmatprep.subr.bf16.mxu1 %v11759_v48  ;;  %v11843_v58 = vld [vmem:[%s16057_s1 + $0x1cec] ss:$16 sps:$4 sm:$0xff]   ;;  %v11838_v48 = vld [vmem:[%s16057_s1 + $0x1ce0] ss:$16 sps:$4 sm:$0xff]  }
 0x367   :  { %7774 = vmatpush1.bf16.msra.mxu0 %v11754_v61  ;;  %8512 = vmatpush1.bf16.msra.mxu1 %v11757_v62  ;;  %v11841_v61 = vld [vmem:[%s16057_s1 + $0x1ce8] ss:$16 sps:$4 sm:$0xff]   ;;  %v11846_v62 = vld [vmem:[%s16057_s1 + $0x1d04] ss:$16 sps:$4 sm:$0xff]  }
 0x368   :  { %7775 = vmatprep.subr.bf16.mxu0 %v11762_v44  ;;  %8513 = vmatprep.subr.bf16.mxu1 %v11765_v0  ;;  %v11849_v44 = vld [vmem:[%s16057_s1 + $0x1d0c] ss:$16 sps:$4 sm:$0xff]   ;;  %v11844_v0 = vld [vmem:[%s16057_s1 + $0x1d00] ss:$16 sps:$4 sm:$0xff]  }
 0x36b   :  { %7776 = vmatpush1.bf16.msra.mxu0 %v11760_v1  ;;  %8514 = vmatpush1.bf16.msra.mxu1 %v11763_v2  ;;  %v11847_v1 = vld [vmem:[%s16057_s1 + $0x1d08] ss:$16 sps:$4 sm:$0xff]   ;;  %v11852_v2 = vld [vmem:[%s16057_s1 + $0x1d24] ss:$16 sps:$4 sm:$0xff]  }
 0x36c   :  { %7777 = vmatprep.subr.bf16.mxu0 %v11768_v59  ;;  %8515 = vmatprep.subr.bf16.mxu1 %v11771_v3  ;;  %v11855_v59 = vld [vmem:[%s16057_s1 + $0x1d2c] ss:$16 sps:$4 sm:$0xff]   ;;  %v11850_v3 = vld [vmem:[%s16057_s1 + $0x1d20] ss:$16 sps:$4 sm:$0xff]  }
 0x36f   :  { %7778 = vmatpush1.bf16.msra.mxu0 %v11766_v5  ;;  %8516 = vmatpush1.bf16.msra.mxu1 %v11769_v6  ;;  %v11853_v5 = vld [vmem:[%s16057_s1 + $0x1d28] ss:$16 sps:$4 sm:$0xff]   ;;  %v11858_v6 = vld [vmem:[%s16057_s1 + $0x1d44] ss:$16 sps:$4 sm:$0xff]  }
 0x370   :  { %7779 = vmatprep.subr.bf16.mxu0 %v11774_v60  ;;  %8517 = vmatprep.subr.bf16.mxu1 %v11777_v9  ;;  %v11861_v60 = vld [vmem:[%s16057_s1 + $0x1d4c] ss:$16 sps:$4 sm:$0xff]   ;;  %v11856_v9 = vld [vmem:[%s16057_s1 + $0x1d40] ss:$16 sps:$4 sm:$0xff]  }
 0x373   :  { %7780 = vmatpush1.bf16.msra.mxu0 %v11772_v11  ;;  %8518 = vmatpush1.bf16.msra.mxu1 %v11775_v63  ;;  %v11859_v11 = vld [vmem:[%s16057_s1 + $0x1d48] ss:$16 sps:$4 sm:$0xff]   ;;  %v11864_v63 = vld [vmem:[%s16057_s1 + $0x1d64] ss:$16 sps:$4 sm:$0xff]  }
 0x374   :  { %7781 = vmatprep.subr.bf16.mxu0 %v11780_v12  ;;  %8519 = vmatprep.subr.bf16.mxu1 %v11783_v52  ;;  %v11867_v12 = vld [vmem:[%s16057_s1 + $0x1d6c] ss:$16 sps:$4 sm:$0xff]   ;;  %v11862_v52 = vld [vmem:[%s16057_s1 + $0x1d60] ss:$16 sps:$4 sm:$0xff]  }
 0x377   :  { %7782 = vmatpush1.bf16.msra.mxu0 %v11778_v15  ;;  %8520 = vmatpush1.bf16.msra.mxu1 %v11781_v7  ;;  %v11865_v15 = vld [vmem:[%s16057_s1 + $0x1d68] ss:$16 sps:$4 sm:$0xff]   ;;  %v11870_v7 = vld [vmem:[%s16057_s1 + $0x1d84] ss:$16 sps:$4 sm:$0xff]  }
 0x378   :  { %7783 = vmatprep.subr.bf16.mxu0 %v11786_v16  ;;  %8521 = vmatprep.subr.bf16.mxu1 %v11789_v17  ;;  %v11873_v16 = vld [vmem:[%s16057_s1 + $0x1d8c] ss:$16 sps:$4 sm:$0xff]   ;;  %v11868_v17 = vld [vmem:[%s16057_s1 + $0x1d80] ss:$16 sps:$4 sm:$0xff]  }
 0x37b   :  { %7784 = vmatpush1.bf16.msra.mxu0 %v11784_v8  ;;  %8522 = vmatpush1.bf16.msra.mxu1 %v11787_v20  ;;  %v11876_v8 = vld [vmem:[%s16057_s1 + $0x1da4] ss:$16 sps:$4 sm:$0xff]   ;;  %v11879_v20 = vld [vmem:[%s16057_s1 + $0x1dac] ss:$16 sps:$4 sm:$0xff]  }
 0x37c   :  { %7785 = vmatprep.subr.bf16.mxu0 %v11792_v23  ;;  %8523 = vmatprep.subr.bf16.mxu1 %v11795_v4  ;;  %v11874_v23 = vld [vmem:[%s16057_s1 + $0x1da0] ss:$16 sps:$4 sm:$0xff]   ;;  %v11877_v4 = vld [vmem:[%s16057_s1 + $0x1da8] ss:$16 sps:$4 sm:$0xff]  }
 0x37f   :  { %7786 = vmatpush1.bf16.msra.mxu0 %v11790_v13  ;;  %8524 = vmatpush1.bf16.msra.mxu1 %v11793_v10  ;;  %v11882_v13 = vld [vmem:[%s16057_s1 + $0x1dc4] ss:$16 sps:$4 sm:$0xff]   ;;  %v11885_v10 = vld [vmem:[%s16057_s1 + $0x1dcc] ss:$16 sps:$4 sm:$0xff]  }
 0x380   :  { %7796 = vmatprep.subr.bf16.mxu0 %v11798_v27  ;;  %8534 = vmatprep.subr.bf16.mxu1 %v11801_v28  ;;  %v11880_v27 = vld [vmem:[%s16057_s1 + $0x1dc0] ss:$16 sps:$4 sm:$0xff]   ;;  %v11883_v28 = vld [vmem:[%s16057_s1 + $0x1dc8] ss:$16 sps:$4 sm:$0xff]  }
 0x382   :  { %7788 = vmatmul.mubr.bf16.vlgmr.msra.gmra.mrb[0].mxu0 %v1398_v19  ;;  %8526 = vmatmul.mubr.bf16.vlgmr.msra.gmra.mrb[0].mxu1 %v1398_v19  ;;  %v11891_v19 = vld [vmem:[%s16057_s1 + $0x1dec] ss:$16 sps:$4 sm:$0xff]  }
 0x383   :  { %7797 = vmatpush1.bf16.msra.mxu0 %v11796_v14  ;;  %8535 = vmatpush1.bf16.msra.mxu1 %v11799_v30  ;;  %v11886_v14 = vld [vmem:[%s16057_s1 + $0x1de0] ss:$16 sps:$4 sm:$0xff]   ;;  %v11889_v30 = vld [vmem:[%s16057_s1 + $0x1de8] ss:$16 sps:$4 sm:$0xff]  }
 0x384   :  { %7798 = vmatprep.subr.bf16.mxu0 %v11804_v31  ;;  %8536 = vmatprep.subr.bf16.mxu1 %v11807_v22  ;;  %v11895_v31 = vld [vmem:[%s16057_s1 + $0x1e04] ss:$16 sps:$4 sm:$0xff]   ;;  %v11898_v22 = vld [vmem:[%s16057_s1 + $0x1e0c] ss:$16 sps:$4 sm:$0xff]  }
 0x385   :  { %7828 = vmatprep.mubr.bf16.mxu0 %v15149_v25  ;;  %8566 = vmatprep.mubr.bf16.mxu1 %v15149_v25 }
 0x387   :  { %7799 = vmatpush1.bf16.msra.mxu0 %v11802_v32  ;;  %8537 = vmatpush1.bf16.msra.mxu1 %v11805_v33  ;;  %v15335_v32 = vrot.slane %v15118_v24, %v12412_v49  ;;  %v11893_v33 = vld [vmem:[%s16057_s1 + $0x1e00] ss:$16 sps:$4 sm:$0xff]   ;;  %v11904_v24 = vld [vmem:[%s16057_s1 + $0x1e2c] ss:$16 sps:$4 sm:$0xff]  }
 0x388   :  { %7800 = vmatprep.subr.bf16.mxu0 %v11810_v26  ;;  %8538 = vmatprep.subr.bf16.mxu1 %v11813_v36  ;;  %v11896_v26 = vld [vmem:[%s16057_s1 + $0x1e08] ss:$16 sps:$4 sm:$0xff]   ;;  %v11901_v36 = vld [vmem:[%s16057_s1 + $0x1e24] ss:$16 sps:$4 sm:$0xff]  }
 0x38b   :  { %7801 = vmatpush1.bf16.msra.mxu0 %v11808_v37  ;;  %8539 = vmatpush1.bf16.msra.mxu1 %v11811_v21  ;;  %v1401_v37 = vcombine.high %v15149_v25, %v15149_v25  ;;  %v11899_v21 = vld [vmem:[%s16057_s1 + $0x1e20] ss:$16 sps:$4 sm:$0xff]   ;;  %v11907_v25 = vld [vmem:[%s16057_s1 + $0x1e44] ss:$16 sps:$4 sm:$0xff]  }
 0x38c   :  { %7802 = vmatprep.subr.bf16.mxu0 %v11816_v39  ;;  %8540 = vmatprep.subr.bf16.mxu1 %v11819_v40  ;;  %v11902_v39 = vld [vmem:[%s16057_s1 + $0x1e28] ss:$16 sps:$4 sm:$0xff]   ;;  %v11910_v40 = vld [vmem:[%s16057_s1 + $0x1e4c] ss:$16 sps:$4 sm:$0xff]  }
 0x38f   :  { %7803 = vmatpush1.bf16.msra.mxu0 %v11814_v41  ;;  %8541 = vmatpush1.bf16.msra.mxu1 %v11817_v34  ;;  %v11905_v41 = vld [vmem:[%s16057_s1 + $0x1e40] ss:$16 sps:$4 sm:$0xff]   ;;  %v11908_v34 = vld [vmem:[%s16057_s1 + $0x1e48] ss:$16 sps:$4 sm:$0xff]  }
 0x390   :  { %7804 = vmatprep.subr.bf16.mxu0 %v11822_v43  ;;  %8542 = vmatprep.subr.bf16.mxu1 %v11825_v45  ;;  %v11913_v43 = vld [vmem:[%s16057_s1 + $0x1e64] ss:$16 sps:$4 sm:$0xff]   ;;  %v11916_v45 = vld [vmem:[%s16057_s1 + $0x1e6c] ss:$16 sps:$4 sm:$0xff]  }
 0x393   :  { %7805 = vmatpush1.bf16.msra.mxu0 %v11820_v46  ;;  %8543 = vmatpush1.bf16.msra.mxu1 %v11823_v35  ;;  %v11911_v46 = vld [vmem:[%s16057_s1 + $0x1e60] ss:$16 sps:$4 sm:$0xff]   ;;  %v11914_v35 = vld [vmem:[%s16057_s1 + $0x1e68] ss:$16 sps:$4 sm:$0xff]  }
 0x394   :  { %7806 = vmatprep.subr.bf16.mxu0 %v11828_v50  ;;  %8544 = vmatprep.subr.bf16.mxu1 %v11831_v51  ;;  %v11919_v50 = vld [vmem:[%s16057_s1 + $0x1e84] ss:$16 sps:$4 sm:$0xff]   ;;  %v11922_v51 = vld [vmem:[%s16057_s1 + $0x1e8c] ss:$16 sps:$4 sm:$0xff]  }
 0x397   :  { %7807 = vmatpush1.bf16.msra.mxu0 %v11826_v53  ;;  %8545 = vmatpush1.bf16.msra.mxu1 %v11829_v38  ;;  %v11917_v53 = vld [vmem:[%s16057_s1 + $0x1e80] ss:$16 sps:$4 sm:$0xff]   ;;  %v11920_v38 = vld [vmem:[%s16057_s1 + $0x1e88] ss:$16 sps:$4 sm:$0xff]  }
 0x398   :  { %7808 = vmatprep.subr.bf16.mxu0 %v11834_v54  ;;  %8546 = vmatprep.subr.bf16.mxu1 %v11837_v55  ;;  %v11925_v54 = vld [vmem:[%s16057_s1 + $0x1ea4] ss:$16 sps:$4 sm:$0xff]   ;;  %v11928_v55 = vld [vmem:[%s16057_s1 + $0x1eac] ss:$16 sps:$4 sm:$0xff]  }
 0x39b   :  { %7809 = vmatpush1.bf16.msra.mxu0 %v11832_v56  ;;  %8547 = vmatpush1.bf16.msra.mxu1 %v11835_v47  ;;  %v11923_v56 = vld [vmem:[%s16057_s1 + $0x1ea0] ss:$16 sps:$4 sm:$0xff]   ;;  %v11926_v47 = vld [vmem:[%s16057_s1 + $0x1ea8] ss:$16 sps:$4 sm:$0xff]  }
 0x39c   :  { %7810 = vmatprep.subr.bf16.mxu0 %v11840_v57  ;;  %8548 = vmatprep.subr.bf16.mxu1 %v11843_v58  ;;  %v11931_v57 = vld [vmem:[%s16057_s1 + $0x1ec4] ss:$16 sps:$4 sm:$0xff]   ;;  %v11934_v58 = vld [vmem:[%s16057_s1 + $0x1ecc] ss:$16 sps:$4 sm:$0xff]  }
 0x39f   :  { %7811 = vmatpush1.bf16.msra.mxu0 %v11838_v48  ;;  %8549 = vmatpush1.bf16.msra.mxu1 %v11841_v61  ;;  %v11929_v48 = vld [vmem:[%s16057_s1 + $0x1ec0] ss:$16 sps:$4 sm:$0xff]   ;;  %v11932_v61 = vld [vmem:[%s16057_s1 + $0x1ec8] ss:$16 sps:$4 sm:$0xff]  }
 0x3a0   :  { %7812 = vmatprep.subr.bf16.mxu0 %v11846_v62  ;;  %8550 = vmatprep.subr.bf16.mxu1 %v11849_v44  ;;  %v11937_v62 = vld [vmem:[%s16057_s1 + $0x1ee4] ss:$16 sps:$4 sm:$0xff]   ;;  %v11940_v44 = vld [vmem:[%s16057_s1 + $0x1eec] ss:$16 sps:$4 sm:$0xff]  }
 0x3a3   :  { %7813 = vmatpush1.bf16.msra.mxu0 %v11844_v0  ;;  %8551 = vmatpush1.bf16.msra.mxu1 %v11847_v1  ;;  %v11935_v0 = vld [vmem:[%s16057_s1 + $0x1ee0] ss:$16 sps:$4 sm:$0xff]   ;;  %v11938_v1 = vld [vmem:[%s16057_s1 + $0x1ee8] ss:$16 sps:$4 sm:$0xff]  }
 0x3a4   :  { %7814 = vmatprep.subr.bf16.mxu0 %v11852_v2  ;;  %8552 = vmatprep.subr.bf16.mxu1 %v11855_v59  ;;  %v11943_v2 = vld [vmem:[%s16057_s1 + $0x1f04] ss:$16 sps:$4 sm:$0xff]   ;;  %v11946_v59 = vld [vmem:[%s16057_s1 + $0x1f0c] ss:$16 sps:$4 sm:$0xff]  }
 0x3a7   :  { %7815 = vmatpush1.bf16.msra.mxu0 %v11850_v3  ;;  %8553 = vmatpush1.bf16.msra.mxu1 %v11853_v5  ;;  %v11941_v3 = vld [vmem:[%s16057_s1 + $0x1f00] ss:$16 sps:$4 sm:$0xff]   ;;  %v11944_v5 = vld [vmem:[%s16057_s1 + $0x1f08] ss:$16 sps:$4 sm:$0xff]  }
 0x3a8   :  { %7816 = vmatprep.subr.bf16.mxu0 %v11858_v6  ;;  %8554 = vmatprep.subr.bf16.mxu1 %v11861_v60  ;;  %v11949_v6 = vld [vmem:[%s16057_s1 + $0x1f24] ss:$16 sps:$4 sm:$0xff]   ;;  %v11952_v60 = vld [vmem:[%s16057_s1 + $0x1f2c] ss:$16 sps:$4 sm:$0xff]  }
 0x3ab   :  { %7817 = vmatpush1.bf16.msra.mxu0 %v11856_v9  ;;  %8555 = vmatpush1.bf16.msra.mxu1 %v11859_v11  ;;  %v11947_v9 = vld [vmem:[%s16057_s1 + $0x1f20] ss:$16 sps:$4 sm:$0xff]   ;;  %v11950_v11 = vld [vmem:[%s16057_s1 + $0x1f28] ss:$16 sps:$4 sm:$0xff]  }
 0x3ac   :  { %7818 = vmatprep.subr.bf16.mxu0 %v11864_v63  ;;  %8556 = vmatprep.subr.bf16.mxu1 %v11867_v12  ;;  %v11955_v63 = vld [vmem:[%s16057_s1 + $0x1f44] ss:$16 sps:$4 sm:$0xff]   ;;  %v11958_v12 = vld [vmem:[%s16057_s1 + $0x1f4c] ss:$16 sps:$4 sm:$0xff]  }
 0x3af   :  { %7819 = vmatpush1.bf16.msra.mxu0 %v11862_v52  ;;  %8557 = vmatpush1.bf16.msra.mxu1 %v11865_v15  ;;  %v11953_v52 = vld [vmem:[%s16057_s1 + $0x1f40] ss:$16 sps:$4 sm:$0xff]   ;;  %v11956_v15 = vld [vmem:[%s16057_s1 + $0x1f48] ss:$16 sps:$4 sm:$0xff]  }
 0x3b0   :  { %7820 = vmatprep.subr.bf16.mxu0 %v11870_v7  ;;  %8558 = vmatprep.subr.bf16.mxu1 %v11873_v16  ;;  %v11961_v7 = vld [vmem:[%s16057_s1 + $0x1f64] ss:$16 sps:$4 sm:$0xff]   ;;  %v11964_v16 = vld [vmem:[%s16057_s1 + $0x1f6c] ss:$16 sps:$4 sm:$0xff]  }
 0x3b3   :  { %7821 = vmatpush1.bf16.msra.mxu0 %v11868_v17  ;;  %8559 = vmatpush1.bf16.msra.mxu1 %v11871_v18  ;;  %v11959_v17 = vld [vmem:[%s16057_s1 + $0x1f60] ss:$16 sps:$4 sm:$0xff]   ;;  %v11962_v18 = vld [vmem:[%s16057_s1 + $0x1f68] ss:$16 sps:$4 sm:$0xff]  }
 0x3b4   :  { %7822 = vmatprep.subr.bf16.mxu0 %v11876_v8  ;;  %8560 = vmatprep.subr.bf16.mxu1 %v11879_v20  ;;  %v11967_v8 = vld [vmem:[%s16057_s1 + $0x1f84] ss:$16 sps:$4 sm:$0xff]   ;;  %v11970_v20 = vld [vmem:[%s16057_s1 + $0x1f8c] ss:$16 sps:$4 sm:$0xff]  }
 0x3b7   :  { %7823 = vmatpush1.bf16.msra.mxu0 %v11874_v23  ;;  %8561 = vmatpush1.bf16.msra.mxu1 %v11877_v4  ;;  %v11965_v23 = vld [vmem:[%s16057_s1 + $0x1f80] ss:$16 sps:$4 sm:$0xff]   ;;  %v11968_v4 = vld [vmem:[%s16057_s1 + $0x1f88] ss:$16 sps:$4 sm:$0xff]  }
 0x3b8   :  { %7824 = vmatprep.subr.bf16.mxu0 %v11882_v13  ;;  %8562 = vmatprep.subr.bf16.mxu1 %v11885_v10  ;;  %v11973_v13 = vld [vmem:[%s16057_s1 + $0x1fa4] ss:$16 sps:$4 sm:$0xff]   ;;  %v11976_v10 = vld [vmem:[%s16057_s1 + $0x1fac] ss:$16 sps:$4 sm:$0xff]  }
 0x3bb   :  { %7825 = vmatpush1.bf16.msra.mxu0 %v11880_v27  ;;  %8563 = vmatpush1.bf16.msra.mxu1 %v11883_v28  ;;  %v11971_v27 = vld [vmem:[%s16057_s1 + $0x1fa0] ss:$16 sps:$4 sm:$0xff]   ;;  %v11974_v28 = vld [vmem:[%s16057_s1 + $0x1fa8] ss:$16 sps:$4 sm:$0xff]  }
 0x3bc   :  { %7826 = vmatprep.subr.bf16.mxu0 %v11888_v29  ;;  %8564 = vmatprep.subr.bf16.mxu1 %v11891_v19  ;;  %v11979_v29 = vld [vmem:[%s16057_s1 + $0x1fc4] ss:$16 sps:$4 sm:$0xff]   ;;  %v11982_v19 = vld [vmem:[%s16057_s1 + $0x1fcc] ss:$16 sps:$4 sm:$0xff]  }
 0x3bf   :  { %7827 = vmatpush1.bf16.msra.mxu0 %v11886_v14  ;;  %8565 = vmatpush1.bf16.msra.mxu1 %v11889_v30  ;;  %v11977_v14 = vld [vmem:[%s16057_s1 + $0x1fc0] ss:$16 sps:$4 sm:$0xff]   ;;  %v11980_v30 = vld [vmem:[%s16057_s1 + $0x1fc8] ss:$16 sps:$4 sm:$0xff]  }
 0x3c0   :  { %7837 = vmatprep.subr.bf16.mxu0 %v11895_v31  ;;  %8575 = vmatprep.subr.bf16.mxu1 %v11898_v22  ;;  %v11985_v31 = vld [vmem:[%s16057_s1 + $0x1fe4] ss:$16 sps:$4 sm:$0xff]   ;;  %v11988_v22 = vld [vmem:[%s16057_s1 + $0x1fec] ss:$16 sps:$4 sm:$0xff]  }
 0x3c2   :  { %7829 = vmatmul.mubr.bf16.vlgmr.msra.gmra.mrb[0].mxu0 %v15335_v32  ;;  %8567 = vmatmul.mubr.bf16.vlgmr.msra.gmra.mrb[0].mxu1 %v15335_v32 }
 0x3c3   :  { %7838 = vmatpush1.bf16.msra.mxu0 %v11893_v33  ;;  %8576 = vmatpush1.bf16.msra.mxu1 %v11896_v26  ;;  %v15524_v33 = vld.sshfl [vmem:[%s16056_s0 + $0x20] sm:$0x33 pattern:$0x75316420] }
 0x3c4   :  { %7839 = vmatprep.subr.bf16.mxu0 %v11901_v36  ;;  %8577 = vmatprep.subr.bf16.mxu1 %v11904_v24  ;;  %v11983_v26 = vld [vmem:[%s16057_s1 + $0x1fe0] ss:$16 sps:$4 sm:$0xff]   ;;  %v11986_v36 = vld [vmem:[%s16057_s1 + $0x1fe8] ss:$16 sps:$4 sm:$0xff]   ;;  %v11991_v24 = vld [vmem:[%s16057_s1 + $0x2004] ss:$16 sps:$4 sm:$0xff]  }
 0x3c5   :  { %7869 = vmatprep.mubr.bf16.mxu0 %v1401_v37  ;;  %8607 = vmatprep.mubr.bf16.mxu1 %v1401_v37  ;;  %v11994_v37 = vld [vmem:[%s16057_s1 + $0x200c] ss:$16 sps:$4 sm:$0xff]  }
 0x3c7   :  { %7840 = vmatpush1.bf16.msra.mxu0 %v11899_v21  ;;  %8578 = vmatpush1.bf16.msra.mxu1 %v11902_v39  ;;  %v1409_v21 = vcombine.high %v15524_v33, %v15524_v33  ;;  %v1399_v39 = vcombine.high %v15335_v32, %v15335_v32  ;;  %v12000_v32 = vld [vmem:[%s16057_s1 + $0x202c] ss:$16 sps:$4 sm:$0xff]  }
 0x3c8   :  { %7841 = vmatprep.subr.bf16.mxu0 %v11907_v25  ;;  %8579 = vmatprep.subr.bf16.mxu1 %v11910_v40  ;;  %v11989_v25 = vld [vmem:[%s16057_s1 + $0x2000] ss:$16 sps:$4 sm:$0xff]   ;;  %v11992_v40 = vld [vmem:[%s16057_s1 + $0x2008] ss:$16 sps:$4 sm:$0xff]  }
 0x3cb   :  { %7842 = vmatpush1.bf16.msra.mxu0 %v11905_v41  ;;  %8580 = vmatpush1.bf16.msra.mxu1 %v11908_v34  ;;  %v11997_v41 = vld [vmem:[%s16057_s1 + $0x2024] ss:$16 sps:$4 sm:$0xff]   ;;  %v15555_v34 = vrot.slane %v1409_v21, %v12412_v49 }
 0x3cc   :  { %7843 = vmatprep.subr.bf16.mxu0 %v11913_v43  ;;  %8581 = vmatprep.subr.bf16.mxu1 %v11916_v45  ;;  %v11995_v43 = vld [vmem:[%s16057_s1 + $0x2020] ss:$16 sps:$4 sm:$0xff]   ;;  %v11998_v45 = vld [vmem:[%s16057_s1 + $0x2028] ss:$16 sps:$4 sm:$0xff]   ;;  %v12081_v21 = vld [vmem:[%s16057_s1 + $0x21e4] ss:$16 sps:$4 sm:$0xff]  }
 0x3cf   :  { %7844 = vmatpush1.bf16.msra.mxu0 %v11911_v46  ;;  %8582 = vmatpush1.bf16.msra.mxu1 %v11914_v35  ;;  %v12003_v46 = vld [vmem:[%s16057_s1 + $0x2044] ss:$16 sps:$4 sm:$0xff]   ;;  %v12006_v35 = vld [vmem:[%s16057_s1 + $0x204c] ss:$16 sps:$4 sm:$0xff]  }
 0x3d0   :  { %7845 = vmatprep.subr.bf16.mxu0 %v11919_v50  ;;  %8583 = vmatprep.subr.bf16.mxu1 %v11922_v51  ;;  %v12001_v50 = vld [vmem:[%s16057_s1 + $0x2040] ss:$16 sps:$4 sm:$0xff]   ;;  %v12004_v51 = vld [vmem:[%s16057_s1 + $0x2048] ss:$16 sps:$4 sm:$0xff]  }
 0x3d3   :  { %7846 = vmatpush1.bf16.msra.mxu0 %v11917_v53  ;;  %8584 = vmatpush1.bf16.msra.mxu1 %v11920_v38  ;;  %v12009_v53 = vld [vmem:[%s16057_s1 + $0x2064] ss:$16 sps:$4 sm:$0xff]   ;;  %v12012_v38 = vld [vmem:[%s16057_s1 + $0x206c] ss:$16 sps:$4 sm:$0xff]  }
 0x3d4   :  { %7847 = vmatprep.subr.bf16.mxu0 %v11925_v54  ;;  %8585 = vmatprep.subr.bf16.mxu1 %v11928_v55  ;;  %v12007_v54 = vld [vmem:[%s16057_s1 + $0x2060] ss:$16 sps:$4 sm:$0xff]   ;;  %v12010_v55 = vld [vmem:[%s16057_s1 + $0x2068] ss:$16 sps:$4 sm:$0xff]  }
 0x3d7   :  { %7848 = vmatpush1.bf16.msra.mxu0 %v11923_v56  ;;  %8586 = vmatpush1.bf16.msra.mxu1 %v11926_v47  ;;  %v12015_v56 = vld [vmem:[%s16057_s1 + $0x2084] ss:$16 sps:$4 sm:$0xff]   ;;  %v12018_v47 = vld [vmem:[%s16057_s1 + $0x208c] ss:$16 sps:$4 sm:$0xff]  }
 0x3d8   :  { %7849 = vmatprep.subr.bf16.mxu0 %v11931_v57  ;;  %8587 = vmatprep.subr.bf16.mxu1 %v11934_v58  ;;  %v12013_v57 = vld [vmem:[%s16057_s1 + $0x2080] ss:$16 sps:$4 sm:$0xff]   ;;  %v12016_v58 = vld [vmem:[%s16057_s1 + $0x2088] ss:$16 sps:$4 sm:$0xff]  }
 0x3db   :  { %7850 = vmatpush1.bf16.msra.mxu0 %v11929_v48  ;;  %8588 = vmatpush1.bf16.msra.mxu1 %v11932_v61  ;;  %v12021_v48 = vld [vmem:[%s16057_s1 + $0x20a4] ss:$16 sps:$4 sm:$0xff]   ;;  %v12024_v61 = vld [vmem:[%s16057_s1 + $0x20ac] ss:$16 sps:$4 sm:$0xff]  }
 0x3dc   :  { %7851 = vmatprep.subr.bf16.mxu0 %v11937_v62  ;;  %8589 = vmatprep.subr.bf16.mxu1 %v11940_v44  ;;  %v12019_v62 = vld [vmem:[%s16057_s1 + $0x20a0] ss:$16 sps:$4 sm:$0xff]   ;;  %v12022_v44 = vld [vmem:[%s16057_s1 + $0x20a8] ss:$16 sps:$4 sm:$0xff]  }
 0x3df   :  { %7852 = vmatpush1.bf16.msra.mxu0 %v11935_v0  ;;  %8590 = vmatpush1.bf16.msra.mxu1 %v11938_v1  ;;  %v12027_v0 = vld [vmem:[%s16057_s1 + $0x20c4] ss:$16 sps:$4 sm:$0xff]   ;;  %v12030_v1 = vld [vmem:[%s16057_s1 + $0x20cc] ss:$16 sps:$4 sm:$0xff]  }
 0x3e0   :  { %7853 = vmatprep.subr.bf16.mxu0 %v11943_v2  ;;  %8591 = vmatprep.subr.bf16.mxu1 %v11946_v59  ;;  %v12025_v2 = vld [vmem:[%s16057_s1 + $0x20c0] ss:$16 sps:$4 sm:$0xff]   ;;  %v12028_v59 = vld [vmem:[%s16057_s1 + $0x20c8] ss:$16 sps:$4 sm:$0xff]  }
 0x3e3   :  { %7854 = vmatpush1.bf16.msra.mxu0 %v11941_v3  ;;  %8592 = vmatpush1.bf16.msra.mxu1 %v11944_v5  ;;  %v12033_v3 = vld [vmem:[%s16057_s1 + $0x20e4] ss:$16 sps:$4 sm:$0xff]   ;;  %v12036_v5 = vld [vmem:[%s16057_s1 + $0x20ec] ss:$16 sps:$4 sm:$0xff]  }
 0x3e4   :  { %7855 = vmatprep.subr.bf16.mxu0 %v11949_v6  ;;  %8593 = vmatprep.subr.bf16.mxu1 %v11952_v60  ;;  %v12031_v6 = vld [vmem:[%s16057_s1 + $0x20e0] ss:$16 sps:$4 sm:$0xff]   ;;  %v12034_v60 = vld [vmem:[%s16057_s1 + $0x20e8] ss:$16 sps:$4 sm:$0xff]  }
 0x3e7   :  { %7856 = vmatpush1.bf16.msra.mxu0 %v11947_v9  ;;  %8594 = vmatpush1.bf16.msra.mxu1 %v11950_v11  ;;  %v12039_v9 = vld [vmem:[%s16057_s1 + $0x2104] ss:$16 sps:$4 sm:$0xff]   ;;  %v12042_v11 = vld [vmem:[%s16057_s1 + $0x210c] ss:$16 sps:$4 sm:$0xff]  }
 0x3e8   :  { %7857 = vmatprep.subr.bf16.mxu0 %v11955_v63  ;;  %8595 = vmatprep.subr.bf16.mxu1 %v11958_v12  ;;  %v12037_v63 = vld [vmem:[%s16057_s1 + $0x2100] ss:$16 sps:$4 sm:$0xff]   ;;  %v12040_v12 = vld [vmem:[%s16057_s1 + $0x2108] ss:$16 sps:$4 sm:$0xff]  }
 0x3eb   :  { %7858 = vmatpush1.bf16.msra.mxu0 %v11953_v52  ;;  %8596 = vmatpush1.bf16.msra.mxu1 %v11956_v15  ;;  %v12045_v52 = vld [vmem:[%s16057_s1 + $0x2124] ss:$16 sps:$4 sm:$0xff]   ;;  %v12048_v15 = vld [vmem:[%s16057_s1 + $0x212c] ss:$16 sps:$4 sm:$0xff]  }
 0x3ec   :  { %7859 = vmatprep.subr.bf16.mxu0 %v11961_v7  ;;  %8597 = vmatprep.subr.bf16.mxu1 %v11964_v16  ;;  %v12043_v7 = vld [vmem:[%s16057_s1 + $0x2120] ss:$16 sps:$4 sm:$0xff]   ;;  %v12046_v16 = vld [vmem:[%s16057_s1 + $0x2128] ss:$16 sps:$4 sm:$0xff]  }
 0x3ef   :  { %7860 = vmatpush1.bf16.msra.mxu0 %v11959_v17  ;;  %8598 = vmatpush1.bf16.msra.mxu1 %v11962_v18  ;;  %v12051_v17 = vld [vmem:[%s16057_s1 + $0x2144] ss:$16 sps:$4 sm:$0xff]   ;;  %v12054_v18 = vld [vmem:[%s16057_s1 + $0x214c] ss:$16 sps:$4 sm:$0xff]  }
 0x3f0   :  { %7861 = vmatprep.subr.bf16.mxu0 %v11967_v8  ;;  %8599 = vmatprep.subr.bf16.mxu1 %v11970_v20  ;;  %v12049_v8 = vld [vmem:[%s16057_s1 + $0x2140] ss:$16 sps:$4 sm:$0xff]   ;;  %v12052_v20 = vld [vmem:[%s16057_s1 + $0x2148] ss:$16 sps:$4 sm:$0xff]  }
 0x3f3   :  { %7862 = vmatpush1.bf16.msra.mxu0 %v11965_v23  ;;  %8600 = vmatpush1.bf16.msra.mxu1 %v11968_v4  ;;  %v12057_v23 = vld [vmem:[%s16057_s1 + $0x2164] ss:$16 sps:$4 sm:$0xff]   ;;  %v12060_v4 = vld [vmem:[%s16057_s1 + $0x216c] ss:$16 sps:$4 sm:$0xff]  }
 0x3f4   :  { %7863 = vmatprep.subr.bf16.mxu0 %v11973_v13  ;;  %8601 = vmatprep.subr.bf16.mxu1 %v11976_v10  ;;  %v12055_v13 = vld [vmem:[%s16057_s1 + $0x2160] ss:$16 sps:$4 sm:$0xff]   ;;  %v12058_v10 = vld [vmem:[%s16057_s1 + $0x2168] ss:$16 sps:$4 sm:$0xff]  }
 0x3f7   :  { %7864 = vmatpush1.bf16.msra.mxu0 %v11971_v27  ;;  %8602 = vmatpush1.bf16.msra.mxu1 %v11974_v28  ;;  %v12063_v27 = vld [vmem:[%s16057_s1 + $0x2184] ss:$16 sps:$4 sm:$0xff]   ;;  %v12066_v28 = vld [vmem:[%s16057_s1 + $0x218c] ss:$16 sps:$4 sm:$0xff]  }
 0x3f8   :  { %7865 = vmatprep.subr.bf16.mxu0 %v11979_v29  ;;  %8603 = vmatprep.subr.bf16.mxu1 %v11982_v19  ;;  %v12061_v29 = vld [vmem:[%s16057_s1 + $0x2180] ss:$16 sps:$4 sm:$0xff]   ;;  %v12064_v19 = vld [vmem:[%s16057_s1 + $0x2188] ss:$16 sps:$4 sm:$0xff]  }
 0x3fb   :  { %7866 = vmatpush1.bf16.msra.mxu0 %v11977_v14  ;;  %8604 = vmatpush1.bf16.msra.mxu1 %v11980_v30  ;;  %v12069_v14 = vld [vmem:[%s16057_s1 + $0x21a4] ss:$16 sps:$4 sm:$0xff]   ;;  %v12072_v30 = vld [vmem:[%s16057_s1 + $0x21ac] ss:$16 sps:$4 sm:$0xff]  }
 0x3fc   :  { %7867 = vmatprep.subr.bf16.mxu0 %v11985_v31  ;;  %8605 = vmatprep.subr.bf16.mxu1 %v11988_v22  ;;  %v12067_v31 = vld [vmem:[%s16057_s1 + $0x21a0] ss:$16 sps:$4 sm:$0xff]   ;;  %v12070_v22 = vld [vmem:[%s16057_s1 + $0x21a8] ss:$16 sps:$4 sm:$0xff]  }
 0x3ff   :  { %7868 = vmatpush1.bf16.msra.mxu0 %v11983_v26  ;;  %8606 = vmatpush1.bf16.msra.mxu1 %v11986_v36  ;;  %v12075_v26 = vld [vmem:[%s16057_s1 + $0x21c4] ss:$16 sps:$4 sm:$0xff]   ;;  %v12078_v36 = vld [vmem:[%s16057_s1 + $0x21cc] ss:$16 sps:$4 sm:$0xff]  }
 0x400   :  { %7878 = vmatprep.subr.bf16.mxu0 %v11991_v24  ;;  %8616 = vmatprep.subr.bf16.mxu1 %v11994_v37  ;;  %v12073_v24 = vld [vmem:[%s16057_s1 + $0x21c0] ss:$16 sps:$4 sm:$0xff]   ;;  %v12076_v37 = vld [vmem:[%s16057_s1 + $0x21c8] ss:$16 sps:$4 sm:$0xff]  }
 0x402   :  { %7870 = vmatmul.mubr.bf16.vlgmr.msra.gmra.mrb[0].mxu0 %v1399_v39  ;;  %8608 = vmatmul.mubr.bf16.vlgmr.msra.gmra.mrb[0].mxu1 %v1399_v39  ;;  %v12084_v39 = vld [vmem:[%s16057_s1 + $0x21ec] ss:$16 sps:$4 sm:$0xff]  }
 0x403   :  { %7879 = vmatpush1.bf16.msra.mxu0 %v11989_v25  ;;  %8617 = vmatpush1.bf16.msra.mxu1 %v11992_v40  ;;  %v12079_v25 = vld [vmem:[%s16057_s1 + $0x21e0] ss:$16 sps:$4 sm:$0xff]   ;;  %v12082_v40 = vld [vmem:[%s16057_s1 + $0x21e8] ss:$16 sps:$4 sm:$0xff]  }
 0x404   :  { %7880 = vmatprep.subr.bf16.mxu0 %v11997_v41  ;;  %8618 = vmatprep.subr.bf16.mxu1 %v12000_v32  ;;  %v12087_v41 = vld [vmem:[%s16057_s1 + $0x2204] ss:$16 sps:$4 sm:$0xff]   ;;  %v12090_v32 = vld [vmem:[%s16057_s1 + $0x220c] ss:$16 sps:$4 sm:$0xff]  }
 0x405   :  { %7910 = vmatprep.mubr.bf16.mxu0 %v15555_v34  ;;  %8648 = vmatprep.mubr.bf16.mxu1 %v15555_v34 }
 0x407   :  { %7881 = vmatpush1.bf16.msra.mxu0 %v11995_v43  ;;  %8619 = vmatpush1.bf16.msra.mxu1 %v11998_v45  ;;  %v15741_v43 = vrot.slane %v15524_v33, %v12412_v49  ;;  %v12085_v45 = vld [vmem:[%s16057_s1 + $0x2200] ss:$16 sps:$4 sm:$0xff]   ;;  %v12096_v49 = vld [vmem:[%s16057_s1 + $0x222c] ss:$16 sps:$4 sm:$0xff]   ;;  %v1425_v33 = vcombine.high %v15555_v34, %v15555_v34  ;;  %v12099_v34 = vld [vmem:[%s16057_s1 + $0x2244] ss:$16 sps:$4 sm:$0xff]  }
 0x408   :  { %7882 = vmatprep.subr.bf16.mxu0 %v12003_v46  ;;  %8620 = vmatprep.subr.bf16.mxu1 %v12006_v35  ;;  %v12088_v46 = vld [vmem:[%s16057_s1 + $0x2208] ss:$16 sps:$4 sm:$0xff]   ;;  %v12093_v35 = vld [vmem:[%s16057_s1 + $0x2224] ss:$16 sps:$4 sm:$0xff]  }
 0x40b   :  { %7883 = vmatpush1.bf16.msra.mxu0 %v12001_v50  ;;  %8621 = vmatpush1.bf16.msra.mxu1 %v12004_v51  ;;  %v12091_v50 = vld [vmem:[%s16057_s1 + $0x2220] ss:$16 sps:$4 sm:$0xff]   ;;  %v12094_v51 = vld [vmem:[%s16057_s1 + $0x2228] ss:$16 sps:$4 sm:$0xff]  }
 0x40c   :  { %7884 = vmatprep.subr.bf16.mxu0 %v12009_v53  ;;  %8622 = vmatprep.subr.bf16.mxu1 %v12012_v38  ;;  %v12102_v53 = vld [vmem:[%s16057_s1 + $0x224c] ss:$16 sps:$4 sm:$0xff]   ;;  %v12097_v38 = vld [vmem:[%s16057_s1 + $0x2240] ss:$16 sps:$4 sm:$0xff]  }
 0x40f   :  { %7885 = vmatpush1.bf16.msra.mxu0 %v12007_v54  ;;  %8623 = vmatpush1.bf16.msra.mxu1 %v12010_v55  ;;  %v12100_v54 = vld [vmem:[%s16057_s1 + $0x2248] ss:$16 sps:$4 sm:$0xff]   ;;  %v12105_v55 = vld [vmem:[%s16057_s1 + $0x2264] ss:$16 sps:$4 sm:$0xff]  }
 0x410   :  { %7886 = vmatprep.subr.bf16.mxu0 %v12015_v56  ;;  %8624 = vmatprep.subr.bf16.mxu1 %v12018_v47  ;;  %v12108_v56 = vld [vmem:[%s16057_s1 + $0x226c] ss:$16 sps:$4 sm:$0xff]   ;;  %v12103_v47 = vld [vmem:[%s16057_s1 + $0x2260] ss:$16 sps:$4 sm:$0xff]  }
 0x413   :  { %7887 = vmatpush1.bf16.msra.mxu0 %v12013_v57  ;;  %8625 = vmatpush1.bf16.msra.mxu1 %v12016_v58  ;;  %v12106_v57 = vld [vmem:[%s16057_s1 + $0x2268] ss:$16 sps:$4 sm:$0xff]   ;;  %v12111_v58 = vld [vmem:[%s16057_s1 + $0x2284] ss:$16 sps:$4 sm:$0xff]  }
 0x414   :  { %7888 = vmatprep.subr.bf16.mxu0 %v12021_v48  ;;  %8626 = vmatprep.subr.bf16.mxu1 %v12024_v61  ;;  %v12114_v48 = vld [vmem:[%s16057_s1 + $0x228c] ss:$16 sps:$4 sm:$0xff]   ;;  %v12109_v61 = vld [vmem:[%s16057_s1 + $0x2280] ss:$16 sps:$4 sm:$0xff]  }
 0x417   :  { %7889 = vmatpush1.bf16.msra.mxu0 %v12019_v62  ;;  %8627 = vmatpush1.bf16.msra.mxu1 %v12022_v44  ;;  %v12112_v62 = vld [vmem:[%s16057_s1 + $0x2288] ss:$16 sps:$4 sm:$0xff]   ;;  %v12117_v44 = vld [vmem:[%s16057_s1 + $0x22a4] ss:$16 sps:$4 sm:$0xff]  }
 0x418   :  { %7890 = vmatprep.subr.bf16.mxu0 %v12027_v0  ;;  %8628 = vmatprep.subr.bf16.mxu1 %v12030_v1  ;;  %v12120_v0 = vld [vmem:[%s16057_s1 + $0x22ac] ss:$16 sps:$4 sm:$0xff]   ;;  %v12115_v1 = vld [vmem:[%s16057_s1 + $0x22a0] ss:$16 sps:$4 sm:$0xff]  }
 0x41b   :  { %7891 = vmatpush1.bf16.msra.mxu0 %v12025_v2  ;;  %8629 = vmatpush1.bf16.msra.mxu1 %v12028_v59  ;;  %v12118_v2 = vld [vmem:[%s16057_s1 + $0x22a8] ss:$16 sps:$4 sm:$0xff]   ;;  %v12123_v59 = vld [vmem:[%s16057_s1 + $0x22c4] ss:$16 sps:$4 sm:$0xff]  }
 0x41c   :  { %7892 = vmatprep.subr.bf16.mxu0 %v12033_v3  ;;  %8630 = vmatprep.subr.bf16.mxu1 %v12036_v5  ;;  %v12126_v3 = vld [vmem:[%s16057_s1 + $0x22cc] ss:$16 sps:$4 sm:$0xff]   ;;  %v12121_v5 = vld [vmem:[%s16057_s1 + $0x22c0] ss:$16 sps:$4 sm:$0xff]  }
 0x41f   :  { %7893 = vmatpush1.bf16.msra.mxu0 %v12031_v6  ;;  %8631 = vmatpush1.bf16.msra.mxu1 %v12034_v60  ;;  %v12124_v6 = vld [vmem:[%s16057_s1 + $0x22c8] ss:$16 sps:$4 sm:$0xff]   ;;  %v12129_v60 = vld [vmem:[%s16057_s1 + $0x22e4] ss:$16 sps:$4 sm:$0xff]  }
 0x420   :  { %7894 = vmatprep.subr.bf16.mxu0 %v12039_v9  ;;  %8632 = vmatprep.subr.bf16.mxu1 %v12042_v11  ;;  %v12132_v9 = vld [vmem:[%s16057_s1 + $0x22ec] ss:$16 sps:$4 sm:$0xff]   ;;  %v12127_v11 = vld [vmem:[%s16057_s1 + $0x22e0] ss:$16 sps:$4 sm:$0xff]  }
 0x423   :  { %7895 = vmatpush1.bf16.msra.mxu0 %v12037_v63  ;;  %8633 = vmatpush1.bf16.msra.mxu1 %v12040_v12  ;;  %v12130_v63 = vld [vmem:[%s16057_s1 + $0x22e8] ss:$16 sps:$4 sm:$0xff]   ;;  %v12135_v12 = vld [vmem:[%s16057_s1 + $0x2304] ss:$16 sps:$4 sm:$0xff]  }
 0x424   :  { %7896 = vmatprep.subr.bf16.mxu0 %v12045_v52  ;;  %8634 = vmatprep.subr.bf16.mxu1 %v12048_v15  ;;  %v12138_v52 = vld [vmem:[%s16057_s1 + $0x230c] ss:$16 sps:$4 sm:$0xff]   ;;  %v12133_v15 = vld [vmem:[%s16057_s1 + $0x2300] ss:$16 sps:$4 sm:$0xff]  }
 0x427   :  { %7897 = vmatpush1.bf16.msra.mxu0 %v12043_v7  ;;  %8635 = vmatpush1.bf16.msra.mxu1 %v12046_v16  ;;  %v12136_v7 = vld [vmem:[%s16057_s1 + $0x2308] ss:$16 sps:$4 sm:$0xff]   ;;  %v12141_v16 = vld [vmem:[%s16057_s1 + $0x2324] ss:$16 sps:$4 sm:$0xff]  }
 0x428   :  { %7898 = vmatprep.subr.bf16.mxu0 %v12051_v17  ;;  %8636 = vmatprep.subr.bf16.mxu1 %v12054_v18  ;;  %v12144_v17 = vld [vmem:[%s16057_s1 + $0x232c] ss:$16 sps:$4 sm:$0xff]   ;;  %v12139_v18 = vld [vmem:[%s16057_s1 + $0x2320] ss:$16 sps:$4 sm:$0xff]  }
 0x42b   :  { %7899 = vmatpush1.bf16.msra.mxu0 %v12049_v8  ;;  %8637 = vmatpush1.bf16.msra.mxu1 %v12052_v20  ;;  %v12142_v8 = vld [vmem:[%s16057_s1 + $0x2328] ss:$16 sps:$4 sm:$0xff]   ;;  %v12147_v20 = vld [vmem:[%s16057_s1 + $0x2344] ss:$16 sps:$4 sm:$0xff]  }
 0x42c   :  { %7900 = vmatprep.subr.bf16.mxu0 %v12057_v23  ;;  %8638 = vmatprep.subr.bf16.mxu1 %v12060_v4  ;;  %v12150_v23 = vld [vmem:[%s16057_s1 + $0x234c] ss:$16 sps:$4 sm:$0xff]   ;;  %v12145_v4 = vld [vmem:[%s16057_s1 + $0x2340] ss:$16 sps:$4 sm:$0xff]  }
 0x42f   :  { %7901 = vmatpush1.bf16.msra.mxu0 %v12055_v13  ;;  %8639 = vmatpush1.bf16.msra.mxu1 %v12058_v10  ;;  %v12148_v13 = vld [vmem:[%s16057_s1 + $0x2348] ss:$16 sps:$4 sm:$0xff]   ;;  %v12153_v10 = vld [vmem:[%s16057_s1 + $0x2364] ss:$16 sps:$4 sm:$0xff]  }
 0x430   :  { %7902 = vmatprep.subr.bf16.mxu0 %v12063_v27  ;;  %8640 = vmatprep.subr.bf16.mxu1 %v12066_v28  ;;  %v12156_v27 = vld [vmem:[%s16057_s1 + $0x236c] ss:$16 sps:$4 sm:$0xff]   ;;  %v12151_v28 = vld [vmem:[%s16057_s1 + $0x2360] ss:$16 sps:$4 sm:$0xff]  }
 0x433   :  { %7903 = vmatpush1.bf16.msra.mxu0 %v12061_v29  ;;  %8641 = vmatpush1.bf16.msra.mxu1 %v12064_v19  ;;  %v12154_v29 = vld [vmem:[%s16057_s1 + $0x2368] ss:$16 sps:$4 sm:$0xff]   ;;  %v12159_v19 = vld [vmem:[%s16057_s1 + $0x2384] ss:$16 sps:$4 sm:$0xff]  }
 0x434   :  { %7904 = vmatprep.subr.bf16.mxu0 %v12069_v14  ;;  %8642 = vmatprep.subr.bf16.mxu1 %v12072_v30  ;;  %v12162_v14 = vld [vmem:[%s16057_s1 + $0x238c] ss:$16 sps:$4 sm:$0xff]   ;;  %v12157_v30 = vld [vmem:[%s16057_s1 + $0x2380] ss:$16 sps:$4 sm:$0xff]  }
 0x437   :  { %7905 = vmatpush1.bf16.msra.mxu0 %v12067_v31  ;;  %8643 = vmatpush1.bf16.msra.mxu1 %v12070_v22  ;;  %v12160_v31 = vld [vmem:[%s16057_s1 + $0x2388] ss:$16 sps:$4 sm:$0xff]   ;;  %v12165_v22 = vld [vmem:[%s16057_s1 + $0x23a4] ss:$16 sps:$4 sm:$0xff]  }
 0x438   :  { %7906 = vmatprep.subr.bf16.mxu0 %v12075_v26  ;;  %8644 = vmatprep.subr.bf16.mxu1 %v12078_v36  ;;  %v12168_v26 = vld [vmem:[%s16057_s1 + $0x23ac] ss:$16 sps:$4 sm:$0xff]   ;;  %v12163_v36 = vld [vmem:[%s16057_s1 + $0x23a0] ss:$16 sps:$4 sm:$0xff]  }
 0x43b   :  { %7907 = vmatpush1.bf16.msra.mxu0 %v12073_v24  ;;  %8645 = vmatpush1.bf16.msra.mxu1 %v12076_v37  ;;  %v12166_v24 = vld [vmem:[%s16057_s1 + $0x23a8] ss:$16 sps:$4 sm:$0xff]   ;;  %v12171_v37 = vld [vmem:[%s16057_s1 + $0x23c4] ss:$16 sps:$4 sm:$0xff]  }
 0x43c   :  { %7908 = vmatprep.subr.bf16.mxu0 %v12081_v21  ;;  %8646 = vmatprep.subr.bf16.mxu1 %v12084_v39  ;;  %v12174_v21 = vld [vmem:[%s16057_s1 + $0x23cc] ss:$16 sps:$4 sm:$0xff]   ;;  %v12169_v39 = vld [vmem:[%s16057_s1 + $0x23c0] ss:$16 sps:$4 sm:$0xff]  }
 0x43f   :  { %7909 = vmatpush1.bf16.msra.mxu0 %v12079_v25  ;;  %8647 = vmatpush1.bf16.msra.mxu1 %v12082_v40  ;;  %v12172_v25 = vld [vmem:[%s16057_s1 + $0x23c8] ss:$16 sps:$4 sm:$0xff]   ;;  %v12177_v40 = vld [vmem:[%s16057_s1 + $0x23e4] ss:$16 sps:$4 sm:$0xff]  }
 0x440   :  { %7919 = vmatprep.subr.bf16.mxu0 %v12087_v41  ;;  %8657 = vmatprep.subr.bf16.mxu1 %v12090_v32  ;;  %v12180_v41 = vld [vmem:[%s16057_s1 + $0x23ec] ss:$16 sps:$4 sm:$0xff]   ;;  %v12175_v32 = vld [vmem:[%s16057_s1 + $0x23e0] ss:$16 sps:$4 sm:$0xff]  }
 0x442   :  { %7911 = vmatmul.mubr.bf16.vlgmr.msra.gmra.mrb[0].mxu0 %v15741_v43  ;;  %8649 = vmatmul.mubr.bf16.vlgmr.msra.gmra.mrb[0].mxu1 %v15741_v43 }
 0x443   :  { %7920 = vmatpush1.bf16.msra.mxu0 %v12085_v45  ;;  %8658 = vmatpush1.bf16.msra.mxu1 %v12088_v46  ;;  %v12178_v45 = vld [vmem:[%s16057_s1 + $0x23e8] ss:$16 sps:$4 sm:$0xff]   ;;  %v12181_v46 = vld [vmem:[%s16059_s3 + $0x40] sm:$0xff]  }
 0x444   :  { %7921 = vmatprep.subr.bf16.mxu0 %v12093_v35  ;;  %8659 = vmatprep.subr.bf16.mxu1 %v12096_v49  ;;  %v12182_v35 = vld [vmem:[%s16059_s3 + $0xc0] sm:$0xff]   ;;  %v1424_v49 = vcombine.high %v15741_v43, %v15741_v43  ;;  %v12186_v43 = vld [vmem:[%s16059_s3 + $0xc8] sm:$0xff]  }
 0x445   :  { %7951 = vmatprep.mubr.bf16.mxu0 %v1425_v33  ;;  %8689 = vmatprep.mubr.bf16.mxu1 %v1425_v33  ;;  %v12183_v33 = vld [vmem:[%s16059_s3] sm:$0xff]  }
 0x447   :  { %7922 = vmatpush1.bf16.msra.mxu0 %v12091_v50  ;;  %8660 = vmatpush1.bf16.msra.mxu1 %v12094_v51  ;;  %v12184_v50 = vld [vmem:[%s16059_s3 + $0x80] sm:$0xff]   ;;  %v12185_v51 = vld [vmem:[%s16059_s3 + $0x48] sm:$0xff]  }
 0x448   :  { %7923 = vmatprep.subr.bf16.mxu0 %v12099_v34  ;;  %8661 = vmatprep.subr.bf16.mxu1 %v12102_v53  ;;  %v12187_v34 = vld [vmem:[%s16059_s3 + $0x8] sm:$0xff]  }
 0x449   :  { %v12188_v53 = vld [vmem:[%s16059_s3 + $0x88] sm:$0xff]  }
 0x44b   :  { %7924 = vmatpush1.bf16.msra.mxu0 %v12097_v38  ;;  %8662 = vmatpush1.bf16.msra.mxu1 %v12100_v54  ;;  %v12189_v38 = vld [vmem:[%s16059_s3 + $0x50] sm:$0xff]  }
 0x44c   :  { %7925 = vmatprep.subr.bf16.mxu0 %v12105_v55  ;;  %8663 = vmatprep.subr.bf16.mxu1 %v12108_v56  ;;  %v12190_v54 = vld [vmem:[%s16059_s3 + $0xd0] sm:$0xff]  }
 0x44d   :  { %v12191_v55 = vld [vmem:[%s16059_s3 + $0x10] sm:$0xff]  }
 0x44e   :  { %v12192_v56 = vld [vmem:[%s16059_s3 + $0x90] sm:$0xff]  }
 0x44f   :  { %7926 = vmatpush1.bf16.msra.mxu0 %v12103_v47  ;;  %8664 = vmatpush1.bf16.msra.mxu1 %v12106_v57  ;;  %v12193_v47 = vld [vmem:[%s16059_s3 + $0x58] sm:$0xff]  }
 0x450   :  { %7927 = vmatprep.subr.bf16.mxu0 %v12111_v58  ;;  %8665 = vmatprep.subr.bf16.mxu1 %v12114_v48  ;;  %v12194_v57 = vld [vmem:[%s16059_s3 + $0xd8] sm:$0xff]  }
 0x451   :  { %v12195_v58 = vld [vmem:[%s16059_s3 + $0x18] sm:$0xff]  }
 0x452   :  { %v12196_v48 = vld [vmem:[%s16059_s3 + $0x98] sm:$0xff]  }
 0x453   :  { %7928 = vmatpush1.bf16.msra.mxu0 %v12109_v61  ;;  %8666 = vmatpush1.bf16.msra.mxu1 %v12112_v62  ;;  %v12197_v61 = vld [vmem:[%s16059_s3 + $0x60] sm:$0xff]  }
 0x454   :  { %7929 = vmatprep.subr.bf16.mxu0 %v12117_v44  ;;  %8667 = vmatprep.subr.bf16.mxu1 %v12120_v0  ;;  %v12198_v62 = vld [vmem:[%s16059_s3 + $0xe0] sm:$0xff]  }
 0x455   :  { %v12199_v44 = vld [vmem:[%s16059_s3 + $0x20] sm:$0xff]  }
 0x456   :  { %v12200_v0 = vld [vmem:[%s16059_s3 + $0xa0] sm:$0xff]  }
 0x457   :  { %7930 = vmatpush1.bf16.msra.mxu0 %v12115_v1  ;;  %8668 = vmatpush1.bf16.msra.mxu1 %v12118_v2  ;;  %v12201_v1 = vld [vmem:[%s16059_s3 + $0x68] sm:$0xff]  }
 0x458   :  { %7931 = vmatprep.subr.bf16.mxu0 %v12123_v59  ;;  %8669 = vmatprep.subr.bf16.mxu1 %v12126_v3  ;;  %v12202_v2 = vld [vmem:[%s16059_s3 + $0xe8] sm:$0xff]  }
 0x459   :  { %v12203_v59 = vld [vmem:[%s16059_s3 + $0x28] sm:$0xff]  }
 0x45a   :  { %v12204_v3 = vld [vmem:[%s16059_s3 + $0xa8] sm:$0xff]  }
 0x45b   :  { %7932 = vmatpush1.bf16.msra.mxu0 %v12121_v5  ;;  %8670 = vmatpush1.bf16.msra.mxu1 %v12124_v6  ;;  %v12205_v5 = vld [vmem:[%s16059_s3 + $0x70] sm:$0xff]  }
 0x45c   :  { %7933 = vmatprep.subr.bf16.mxu0 %v12129_v60  ;;  %8671 = vmatprep.subr.bf16.mxu1 %v12132_v9  ;;  %v12206_v6 = vld [vmem:[%s16059_s3 + $0xf0] sm:$0xff]  }
 0x45d   :  { %v12207_v60 = vld [vmem:[%s16059_s3 + $0x30] sm:$0xff]  }
 0x45e   :  { %v12208_v9 = vld [vmem:[%s16059_s3 + $0xb0] sm:$0xff]  }
 0x45f   :  { %7934 = vmatpush1.bf16.msra.mxu0 %v12127_v11  ;;  %8672 = vmatpush1.bf16.msra.mxu1 %v12130_v63  ;;  %v12209_v11 = vld [vmem:[%s16059_s3 + $0x78] sm:$0xff]  }
 0x460   :  { %7935 = vmatprep.subr.bf16.mxu0 %v12135_v12  ;;  %8673 = vmatprep.subr.bf16.mxu1 %v12138_v52  ;;  %v12210_v63 = vld [vmem:[%s16059_s3 + $0xf8] sm:$0xff]  }
 0x461   :  { %v12211_v12 = vld [vmem:[%s16059_s3 + $0x38] sm:$0xff]  }
 0x462   :  { %v12212_v52 = vld [vmem:[%s16059_s3 + $0xb8] sm:$0xff]  }
 0x463   :  { %7936 = vmatpush1.bf16.msra.mxu0 %v12133_v15  ;;  %8674 = vmatpush1.bf16.msra.mxu1 %v12136_v7  ;;  %v1183_v15 = vsub.s32 0, %v12394_v42  ;;  %v1191_v7 = vsub.s32 2, %v12394_v42 }
 0x464   :  { %7937 = vmatprep.subr.bf16.mxu0 %v12141_v16  ;;  %8675 = vmatprep.subr.bf16.mxu1 %v12144_v17  ;;  %v1179_v16 = vld [vmem:[%s16058_s2] sm:$0xf]  ;;  %v1187_v17 = vsub.s32 1, %v12394_v42 }
 0x467   :  { %7938 = vmatpush1.bf16.msra.mxu0 %v12139_v18  ;;  %8676 = vmatpush1.bf16.msra.mxu1 %v12142_v8  ;;  %v1195_v18 = vsub.s32 3, %v12394_v42  ;;  %v1184_v8 = vrot.slane %v1179_v16, %v1183_v15 }
 0x468   :  { %7939 = vmatprep.subr.bf16.mxu0 %v12147_v20  ;;  %8677 = vmatprep.subr.bf16.mxu1 %v12150_v23  ;;  %v1192_v20 = vrot.slane %v1179_v16, %v1191_v7  ;;  %v1188_v23 = vrot.slane %v1179_v16, %v1187_v17 }
 0x46b   :  { %7940 = vmatpush1.bf16.msra.mxu0 %v12145_v4  ;;  %8678 = vmatpush1.bf16.msra.mxu1 %v12148_v13  ;;  %v1196_v4 = vrot.slane %v1179_v16, %v1195_v18 }
 0x46c   :  { %7941 = vmatprep.subr.bf16.mxu0 %v12153_v10  ;;  %8679 = vmatprep.subr.bf16.mxu1 %v12156_v27 }
 0x46f   :  { %7942 = vmatpush1.bf16.msra.mxu0 %v12151_v28  ;;  %8680 = vmatpush1.bf16.msra.mxu1 %v12154_v29 }
 0x470   :  { %7943 = vmatprep.subr.bf16.mxu0 %v12159_v19  ;;  %8681 = vmatprep.subr.bf16.mxu1 %v12162_v14 }
 0x473   :  { %7944 = vmatpush1.bf16.msra.mxu0 %v12157_v30  ;;  %8682 = vmatpush1.bf16.msra.mxu1 %v12160_v31 }
 0x474   :  { %7945 = vmatprep.subr.bf16.mxu0 %v12165_v22  ;;  %8683 = vmatprep.subr.bf16.mxu1 %v12168_v26 }
 0x477   :  { %7946 = vmatpush1.bf16.msra.mxu0 %v12163_v36  ;;  %8684 = vmatpush1.bf16.msra.mxu1 %v12166_v24 }
 0x478   :  { %7947 = vmatprep.subr.bf16.mxu0 %v12171_v37  ;;  %8685 = vmatprep.subr.bf16.mxu1 %v12174_v21 }
 0x47b   :  { %7948 = vmatpush1.bf16.msra.mxu0 %v12169_v39  ;;  %8686 = vmatpush1.bf16.msra.mxu1 %v12172_v25 }
 0x47c   :  { %7949 = vmatprep.subr.bf16.mxu0 %v12177_v40  ;;  %8687 = vmatprep.subr.bf16.mxu1 %v12180_v41 }
 0x47f   :  { %7950 = vmatpush1.bf16.msra.mxu0 %v12175_v32  ;;  %8688 = vmatpush1.bf16.msra.mxu1 %v12178_v45 }
 0x480   :  { %10263 = vmatprep.subr.bf16.mxu0 %v12181_v46  ;;  %10285 = vmatprep.subr.bf16.mxu1 %v12182_v35  ;;  %v10230_v46 = vld [vmem:[%s16060_s4] ss:$0 sm:$0xff]  ;;  %s12246_s4 = smov [#allocation2]  }
 0x481   :  { %s9069_s11 = sshll.u32 %s12246_s4, 4  ;;  %s9070_s11 = int_to_ptr.vmem [resolvable:$true] %s9069_s11 }
 0x482   :  { %7952 = vmatmul.mubr.bf16.vlgmr.msra.gmra.mrb[0].mxu0 %v1424_v49  ;;  %8690 = vmatmul.mubr.bf16.vlgmr.msra.gmra.mrb[0].mxu1 %v1424_v49  ;;  %s12221_s12 = scalar_lea.vmem %s9070_s11, 32  ;;  %p12226_p1 = scmp.lt.s32.totalorder %s9070_s11, %s9070_s11 }
 0x483   :  { %10264 = vmatpush3.bf16.msra.mxu0 %v12183_v33  ;;  %10286 = vmatpush3.bf16.msra.mxu1 %v12184_v50  ;;  %p12222_p0 = scmp.ne.s32.totalorder %s9070_s11, %s12221_s12  ;;  %p12227_p2 = scmp.lt.s32.totalorder %s12221_s12, %s12221_s12 }
 0x484   :  { %10265 = vmatprep.subr.bf16.mxu0 %v12185_v51  ;;  %10287 = vmatprep.subr.bf16.mxu1 %v12186_v43 }
 0x485   :  { %p12228_p3 = por %p12227_p2, %p12226_p1 }
 0x487   :  { %10266 = vmatpush3.bf16.msra.mxu0 %v12187_v34  ;;  %10288 = vmatpush3.bf16.msra.mxu1 %v12188_v53  ;;  %p12229_p4 = pnand %p12228_p3, %p12222_p0 }
 0x488   :  { %10267 = vmatprep.subr.bf16.mxu0 %v12189_v38  ;;  %10289 = vmatprep.subr.bf16.mxu1 %v12190_v54 }
 0x48b   :  { %10268 = vmatpush3.bf16.msra.mxu0 %v12191_v55  ;;  %10290 = vmatpush3.bf16.msra.mxu1 %v12192_v56 }
 0x48c   :  { %10269 = vmatprep.subr.bf16.mxu0 %v12193_v47  ;;  %10291 = vmatprep.subr.bf16.mxu1 %v12194_v57 }
 0x48f   :  { %10270 = vmatpush3.bf16.msra.mxu0 %v12195_v58  ;;  %10292 = vmatpush3.bf16.msra.mxu1 %v12196_v48 }
 0x490   :  { %10271 = vmatprep.subr.bf16.mxu0 %v12197_v61  ;;  %10293 = vmatprep.subr.bf16.mxu1 %v12198_v62 }
 0x493   :  { %10272 = vmatpush3.bf16.msra.mxu0 %v12199_v44  ;;  %10294 = vmatpush3.bf16.msra.mxu1 %v12200_v0 }
 0x494   :  { %10273 = vmatprep.subr.bf16.mxu0 %v12201_v1  ;;  %10295 = vmatprep.subr.bf16.mxu1 %v12202_v2 }
 0x497   :  { %10274 = vmatpush3.bf16.msra.mxu0 %v12203_v59  ;;  %10296 = vmatpush3.bf16.msra.mxu1 %v12204_v3 }
 0x498   :  { %10275 = vmatprep.subr.bf16.mxu0 %v12205_v5  ;;  %10297 = vmatprep.subr.bf16.mxu1 %v12206_v6 }
 0x49b   :  { %10276 = vmatpush3.bf16.msra.mxu0 %v12207_v60  ;;  %10298 = vmatpush3.bf16.msra.mxu1 %v12208_v9 }
 0x49c   :  { %10277 = vmatprep.subr.bf16.mxu0 %v12209_v11  ;;  %10299 = vmatprep.subr.bf16.mxu1 %v12210_v63 }
 0x49f   :  { %10278 = vmatpush3.bf16.msra.mxu0 %v12211_v12  ;;  %10300 = vmatpush3.bf16.msra.mxu1 %v12212_v52 }
 0x555   :  { %v7953_v13 = vpop.f32.mrb[0].mxu0  ;;  %v8691_v10 = vpop.f32.mrb[0].mxu1 }
 0x556   :  { %v10307_v27 = vadd.f32 %v7953_v13, %v1184_v8  ;;  %v10309_v28 = vadd.f32 %v8691_v10, %v1192_v20  ;;  %v7955_v29 = vpop.f32.mrb[1].mxu0  ;;  %v8693_v19 = vpop.f32.mrb[1].mxu1 }
 0x557   :  { %v10308_v14 = vadd.f32 %v7955_v29, %v1188_v23  ;;  %v10310_v30 = vadd.f32 %v8693_v19, %v1196_v4  ;;  %v7957_v31 = vpop.f32.mrb[2].mxu0  ;;  %v8695_v22 = vpop.f32.mrb[2].mxu1 }
 0x558   :  { %v8698_v26 = vmax.f32 %v10307_v27, 0.0  ;;  %v8700_v36 = vmax.f32 %v10309_v28, 0.0  ;;  %v7958_v24 = vpop.f32.mrb[3].mxu0  ;;  %v8696_v37 = vpop.f32.mrb[3].mxu1 }
 0x559   :  { %v8699_v21 = vmax.f32 %v10308_v14, 0.0  ;;  %v8701_v42 = vmax.f32 %v10310_v30, 0.0 }
 0x55a   :  { %v8702_v40 = vpack.c.bf16 %v8698_v26, %v8698_v26  ;;  %v8704_v41 = vpack.c.bf16 %v8700_v36, %v8700_v36 }
 0x55b   :  { %v8703_v39 = vpack.c.bf16 %v8699_v21, %v8699_v21  ;;  %v8705_v25 = vpack.c.bf16 %v8701_v42, %v8701_v42 }
 0x55d   :  { %9001 = vmatprep.mubr.bf16.mxu0 %v8703_v39  ;;  %9041 = vmatprep.mubr.bf16.mxu1 %v8705_v25 }
 0x55e   :  { %9002 = vmatmul.mubr.bf16.vlgmr.msra.gmra.mrb[4].mxu0 %v8702_v40  ;;  %9042 = vmatmul.mubr.bf16.vlgmr.msra.gmra.mrb[4].mxu1 %v8704_v41 }
 0x631   :  { %v10279_v32 = vpop.f32.mrb[4].mxu0  ;;  %v10301_v45 = vpop.f32.mrb[4].mxu1 }
 0x632   :  { %v10280_v35 = vpop.f32.mrb[5].mxu0  ;;  %v10302_v49 = vpop.f32.mrb[5].mxu1 }
 0x633   :  { %v10281_v33 = vadd.f32 %v10280_v35, %v10279_v32  ;;  %v10303_v50 = vadd.f32 %v10302_v49, %v10301_v45  ;;  %v10282_v51 = vpop.f32.mrb[6].mxu0  ;;  %v10304_v43 = vpop.f32.mrb[6].mxu1 }
 0x634   :  { %v10283_v34 = vpop.f32.mrb[7].mxu0  ;;  %v10305_v53 = vpop.f32.mrb[7].mxu1 }
 0x635   :  { %v9004_v38 = vadd.f32 %v10281_v33, %v10230_v46 }
 0x637   :  { %v9044_v54 = vadd.f32 %v10303_v50, %v9004_v38 }
 0x639   :  { %v9050_v55 = vsel %vm9049_vm0, %v9044_v54, -inf }
 0x63a   :  { %9051 = vmax.xlane.f32.xlu0 %v9050_v55 }
 0x6c7   :  { %v9052_v56 = vpop.xlane.xlu0 %9051 }
 0x6c8   :  { %v9053_v47 = vsub.f32 %v9044_v54, %v9052_v56 }
 0x6ca   :  { %v9054_v57 = vmul.f32 1.442695, %v9053_v47 }
 0x6cc   :  { %12213 = vpow2.f32 %v9054_v57 }
 0x6d6   :  { %v12214_v58 = vpop.eup %12213 }
 0x6d7   :  { %v9056_v48 = vsel %vm9049_vm0, %v12214_v58, 0.0 }
 0x6d8   :  { %9057 = vadd.xlane.f32.xlu0 %v9056_v48 }
 0x765   :  { %v9058_v61 = vpop.xlane.xlu0 %9057 }
 0x766   :  { %12215 = vlog2.f32 %v9058_v61 }
 0x770   :  { %v12216_v62 = vpop.eup %12215 }
 0x771   :  { %v9060_v44 = vmul.f32 0.6931472, %v12216_v62 }
 0x773   :  { %v9061_v0 = vsub.f32 %v9053_v47, %v9060_v44 }
 0x775   :  { %9062 = vst.msk [vmem:[#allocation2] sm:$0x3] %vm9049_vm0, %v9061_v0 }
 0x776   :  { %12232 = shalt.err (!%p12229_p4)
}
 0x777   :  { %s12233_s15 = scalar_lea.hbm %s16061_s5, 32 }
 0x778   :  { %p12234_p5 = scmp.ne.s32.totalorder %s16061_s5, %s12233_s15  ;;  %p12237_p6 = scmp.lt.u32.totalorder %s12233_s15, %s16061_s5 }
 0x77a   :  { %p12239_p7 = pnand %p12237_p6, %p12234_p5 }
 0x77c   :  { %12242 = shalt.err (!%p12239_p7)
}
 0x77d   :  { %9072 = dma.vmem_to_hbm [thread:$0]  %s9070_s11, 32, %s16061_s5, [#allocation3]  }
 0x77e   :  { %12243 = dma.done.wait [#allocation3], 32  }
 0x77f   :  { %12244 = vsyncadd [#allocation3], 4294967264 }
 0x780   :  { %9076 = vsyncpa [#allocation3], 1 }

</bundles_post_ra>
